<compile_context>
chip_gen: v7x
topology: tpu7x:2x2x1
jax: 0.10.0
libtpu: 0.0.40
codegen_flags: <defaults>
</compile_context>

<pallas_src>
import functools

import jax
import jax.numpy as jnp
from jax.experimental import pallas as pl
from jax.experimental.pallas import tpu as pltpu

HIDDEN = 512
NUM_BRANCH = 3


def _silu(x):
    return x * jax.nn.sigmoid(x)


def _round_up(x, m):
    return ((x + m - 1) // m) * m


def position_net_kernel(x_ref, mask_ref, null_ref,
                        w1_ref, b1_ref, w2_ref, b2_ref, w3_ref, b3_ref,
                        o_ref, *, out_pad):
    # x_ref:    (tm, in_dim)            f32
    # mask_ref: (tm, 1)                 f32
    # null_ref: (1, in_dim)             f32
    # w1_ref:   (in_dim, 3*HIDDEN)      bf16   (branch-packed)
    # b1_ref:   (1, 3*HIDDEN)           f32
    # w2_ref:   (3, HIDDEN, HIDDEN)     bf16
    # b2_ref:   (3, 1, HIDDEN)          f32
    # w3_ref:   (3, HIDDEN, out_pad)    bf16
    # b3_ref:   (3, 1, out_pad)         f32
    # o_ref:    (tm, 3*out_pad)         f32   (branch-interleaved, lane-dense)
    x = x_ref[...].astype(jnp.float32)
    m = mask_ref[...].astype(jnp.float32)
    null = null_ref[...].astype(jnp.float32)

    # masked mix: mask * x + (1 - mask) * null_audio_feature  (once per tile)
    x_eff = m * x + (1.0 - m) * null                     # (tm, in_dim) f32
    x_bf = x_eff.astype(jnp.bfloat16)

    # Fused first layer across the 3 branches: (tm, in_dim) @ (in_dim, 3*512)
    h1 = jnp.dot(x_bf, w1_ref[...], preferred_element_type=jnp.float32)
    h1 = _silu(h1 + b1_ref[...])                         # (tm, 3*HIDDEN) f32

    for br in range(NUM_BRANCH):
        hb = h1[:, br * HIDDEN:(br + 1) * HIDDEN].astype(jnp.bfloat16)
        h2 = jnp.dot(hb, w2_ref[br], preferred_element_type=jnp.float32)
        h2 = _silu(h2 + b2_ref[br])                      # (tm, HIDDEN) f32
        out = jnp.dot(h2.astype(jnp.bfloat16), w3_ref[br],
                      preferred_element_type=jnp.float32) + b3_ref[br]
        # 128-aligned, lane-dense store of this branch's slice.
        o_ref[:, br * out_pad:(br + 1) * out_pad] = out.astype(o_ref.dtype)


def position_net_forward(audio_embeddings, mask, params, *, row_tile=256):
    """audio_embeddings: (B, N, in_dim) f32, mask: (B,) f32 -> (B, N*3, out_dim)."""
    B, N, in_dim = audio_embeddings.shape
    out_dim = params["w3"].shape[-1]
    M = B * N

    out_pad = _round_up(out_dim, 128)
    tm = min(row_tile, _round_up(M, 8))
    M_pad = _round_up(M, tm)

    # --- inputs ---------------------------------------------------------
    x = audio_embeddings.reshape(M, in_dim).astype(jnp.float32)
    mask_rows = jnp.broadcast_to(mask.astype(jnp.float32)[:, None, None],
                                 (B, N, 1)).reshape(M, 1)
    if M_pad != M:
        x = jnp.pad(x, ((0, M_pad - M), (0, 0)))
        mask_rows = jnp.pad(mask_rows, ((0, M_pad - M), (0, 0)))
    null = params["null"].reshape(1, in_dim).astype(jnp.float32)

    # --- weights: branch-pack W1, bf16 matmul weights, padded W3/b3 ------
    # (in_dim, 3*HIDDEN): branch-major packing along the output dim.
    w1p = jnp.transpose(params["w1"], (1, 0, 2)).reshape(in_dim, NUM_BRANCH * HIDDEN)
    b1p = params["b1"].reshape(1, NUM_BRANCH * HIDDEN).astype(jnp.float32)
    w2 = params["w2"].astype(jnp.bfloat16)
    b2 = params["b2"].reshape(NUM_BRANCH, 1, HIDDEN).astype(jnp.float32)
    w3 = params["w3"]
    b3 = params["b3"].reshape(NUM_BRANCH, 1, out_dim)
    if out_pad != out_dim:
        w3 = jnp.pad(w3, ((0, 0), (0, 0), (0, out_pad - out_dim)))
        b3 = jnp.pad(b3, ((0, 0), (0, 0), (0, out_pad - out_dim)))
    w1p = w1p.astype(jnp.bfloat16)
    w3 = w3.astype(jnp.bfloat16)
    b3 = b3.astype(jnp.float32)

    grid = (M_pad // tm,)
    kernel = functools.partial(position_net_kernel, out_pad=out_pad)

    out_flat = pl.pallas_call(
        kernel,
        out_shape=jax.ShapeDtypeStruct((M_pad, NUM_BRANCH * out_pad), jnp.float32),
        grid_spec=pltpu.PrefetchScalarGridSpec(
            num_scalar_prefetch=0,
            grid=grid,
            in_specs=[
                pl.BlockSpec((tm, in_dim), lambda i: (i, 0)),               # x
                pl.BlockSpec((tm, 1), lambda i: (i, 0)),                    # mask rows
                pl.BlockSpec((1, in_dim), lambda i: (0, 0)),                # null
                pl.BlockSpec((in_dim, NUM_BRANCH * HIDDEN), lambda i: (0, 0)),   # w1 packed
                pl.BlockSpec((1, NUM_BRANCH * HIDDEN), lambda i: (0, 0)),        # b1 packed
                pl.BlockSpec((NUM_BRANCH, HIDDEN, HIDDEN), lambda i: (0, 0, 0)), # w2
                pl.BlockSpec((NUM_BRANCH, 1, HIDDEN), lambda i: (0, 0, 0)),      # b2
                pl.BlockSpec((NUM_BRANCH, HIDDEN, out_pad), lambda i: (0, 0, 0)),# w3
                pl.BlockSpec((NUM_BRANCH, 1, out_pad), lambda i: (0, 0, 0)),     # b3
            ],
            out_specs=pl.BlockSpec((tm, NUM_BRANCH * out_pad), lambda i: (i, 0)),
        ),
        compiler_params=pltpu.CompilerParams(
            dimension_semantics=("parallel",),
            vmem_limit_bytes=32 * 1024 * 1024,
        ),
    )(x, mask_rows, null, w1p, b1p, w2, b2, w3, b3)

    # (M_pad, 3*out_pad) -> (M, 3, out_pad) -> slice padded lanes -> (B, N*3, C)
    objs = out_flat[:M].reshape(M, NUM_BRANCH, out_pad)
    if out_pad != out_dim:
        objs = objs[:, :, :out_dim]
    return objs.reshape(B, N * NUM_BRANCH, out_dim)


def init_params(key, in_dim, out_dim):
    """Deterministic synthetic parameters (3 stacked branches)."""
    ks = jax.random.split(key, 6)
    scale = 0.02
    params = {
        "w1": scale * jax.random.normal(ks[0], (3, in_dim, HIDDEN), jnp.float32),
        "b1": scale * jax.random.normal(ks[1], (3, HIDDEN), jnp.float32),
        "w2": scale * jax.random.normal(ks[2], (3, HIDDEN, HIDDEN), jnp.float32),
        "b2": scale * jax.random.normal(ks[3], (3, HIDDEN), jnp.float32),
        "w3": scale * jax.random.normal(ks[4], (3, HIDDEN, out_dim), jnp.float32),
        "b3": scale * jax.random.normal(ks[5], (3, out_dim), jnp.float32),
        # nn.Parameter(torch.zeros([in_dim]))
        "null": jnp.zeros((in_dim,), jnp.float32),
    }
    return params


def reference_forward(audio_embeddings, mask, params):
    """Pure-JAX f32 reference mirroring the PyTorch forward."""
    m = mask.astype(jnp.float32)[:, None, None]
    x = m * audio_embeddings + (1.0 - m) * params["null"][None, None, :]

    def mlp(i):
        h = x @ params["w1"][i] + params["b1"][i]
        h = _silu(h)
        h = h @ params["w2"][i] + params["b2"][i]
        h = _silu(h)
        return h @ params["w3"][i] + params["b3"][i]

    o1, o2, o3 = mlp(0), mlp(1), mlp(2)
    B, N, C = o1.shape
    return jnp.stack([o1, o2, o3], axis=2).reshape(B, N * 3, C)


if __name__ == "__main__":
    key = jax.random.PRNGKey(0)
    k_emb, k_mask, k_par = jax.random.split(key, 3)

    B, N, in_dim, out_dim = 2, 8, 32, 64
    audio_embeddings = jax.random.normal(k_emb, (B, N, in_dim), jnp.float32)
    # mask of 0/1 per batch element (one masked, one kept)
    mask = jnp.array([1.0, 0.0], dtype=jnp.float32)

    params = init_params(k_par, in_dim, out_dim)

    out = position_net_forward(audio_embeddings, mask, params)
    out = jax.block_until_ready(out)

    ref = reference_forward(audio_embeddings, mask, params)
    assert out.shape == (B, N * 3, out_dim), out.shape
    # bf16 matmuls (f32 accumulation) -> relaxed tolerance vs f32 reference.
    assert jnp.allclose(out, ref, atol=5e-3, rtol=5e-2), \
        float(jnp.max(jnp.abs(out - ref)))

    print("KERNEL_OK")
</pallas_src>

<mosaic_0001>
module attributes {stable_mosaic.version = 11 : i64} {
  func.func @position_net_kernel(%arg0: i32, %arg1: memref<16x32xf32, #tpu.memory_space<vmem>>, %arg2: memref<16x1xf32, #tpu.memory_space<vmem>>, %arg3: memref<1x32xf32, #tpu.memory_space<vmem>>, %arg4: memref<32x1536xbf16, #tpu.memory_space<vmem>>, %arg5: memref<1x1536xf32, #tpu.memory_space<vmem>>, %arg6: memref<3x512x512xbf16, #tpu.memory_space<vmem>>, %arg7: memref<3x1x512xf32, #tpu.memory_space<vmem>>, %arg8: memref<3x512x128xbf16, #tpu.memory_space<vmem>>, %arg9: memref<3x1x128xf32, #tpu.memory_space<vmem>>, %arg10: memref<16x384xf32, #tpu.memory_space<vmem>>) attributes {dimension_semantics = [#tpu.dimension_semantics<parallel>], iteration_bounds = array<i64: 1>, scalar_prefetch = 0 : i64, scratch_operands = 0 : i64, tpu.core_type = #tpu.core_type<tc>, window_params = [{transform_indices = @transform_0, window_bounds = array<i64: 16, 32>}, {transform_indices = @transform_1, window_bounds = array<i64: 16, 1>}, {pipeline_mode = #tpu.pipeline_mode<synchronous>, transform_indices = @transform_2, window_bounds = array<i64: 1, 32>}, {pipeline_mode = #tpu.pipeline_mode<synchronous>, transform_indices = @transform_3, window_bounds = array<i64: 32, 1536>}, {pipeline_mode = #tpu.pipeline_mode<synchronous>, transform_indices = @transform_4, window_bounds = array<i64: 1, 1536>}, {pipeline_mode = #tpu.pipeline_mode<synchronous>, transform_indices = @transform_5, window_bounds = array<i64: 3, 512, 512>}, {pipeline_mode = #tpu.pipeline_mode<synchronous>, transform_indices = @transform_6, window_bounds = array<i64: 3, 1, 512>}, {pipeline_mode = #tpu.pipeline_mode<synchronous>, transform_indices = @transform_7, window_bounds = array<i64: 3, 512, 128>}, {pipeline_mode = #tpu.pipeline_mode<synchronous>, transform_indices = @transform_8, window_bounds = array<i64: 3, 1, 128>}, {transform_indices = @transform_9, window_bounds = array<i64: 16, 384>}]} {
    %c0 = arith.constant 0 : index
    %c0_0 = arith.constant 0 : index
    %0 = vector.load %arg1[%c0, %c0_0] : memref<16x32xf32, #tpu.memory_space<vmem>>, vector<16x32xf32>
    %c0_1 = arith.constant 0 : index
    %c0_2 = arith.constant 0 : index
    %1 = vector.load %arg2[%c0_1, %c0_2] : memref<16x1xf32, #tpu.memory_space<vmem>>, vector<16x1xf32>
    %c0_3 = arith.constant 0 : index
    %c0_4 = arith.constant 0 : index
    %2 = vector.load %arg3[%c0_3, %c0_4] : memref<1x32xf32, #tpu.memory_space<vmem>>, vector<1x32xf32>
    %3 = vector.broadcast %1 : vector<16x1xf32> to vector<16x32xf32>
    %4 = arith.mulf %3, %0 : vector<16x32xf32>
    %cst = arith.constant 1.000000e+00 : f32
    %5 = vector.broadcast %cst : f32 to vector<16x1xf32>
    %6 = arith.subf %5, %1 : vector<16x1xf32>
    %7 = vector.broadcast %6 : vector<16x1xf32> to vector<16x32xf32>
    %8 = vector.broadcast %2 : vector<1x32xf32> to vector<16x32xf32>
    %9 = arith.mulf %7, %8 : vector<16x32xf32>
    %10 = arith.addf %4, %9 : vector<16x32xf32>
    %11 = arith.truncf %10 : vector<16x32xf32> to vector<16x32xbf16>
    %c0_5 = arith.constant 0 : index
    %c0_6 = arith.constant 0 : index
    %12 = vector.load %arg4[%c0_5, %c0_6] : memref<32x1536xbf16, #tpu.memory_space<vmem>>, vector<32x1536xbf16>
    %cst_7 = arith.constant dense<0.000000e+00> : vector<16x1536xf32>
    %13 = tpu.matmul %11, %12, %cst_7 {dimension_numbers = #tpu.dot_dimension_numbers<[1], [0], [0], [1], [0, 0, 1, 1], [], []>} : vector<16x32xbf16>, vector<32x1536xbf16>, vector<16x1536xf32> -> vector<16x1536xf32>
    %c0_8 = arith.constant 0 : index
    %c0_9 = arith.constant 0 : index
    %14 = vector.load %arg5[%c0_8, %c0_9] : memref<1x1536xf32, #tpu.memory_space<vmem>>, vector<1x1536xf32>
    %15 = vector.broadcast %14 : vector<1x1536xf32> to vector<16x1536xf32>
    %16 = arith.addf %13, %15 : vector<16x1536xf32>
    %17 = arith.negf %16 : vector<16x1536xf32>
    %18 = math.exp %17 : vector<16x1536xf32>
    %cst_10 = arith.constant 1.000000e+00 : f32
    %19 = vector.broadcast %cst_10 : f32 to vector<16x1536xf32>
    %20 = arith.addf %19, %18 : vector<16x1536xf32>
    %21 = arith.divf %19, %20 : vector<16x1536xf32>
    %22 = arith.mulf %16, %21 : vector<16x1536xf32>
    %23 = vector.extract_strided_slice %22 {offsets = [0, 0], sizes = [16, 512], strides = [1, 1]} : vector<16x1536xf32> to vector<16x512xf32>
    %24 = arith.truncf %23 : vector<16x512xf32> to vector<16x512xbf16>
    %c0_11 = arith.constant 0 : index
    %c0_12 = arith.constant 0 : index
    %c0_13 = arith.constant 0 : index
    %25 = vector.load %arg6[%c0_11, %c0_12, %c0_13] : memref<3x512x512xbf16, #tpu.memory_space<vmem>>, vector<1x512x512xbf16>
    %26 = vector.shape_cast %25 : vector<1x512x512xbf16> to vector<512x512xbf16>
    %cst_14 = arith.constant dense<0.000000e+00> : vector<16x512xf32>
    %27 = tpu.matmul %24, %26, %cst_14 {dimension_numbers = #tpu.dot_dimension_numbers<[1], [0], [0], [1], [0, 0, 1, 1], [], []>} : vector<16x512xbf16>, vector<512x512xbf16>, vector<16x512xf32> -> vector<16x512xf32>
    %c0_15 = arith.constant 0 : index
    %c0_16 = arith.constant 0 : index
    %c0_17 = arith.constant 0 : index
    %28 = vector.load %arg7[%c0_15, %c0_16, %c0_17] : memref<3x1x512xf32, #tpu.memory_space<vmem>>, vector<1x1x512xf32>
    %29 = vector.shape_cast %28 : vector<1x1x512xf32> to vector<1x512xf32>
    %30 = vector.broadcast %29 : vector<1x512xf32> to vector<16x512xf32>
    %31 = arith.addf %27, %30 : vector<16x512xf32>
    %32 = arith.negf %31 : vector<16x512xf32>
    %33 = math.exp %32 : vector<16x512xf32>
    %cst_18 = arith.constant 1.000000e+00 : f32
    %34 = vector.broadcast %cst_18 : f32 to vector<16x512xf32>
    %35 = arith.addf %34, %33 : vector<16x512xf32>
    %36 = arith.divf %34, %35 : vector<16x512xf32>
    %37 = arith.mulf %31, %36 : vector<16x512xf32>
    %38 = arith.truncf %37 : vector<16x512xf32> to vector<16x512xbf16>
    %c0_19 = arith.constant 0 : index
    %c0_20 = arith.constant 0 : index
    %c0_21 = arith.constant 0 : index
    %39 = vector.load %arg8[%c0_19, %c0_20, %c0_21] : memref<3x512x128xbf16, #tpu.memory_space<vmem>>, vector<1x512x128xbf16>
    %40 = vector.shape_cast %39 : vector<1x512x128xbf16> to vector<512x128xbf16>
    %cst_22 = arith.constant dense<0.000000e+00> : vector<16x128xf32>
    %41 = tpu.matmul %38, %40, %cst_22 {dimension_numbers = #tpu.dot_dimension_numbers<[1], [0], [0], [1], [0, 0, 1, 1], [], []>} : vector<16x512xbf16>, vector<512x128xbf16>, vector<16x128xf32> -> vector<16x128xf32>
    %c0_23 = arith.constant 0 : index
    %c0_24 = arith.constant 0 : index
    %c0_25 = arith.constant 0 : index
    %42 = vector.load %arg9[%c0_23, %c0_24, %c0_25] : memref<3x1x128xf32, #tpu.memory_space<vmem>>, vector<1x1x128xf32>
    %43 = vector.shape_cast %42 : vector<1x1x128xf32> to vector<1x128xf32>
    %44 = vector.broadcast %43 : vector<1x128xf32> to vector<16x128xf32>
    %45 = arith.addf %41, %44 : vector<16x128xf32>
    %c0_26 = arith.constant 0 : index
    %c0_27 = arith.constant 0 : index
    %46 = vector.load %arg10[%c0_26, %c0_27] : memref<16x384xf32, #tpu.memory_space<vmem>>, vector<16x128xf32>
    tpu.vector_store %arg10[%c0_26, %c0_27], %45 {strides = array<i32>} : memref<16x384xf32, #tpu.memory_space<vmem>>, vector<16x128xf32>,
    %47 = vector.extract_strided_slice %22 {offsets = [0, 512], sizes = [16, 512], strides = [1, 1]} : vector<16x1536xf32> to vector<16x512xf32>
    %48 = arith.truncf %47 : vector<16x512xf32> to vector<16x512xbf16>
    %c1 = arith.constant 1 : index
    %c0_28 = arith.constant 0 : index
    %c0_29 = arith.constant 0 : index
    %49 = vector.load %arg6[%c1, %c0_28, %c0_29] : memref<3x512x512xbf16, #tpu.memory_space<vmem>>, vector<1x512x512xbf16>
    %50 = vector.shape_cast %49 : vector<1x512x512xbf16> to vector<512x512xbf16>
    %cst_30 = arith.constant dense<0.000000e+00> : vector<16x512xf32>
    %51 = tpu.matmul %48, %50, %cst_30 {dimension_numbers = #tpu.dot_dimension_numbers<[1], [0], [0], [1], [0, 0, 1, 1], [], []>} : vector<16x512xbf16>, vector<512x512xbf16>, vector<16x512xf32> -> vector<16x512xf32>
    %c1_31 = arith.constant 1 : index
    %c0_32 = arith.constant 0 : index
    %c0_33 = arith.constant 0 : index
    %52 = vector.load %arg7[%c1_31, %c0_32, %c0_33] : memref<3x1x512xf32, #tpu.memory_space<vmem>>, vector<1x1x512xf32>
    %53 = vector.shape_cast %52 : vector<1x1x512xf32> to vector<1x512xf32>
    %54 = vector.broadcast %53 : vector<1x512xf32> to vector<16x512xf32>
    %55 = arith.addf %51, %54 : vector<16x512xf32>
    %56 = arith.negf %55 : vector<16x512xf32>
    %57 = math.exp %56 : vector<16x512xf32>
    %cst_34 = arith.constant 1.000000e+00 : f32
    %58 = vector.broadcast %cst_34 : f32 to vector<16x512xf32>
    %59 = arith.addf %58, %57 : vector<16x512xf32>
    %60 = arith.divf %58, %59 : vector<16x512xf32>
    %61 = arith.mulf %55, %60 : vector<16x512xf32>
    %62 = arith.truncf %61 : vector<16x512xf32> to vector<16x512xbf16>
    %c1_35 = arith.constant 1 : index
    %c0_36 = arith.constant 0 : index
    %c0_37 = arith.constant 0 : index
    %63 = vector.load %arg8[%c1_35, %c0_36, %c0_37] : memref<3x512x128xbf16, #tpu.memory_space<vmem>>, vector<1x512x128xbf16>
    %64 = vector.shape_cast %63 : vector<1x512x128xbf16> to vector<512x128xbf16>
    %cst_38 = arith.constant dense<0.000000e+00> : vector<16x128xf32>
    %65 = tpu.matmul %62, %64, %cst_38 {dimension_numbers = #tpu.dot_dimension_numbers<[1], [0], [0], [1], [0, 0, 1, 1], [], []>} : vector<16x512xbf16>, vector<512x128xbf16>, vector<16x128xf32> -> vector<16x128xf32>
    %c1_39 = arith.constant 1 : index
    %c0_40 = arith.constant 0 : index
    %c0_41 = arith.constant 0 : index
    %66 = vector.load %arg9[%c1_39, %c0_40, %c0_41] : memref<3x1x128xf32, #tpu.memory_space<vmem>>, vector<1x1x128xf32>
    %67 = vector.shape_cast %66 : vector<1x1x128xf32> to vector<1x128xf32>
    %68 = vector.broadcast %67 : vector<1x128xf32> to vector<16x128xf32>
    %69 = arith.addf %65, %68 : vector<16x128xf32>
    %c0_42 = arith.constant 0 : index
    %c128 = arith.constant 128 : index
    %70 = vector.load %arg10[%c0_42, %c128] : memref<16x384xf32, #tpu.memory_space<vmem>>, vector<16x128xf32>
    tpu.vector_store %arg10[%c0_42, %c128], %69 {strides = array<i32>} : memref<16x384xf32, #tpu.memory_space<vmem>>, vector<16x128xf32>,
    %71 = vector.extract_strided_slice %22 {offsets = [0, 1024], sizes = [16, 512], strides = [1, 1]} : vector<16x1536xf32> to vector<16x512xf32>
    %72 = arith.truncf %71 : vector<16x512xf32> to vector<16x512xbf16>
    %c2 = arith.constant 2 : index
    %c0_43 = arith.constant 0 : index
    %c0_44 = arith.constant 0 : index
    %73 = vector.load %arg6[%c2, %c0_43, %c0_44] : memref<3x512x512xbf16, #tpu.memory_space<vmem>>, vector<1x512x512xbf16>
    %74 = vector.shape_cast %73 : vector<1x512x512xbf16> to vector<512x512xbf16>
    %cst_45 = arith.constant dense<0.000000e+00> : vector<16x512xf32>
    %75 = tpu.matmul %72, %74, %cst_45 {dimension_numbers = #tpu.dot_dimension_numbers<[1], [0], [0], [1], [0, 0, 1, 1], [], []>} : vector<16x512xbf16>, vector<512x512xbf16>, vector<16x512xf32> -> vector<16x512xf32>
    %c2_46 = arith.constant 2 : index
    %c0_47 = arith.constant 0 : index
    %c0_48 = arith.constant 0 : index
    %76 = vector.load %arg7[%c2_46, %c0_47, %c0_48] : memref<3x1x512xf32, #tpu.memory_space<vmem>>, vector<1x1x512xf32>
    %77 = vector.shape_cast %76 : vector<1x1x512xf32> to vector<1x512xf32>
    %78 = vector.broadcast %77 : vector<1x512xf32> to vector<16x512xf32>
    %79 = arith.addf %75, %78 : vector<16x512xf32>
    %80 = arith.negf %79 : vector<16x512xf32>
    %81 = math.exp %80 : vector<16x512xf32>
    %cst_49 = arith.constant 1.000000e+00 : f32
    %82 = vector.broadcast %cst_49 : f32 to vector<16x512xf32>
    %83 = arith.addf %82, %81 : vector<16x512xf32>
    %84 = arith.divf %82, %83 : vector<16x512xf32>
    %85 = arith.mulf %79, %84 : vector<16x512xf32>
    %86 = arith.truncf %85 : vector<16x512xf32> to vector<16x512xbf16>
    %c2_50 = arith.constant 2 : index
    %c0_51 = arith.constant 0 : index
    %c0_52 = arith.constant 0 : index
    %87 = vector.load %arg8[%c2_50, %c0_51, %c0_52] : memref<3x512x128xbf16, #tpu.memory_space<vmem>>, vector<1x512x128xbf16>
    %88 = vector.shape_cast %87 : vector<1x512x128xbf16> to vector<512x128xbf16>
    %cst_53 = arith.constant dense<0.000000e+00> : vector<16x128xf32>
    %89 = tpu.matmul %86, %88, %cst_53 {dimension_numbers = #tpu.dot_dimension_numbers<[1], [0], [0], [1], [0, 0, 1, 1], [], []>} : vector<16x512xbf16>, vector<512x128xbf16>, vector<16x128xf32> -> vector<16x128xf32>
    %c2_54 = arith.constant 2 : index
    %c0_55 = arith.constant 0 : index
    %c0_56 = arith.constant 0 : index
    %90 = vector.load %arg9[%c2_54, %c0_55, %c0_56] : memref<3x1x128xf32, #tpu.memory_space<vmem>>, vector<1x1x128xf32>
    %91 = vector.shape_cast %90 : vector<1x1x128xf32> to vector<1x128xf32>
    %92 = vector.broadcast %91 : vector<1x128xf32> to vector<16x128xf32>
    %93 = arith.addf %89, %92 : vector<16x128xf32>
    %c0_57 = arith.constant 0 : index
    %c256 = arith.constant 256 : index
    %94 = vector.load %arg10[%c0_57, %c256] : memref<16x384xf32, #tpu.memory_space<vmem>>, vector<16x128xf32>
    tpu.vector_store %arg10[%c0_57, %c256], %93 {strides = array<i32>} : memref<16x384xf32, #tpu.memory_space<vmem>>, vector<16x128xf32>,
    return
  }
  func.func @transform_0(%arg0: i32) -> (i32, i32) {
    %c0_i32 = arith.constant 0 : i32
    %c0_i32_0 = arith.constant 0 : i32
    return %arg0, %c0_i32 : i32, i32
  }
  func.func @transform_1(%arg0: i32) -> (i32, i32) {
    %c0_i32 = arith.constant 0 : i32
    %c0_i32_0 = arith.constant 0 : i32
    return %arg0, %c0_i32 : i32, i32
  }
  func.func @transform_2(%arg0: i32) -> (i32, i32) {
    %c0_i32 = arith.constant 0 : i32
    %c0_i32_0 = arith.constant 0 : i32
    %c0_i32_1 = arith.constant 0 : i32
    return %c0_i32, %c0_i32_0 : i32, i32
  }
  func.func @transform_3(%arg0: i32) -> (i32, i32) {
    %c0_i32 = arith.constant 0 : i32
    %c0_i32_0 = arith.constant 0 : i32
    %c0_i32_1 = arith.constant 0 : i32
    return %c0_i32, %c0_i32_0 : i32, i32
  }
  func.func @transform_4(%arg0: i32) -> (i32, i32) {
    %c0_i32 = arith.constant 0 : i32
    %c0_i32_0 = arith.constant 0 : i32
    %c0_i32_1 = arith.constant 0 : i32
    return %c0_i32, %c0_i32_0 : i32, i32
  }
  func.func @transform_5(%arg0: i32) -> (i32, i32, i32) {
    %c0_i32 = arith.constant 0 : i32
    %c0_i32_0 = arith.constant 0 : i32
    %c0_i32_1 = arith.constant 0 : i32
    %c0_i32_2 = arith.constant 0 : i32
    return %c0_i32, %c0_i32_0, %c0_i32_1 : i32, i32, i32
  }
  func.func @transform_6(%arg0: i32) -> (i32, i32, i32) {
    %c0_i32 = arith.constant 0 : i32
    %c0_i32_0 = arith.constant 0 : i32
    %c0_i32_1 = arith.constant 0 : i32
    %c0_i32_2 = arith.constant 0 : i32
    return %c0_i32, %c0_i32_0, %c0_i32_1 : i32, i32, i32
  }
  func.func @transform_7(%arg0: i32) -> (i32, i32, i32) {
    %c0_i32 = arith.constant 0 : i32
    %c0_i32_0 = arith.constant 0 : i32
    %c0_i32_1 = arith.constant 0 : i32
    %c0_i32_2 = arith.constant 0 : i32
    return %c0_i32, %c0_i32_0, %c0_i32_1 : i32, i32, i32
  }
  func.func @transform_8(%arg0: i32) -> (i32, i32, i32) {
    %c0_i32 = arith.constant 0 : i32
    %c0_i32_0 = arith.constant 0 : i32
    %c0_i32_1 = arith.constant 0 : i32
    %c0_i32_2 = arith.constant 0 : i32
    return %c0_i32, %c0_i32_0, %c0_i32_1 : i32, i32, i32
  }
  func.func @transform_9(%arg0: i32) -> (i32, i32) {
    %c0_i32 = arith.constant 0 : i32
    %c0_i32_0 = arith.constant 0 : i32
    return %arg0, %c0_i32 : i32, i32
  }
}

</mosaic_0001>

<bundles_post_ra>
// kernel: tpu_custom_call.1
= control target key start
LH: loop header
LB: loop body
LE: loop exit
PB: predicated region body
PF: predicated region fallthrough
CT: control target
= control target key end

     0   :  { %14 = vsyncpa [#allocation3], 0  ;;  %s7259_s0 = inlined_call_operand.hbm [shape: f32[16,32], index: 0, kind: input, shape index: {}]   ;;  %s7260_s1 = inlined_call_operand.vmem [shape: f32[16,1], index: 1, kind: input, shape index: {}]   ;;  %s7261_s2 = inlined_call_operand.hbm [shape: f32[1,32], index: 2, kind: input, shape index: {}]   ;;  %s7262_s3 = inlined_call_operand.hbm [shape: bf16[32,1536], index: 3, kind: input, shape index: {}]   ;;  %s7263_s4 = inlined_call_operand.hbm [shape: f32[1,1536], index: 4, kind: input, shape index: {}]   ;;  %s7264_s5 = inlined_call_operand.hbm [shape: bf16[3,512,512], index: 5, kind: input, shape index: {}]   ;;  %s7265_s6 = inlined_call_operand.hbm [shape: f32[3,1,512], index: 6, kind: input, shape index: {}]   ;;  %s7266_s7 = inlined_call_operand.hbm [shape: bf16[3,512,128], index: 7, kind: input, shape index: {}]   ;;  %s7267_s8 = inlined_call_operand.hbm [shape: f32[3,1,128], index: 8, kind: input, shape index: {}]   ;;  %s7268_s9 = inlined_call_operand.hbm [shape: f32[16,384], index: 9, kind: output, shape index: {}]  }
   0x1   :  { %15 = vsyncpa [#allocation6], 0 }
   0x2   :  { %16 = vsyncpa [#allocation9], 0 }
   0x3   :  { %17 = vsyncpa [#allocation12], 0 }
   0x4   :  { %18 = vsyncpa [#allocation15], 0 }
   0x5   :  { %19 = vsyncpa [#allocation4], 0  ;;  %s6840_s30 = smov [#allocation5]   ;;  %s6841_s11 = smov [#allocation8]  }
   0x6   :  { %s40_s10 = sshll.u32 %s6840_s30, 4  ;;  %s62_s12 = sshll.u32 %s6841_s11, 4  ;;  %s41_s10 = int_to_ptr.vmem [resolvable:$true] %s40_s10  ;;  %s63_s12 = int_to_ptr.vmem [resolvable:$true] %s62_s12 }
   0x7   :  { %s6630_s15 = scalar_lea.hbm %s7261_s2, 16 }
   0x8   :  { %p6631_p0 = scmp.ne.s32.totalorder %s7261_s2, %s6630_s15  ;;  %p6634_p1 = scmp.lt.u32.totalorder %s6630_s15, %s7261_s2 }
   0xa   :  { %p6636_p2 = pnand %p6634_p1, %p6631_p0 }
   0xc   :  { %6639 = shalt.err (!%p6636_p2)
}
   0xd   :  { %s6640_s20 = scalar_lea.vmem %s41_s10, 16  ;;  %s6644_s21 = scalar_lea.vmem %s41_s10, 32 }
   0xe   :  { %p6641_p3 = scmp.ne.s32.totalorder %s41_s10, %s6640_s20  ;;  %p6645_p4 = scmp.lt.s32.totalorder %s41_s10, %s41_s10 }
   0xf   :  { %p6646_p5 = scmp.lt.s32.totalorder %s6644_s21, %s6640_s20 }
  0x11   :  { %p6647_p6 = por %p6646_p5, %p6645_p4 }
  0x13   :  { %p6648_p7 = pnand %p6647_p6, %p6641_p3 }
  0x15   :  { %6651 = shalt.err (!%p6648_p7)
}
  0x16   :  { %43 = dma.hbm_to_vmem [thread:$0]  %s7261_s2, 16, %s41_s10, [#allocation6]  }
  0x17   :  { %s6652_s26 = scalar_lea.hbm %s7263_s4, 192 }
  0x18   :  { %p6653_p8 = scmp.ne.s32.totalorder %s7263_s4, %s6652_s26  ;;  %p6656_p9 = scmp.lt.u32.totalorder %s6652_s26, %s7263_s4 }
  0x1a   :  { %p6658_p10 = pnand %p6656_p9, %p6653_p8 }
  0x1c   :  { %6661 = shalt.err (!%p6658_p10)
}
  0x1d   :  { %s6662_s11 = scalar_lea.vmem %s63_s12, 192  ;;  %p6667_p12 = scmp.lt.s32.totalorder %s63_s12, %s63_s12 }
  0x1e   :  { %p6663_p11 = scmp.ne.s32.totalorder %s63_s12, %s6662_s11  ;;  %p6668_p13 = scmp.lt.s32.totalorder %s6662_s11, %s6662_s11 }
  0x20   :  { %p6669_p0 = por %p6668_p13, %p6667_p12 }
  0x22   :  { %p6670_p1 = pnand %p6669_p0, %p6663_p11 }
  0x24   :  { %6673 = shalt.err (!%p6670_p1)
}
  0x25   :  { %65 = dma.hbm_to_vmem [thread:$0]  %s7263_s4, 192, %s63_s12, [#allocation9]  }
  0x26   :  { %s6842_s13 = smov [#allocation11]   ;;  %s6674_s17 = scalar_lea.hbm %s7265_s6, 192 }
  0x27   :  { %s83_s14 = sshll.u32 %s6842_s13, 4  ;;  %p6675_p2 = scmp.ne.s32.totalorder %s7265_s6, %s6674_s17  ;;  %s84_s14 = int_to_ptr.vmem [resolvable:$true] %s83_s14 }
  0x28   :  { %p6678_p3 = scmp.lt.u32.totalorder %s6674_s17, %s7265_s6 }
  0x2a   :  { %p6680_p4 = pnand %p6678_p3, %p6675_p2 }
  0x2c   :  { %6683 = shalt.err (!%p6680_p4)
}
  0x2d   :  { %s6684_s22 = scalar_lea.vmem %s84_s14, 192  ;;  %p6689_p6 = scmp.lt.s32.totalorder %s84_s14, %s84_s14 }
  0x2e   :  { %p6685_p5 = scmp.ne.s32.totalorder %s84_s14, %s6684_s22  ;;  %p6690_p7 = scmp.lt.s32.totalorder %s6684_s22, %s6684_s22 }
  0x30   :  { %p6691_p8 = por %p6690_p7, %p6689_p6 }
  0x32   :  { %p6692_p9 = pnand %p6691_p8, %p6685_p5 }
  0x34   :  { %6695 = shalt.err (!%p6692_p9)
}
  0x35   :  { %s6843_s4 = smov 64   ;;  %s6844_s12 = smov 4  }
  0x36   :  { %89 = dma.hbm_to_vmem [thread:$0]  %s7265_s6, 192, %s84_s14, [#allocation12], %s6843_s4, %s6843_s4, %s6844_s12  }
  0x37   :  { %s6845_s25 = smov [#allocation2]   ;;  %s6696_s29 = scalar_lea.hbm %s7259_s0, 256 }
  0x38   :  { %s25_s26 = sshll.u32 %s6845_s25, 4  ;;  %p6697_p10 = scmp.ne.s32.totalorder %s7259_s0, %s6696_s29  ;;  %s26_s26 = int_to_ptr.vmem [resolvable:$true] %s25_s26 }
  0x39   :  { %p6700_p11 = scmp.lt.u32.totalorder %s6696_s29, %s7259_s0 }
  0x3b   :  { %p6702_p12 = pnand %p6700_p11, %p6697_p10 }
  0x3d   :  { %6705 = shalt.err (!%p6702_p12)
}
  0x3e   :  { %s6706_s13 = scalar_lea.vmem %s26_s26, 256  ;;  %p6711_p0 = scmp.lt.s32.totalorder %s26_s26, %s26_s26 }
  0x3f   :  { %p6707_p13 = scmp.ne.s32.totalorder %s26_s26, %s6706_s13  ;;  %p6712_p1 = scmp.lt.s32.totalorder %s6706_s13, %s6706_s13 }
  0x41   :  { %p6713_p2 = por %p6712_p1, %p6711_p0 }
  0x43   :  { %p6714_p3 = pnand %p6713_p2, %p6707_p13 }
  0x45   :  { %6717 = shalt.err (!%p6714_p3)
}
  0x46   :  { %s6846_s6 = smov 128   ;;  %s6847_s14 = smov 8  }
  0x47   :  { %31 = dma.hbm_to_vmem [thread:$0]  %s7259_s0, 256, %s26_s26, [#allocation3], %s6846_s6, %s6846_s6, %s6847_s14  }
  0x48   :  { %s6848_s17 = smov [#allocation7]   ;;  %s6718_s21 = scalar_lea.hbm %s7262_s3, 3072 }
  0x49   :  { %s49_s18 = sshll.u32 %s6848_s17, 4  ;;  %p6719_p4 = scmp.ne.s32.totalorder %s7262_s3, %s6718_s21  ;;  %s50_s18 = int_to_ptr.vmem [resolvable:$true] %s49_s18 }
  0x4a   :  { %p6722_p5 = scmp.lt.u32.totalorder %s6718_s21, %s7262_s3 }
  0x4c   :  { %p6724_p6 = pnand %p6722_p5, %p6719_p4 }
  0x4e   :  { %6727 = shalt.err (!%p6724_p6)
}
  0x4f   :  { %s6728_s27 = scalar_lea.vmem %s50_s18, 3072  ;;  %p6733_p8 = scmp.lt.s32.totalorder %s50_s18, %s50_s18 }
  0x50   :  { %p6729_p7 = scmp.ne.s32.totalorder %s50_s18, %s6728_s27  ;;  %p6734_p9 = scmp.lt.s32.totalorder %s6728_s27, %s6728_s27 }
  0x52   :  { %p6735_p10 = por %p6734_p9, %p6733_p8 }
  0x54   :  { %p6736_p11 = pnand %p6735_p10, %p6729_p7 }
  0x56   :  { %6739 = shalt.err (!%p6736_p11)
}
  0x57   :  { %s6849_s0 = smov 768   ;;  %s6850_s26 = smov 48  }
  0x58   :  { %55 = dma.hbm_to_vmem [thread:$0]  %s7262_s3, 3072, %s50_s18, [#allocation6], %s6849_s0, %s6849_s0, %s6850_s26  }
  0x59   :  { %s6851_s30 = smov [#allocation10]   ;;  %s6740_s13 = scalar_lea.hbm %s7264_s5, 49152 }
  0x5a   :  { %s71_s11 = sshll.u32 %s6851_s30, 4  ;;  %p6741_p12 = scmp.ne.s32.totalorder %s7264_s5, %s6740_s13  ;;  %s72_s11 = int_to_ptr.vmem [resolvable:$true] %s71_s11 }
  0x5b   :  { %p6744_p13 = scmp.lt.u32.totalorder %s6740_s13, %s7264_s5 }
  0x5d   :  { %p6746_p0 = pnand %p6744_p13, %p6741_p12 }
  0x5f   :  { %6749 = shalt.err (!%p6746_p0)
}
  0x60   :  { %s6750_s17 = scalar_lea.vmem %s72_s11, 49152  ;;  %p6755_p2 = scmp.lt.s32.totalorder %s72_s11, %s72_s11 }
  0x61   :  { %p6751_p1 = scmp.ne.s32.totalorder %s72_s11, %s6750_s17  ;;  %p6756_p3 = scmp.lt.s32.totalorder %s6750_s17, %s6750_s17 }
  0x63   :  { %p6757_p4 = por %p6756_p3, %p6755_p2 }
  0x65   :  { %p6758_p5 = pnand %p6757_p4, %p6751_p1 }
  0x67   :  { %6761 = shalt.err (!%p6758_p5)
}
  0x68   :  { %s6852_s3 = smov 256   ;;  %s6853_s18 = smov 16  }
  0x69   :  { %77 = dma.hbm_to_vmem [thread:$0]  %s7264_s5, 49152, %s72_s11, [#allocation9], %s6852_s3, %s6852_s3, %s6853_s18  }
  0x6a   :  { %s6854_s21 = smov [#allocation13]   ;;  %s6855_s23 = smov [#allocation14]  }
  0x6b   :  { %s95_s22 = sshll.u32 %s6854_s21, 4  ;;  %s107_s24 = sshll.u32 %s6855_s23, 4  ;;  %s96_s22 = int_to_ptr.vmem [resolvable:$true] %s95_s22  ;;  %s6987_s24 = int_to_ptr.vmem [resolvable:$true] %s107_s24 }
  0x6c   :  { %s6762_s0 = scalar_lea.hbm %s7266_s7, 12288 }
  0x6d   :  { %p6763_p6 = scmp.ne.s32.totalorder %s7266_s7, %s6762_s0  ;;  %p6766_p7 = scmp.lt.u32.totalorder %s6762_s0, %s7266_s7 }
  0x6f   :  { %p6768_p8 = pnand %p6766_p7, %p6763_p6 }
  0x71   :  { %6771 = shalt.err (!%p6768_p8)
}
  0x72   :  { %s6772_s5 = scalar_lea.vmem %s96_s22, 12288  ;;  %p6777_p10 = scmp.lt.s32.totalorder %s96_s22, %s96_s22 }
  0x73   :  { %p6773_p9 = scmp.ne.s32.totalorder %s96_s22, %s6772_s5  ;;  %p6778_p11 = scmp.lt.s32.totalorder %s6772_s5, %s6772_s5 }
  0x75   :  { %p6779_p12 = por %p6778_p11, %p6777_p10 }
  0x77   :  { %p6780_p13 = pnand %p6779_p12, %p6773_p9 }
  0x79   :  { %6783 = shalt.err (!%p6780_p13)
}
  0x7a   :  { %101 = dma.hbm_to_vmem [thread:$0]  %s7266_s7, 12288, %s96_s22, [#allocation12], %s6843_s4, %s6843_s4, %s6844_s12  }
  0x7b   :  { %s6784_s6 = scalar_lea.hbm %s7267_s8, 48 }
  0x7c   :  { %p6785_p0 = scmp.ne.s32.totalorder %s7267_s8, %s6784_s6  ;;  %p6788_p1 = scmp.lt.u32.totalorder %s6784_s6, %s7267_s8 }
  0x7e   :  { %p6790_p2 = pnand %p6788_p1, %p6785_p0 }
  0x80   :  { %6793 = shalt.err (!%p6790_p2)
}
  0x81   :  { %s6794_s3 = scalar_lea.vmem %s6987_s24, 48  ;;  %s6798_s7 = scalar_lea.vmem %s6987_s24, 64 }
  0x82   :  { %p6795_p3 = scmp.ne.s32.totalorder %s6987_s24, %s6794_s3  ;;  %p6799_p4 = scmp.lt.s32.totalorder %s6987_s24, %s6987_s24 }
  0x83   :  { %p6800_p5 = scmp.lt.s32.totalorder %s6798_s7, %s6794_s3 }
  0x85   :  { %p6801_p6 = por %p6800_p5, %p6799_p4 }
  0x87   :  { %p6802_p7 = pnand %p6801_p6, %p6795_p3 }
  0x89   :  { %6805 = shalt.err (!%p6802_p7)
}
  0x8a   :  { %s6856_s4 = smov 1  }
  0x8b   :  { %113 = dma.hbm_to_vmem [thread:$0]  %s7267_s8, 48, %s6987_s24, [#allocation15], %s6853_s18, %s6853_s18, %s6856_s4  }
  0x8c   :  { %6828 = dma.done.wait [#allocation3], 256  }
  0x8d   :  { %6829 = vsyncadd [#allocation3], 4294967040 }
  0x8e   :  { %6830 = dma.done.wait [#allocation6], 3088  }
  0x8f   :  { %6831 = vsyncadd [#allocation6], 4294964208 }
  0x90   :  { %6832 = dma.done.wait [#allocation9], 49344  }
  0x91   :  { %6833 = vsyncadd [#allocation9], 4294917952 }
  0x92   :  { %6834 = dma.done.wait [#allocation12], 12480  }
  0x93   :  { %6835 = vsyncadd [#allocation12], 4294954816 }
  0x94   :  { %6836 = dma.done.wait [#allocation15], 48  }
  0x95   :  { %6837 = vsyncadd [#allocation15], 4294967248  ;;  %v6857_v0 = vmov 0   ;;  %v141_v1 = vld [vmem:[%s7260_s1] sm:$0xff]  ;;  %v142_v2 = vld [vmem:[%s7260_s1 + $0x8] sm:$0xff]  ;;  %vm387_vm0 = vcmask 261120  }
  0x96   :  { %5728 = vset.pattern.permute.xlu0 %v6857_v0  ;;  %5729 = vset.pattern.permute.xlu1 %v6857_v0  ;;  %v156_v3 = vsub.f32 1.0, %v141_v1  ;;  %v157_v4 = vsub.f32 1.0, %v142_v2  ;;  %v5730_v5 = vld [vmem:[#allocation7 + $0x4] ss:$48 sps:$4 sm:$0xff]   ;;  %v5732_v6 = vld [vmem:[#allocation7 + $0xc] ss:$48 sps:$4 sm:$0xff]  }
  0x97   :  { %423 = vmatprep.mubr.bf16.mxu0 %v6857_v0  ;;  %466 = vmatprep.mubr.bf16.mxu1 %v6857_v0  ;;  %v5734_v7 = vld [vmem:[#allocation7] ss:$48 sps:$4 sm:$0xff]   ;;  %v5735_v8 = vld [vmem:[#allocation7 + $0x8] ss:$48 sps:$4 sm:$0xff]   ;;  %v5736_v9 = vld [vmem:[#allocation7 + $0x64] ss:$48 sps:$4 sm:$0xff]  }
  0x98   :  { %146 = vperm.xlu0 %5728, %v141_v1   ;;  %160 = vperm.xlu1 %5729, %v156_v3   ;;  %v5738_v10 = vld [vmem:[#allocation7 + $0x6c] ss:$48 sps:$4 sm:$0xff]   ;;  %v5740_v11 = vld [vmem:[#allocation7 + $0x60] ss:$48 sps:$4 sm:$0xff]   ;;  %v5741_v12 = vld [vmem:[#allocation7 + $0x68] ss:$48 sps:$4 sm:$0xff]  }
  0x99   :  { %391 = vmatprep.subr.bf16.mxu0 %v5730_v5  ;;  %434 = vmatprep.subr.bf16.mxu1 %v5732_v6  ;;  %v5744_v13 = vld [vmem:[#allocation7 + $0x14] ss:$48 sps:$4 sm:$0xff]   ;;  %v5747_v14 = vld [vmem:[#allocation7 + $0x1c] ss:$48 sps:$4 sm:$0xff]   ;;  %v5742_v26 = vld [vmem:[#allocation7 + $0x10] ss:$48 sps:$4 sm:$0xff]  }
  0x9a   :  { %392 = vmatpush1.bf16.msra.mxu0 %v5734_v7  ;;  %435 = vmatpush1.bf16.msra.mxu1 %v5735_v8  ;;  %v139_v16 = vld [vmem:[#allocation2] sm:$0xff]  ;;  %v4965_v17 = vld [vmem:[#allocation5] ss:$0 sm:$0xff]  ;;  %v140_v19 = vld [vmem:[#allocation2 + $0x8] sm:$0xff]  ;;  %s6858_s1 = smov [#allocation16]  }
  0x9b   :  { %393 = vmatprep.subr.bf16.mxu0 %v5736_v9  ;;  %436 = vmatprep.subr.bf16.mxu1 %v5738_v10  ;;  %v5745_v27 = vld [vmem:[#allocation7 + $0x18] ss:$48 sps:$4 sm:$0xff]   ;;  %v5750_v30 = vld [vmem:[#allocation7 + $0x74] ss:$48 sps:$4 sm:$0xff]   ;;  %v5753_v31 = vld [vmem:[#allocation7 + $0x7c] ss:$48 sps:$4 sm:$0xff]  }
  0x9c   :  { %151 = vperm.xlu0 %5728, %v142_v2   ;;  %165 = vperm.xlu1 %5729, %v157_v4   ;;  %v5748_v33 = vld [vmem:[#allocation7 + $0x70] ss:$48 sps:$4 sm:$0xff]   ;;  %v5751_v34 = vld [vmem:[#allocation7 + $0x78] ss:$48 sps:$4 sm:$0xff]   ;;  %v5756_v35 = vld [vmem:[#allocation7 + $0x24] ss:$48 sps:$4 sm:$0xff]  }
  0x9d   :  { %v5759_v36 = vld [vmem:[#allocation7 + $0x2c] ss:$48 sps:$4 sm:$0xff]   ;;  %v5754_v37 = vld [vmem:[#allocation7 + $0x20] ss:$48 sps:$4 sm:$0xff]   ;;  %v5757_v38 = vld [vmem:[#allocation7 + $0x28] ss:$48 sps:$4 sm:$0xff]  }
  0x9e   :  { %394 = vmatpush1.bf16.msra.mxu0 %v5740_v11  ;;  %437 = vmatpush1.bf16.msra.mxu1 %v5741_v12  ;;  %v5762_v39 = vld [vmem:[#allocation7 + $0x84] ss:$48 sps:$4 sm:$0xff]   ;;  %v5765_v40 = vld [vmem:[#allocation7 + $0x8c] ss:$48 sps:$4 sm:$0xff]   ;;  %v5760_v41 = vld [vmem:[#allocation7 + $0x80] ss:$48 sps:$4 sm:$0xff]  }
  0x9f   :  { %477 = vmatprep.subr.bf16.mxu0 %v5744_v13  ;;  %520 = vmatprep.subr.bf16.mxu1 %v5747_v14  ;;  %v5763_v42 = vld [vmem:[#allocation7 + $0x88] ss:$48 sps:$4 sm:$0xff]   ;;  %v5768_v43 = vld [vmem:[#allocation10 + $0x4] ss:$16 sps:$4 sm:$0xff]   ;;  %v5766_v45 = vld [vmem:[#allocation10] ss:$16 sps:$4 sm:$0xff]  }
  0xa0   :  { %v5771_v44 = vld [vmem:[#allocation10 + $0xc] ss:$16 sps:$4 sm:$0xff]   ;;  %v5769_v46 = vld [vmem:[#allocation10 + $0x8] ss:$16 sps:$4 sm:$0xff]   ;;  %v5774_v47 = vld [vmem:[#allocation10 + $0x24] ss:$16 sps:$4 sm:$0xff]  }
  0xa1   :  { %v5777_v48 = vld [vmem:[#allocation10 + $0x2c] ss:$16 sps:$4 sm:$0xff]   ;;  %v5772_v49 = vld [vmem:[#allocation10 + $0x20] ss:$16 sps:$4 sm:$0xff]   ;;  %v5775_v50 = vld [vmem:[#allocation10 + $0x28] ss:$16 sps:$4 sm:$0xff]  }
  0xa2   :  { %v5780_v51 = vld [vmem:[#allocation10 + $0x44] ss:$16 sps:$4 sm:$0xff]   ;;  %v5783_v52 = vld [vmem:[#allocation10 + $0x4c] ss:$16 sps:$4 sm:$0xff]   ;;  %v5778_v53 = vld [vmem:[#allocation10 + $0x40] ss:$16 sps:$4 sm:$0xff]  }
  0xa3   :  { %v5781_v54 = vld [vmem:[#allocation10 + $0x48] ss:$16 sps:$4 sm:$0xff]   ;;  %v5786_v55 = vld [vmem:[#allocation10 + $0x64] ss:$16 sps:$4 sm:$0xff]   ;;  %v5789_v56 = vld [vmem:[#allocation10 + $0x6c] ss:$16 sps:$4 sm:$0xff]  }
  0xa4   :  { %v5784_v57 = vld [vmem:[#allocation10 + $0x60] ss:$16 sps:$4 sm:$0xff]   ;;  %v5787_v58 = vld [vmem:[#allocation10 + $0x68] ss:$16 sps:$4 sm:$0xff]   ;;  %v5792_v59 = vld [vmem:[#allocation10 + $0x84] ss:$16 sps:$4 sm:$0xff]  }
  0xa5   :  { %v5795_v60 = vld [vmem:[#allocation10 + $0x8c] ss:$16 sps:$4 sm:$0xff]   ;;  %v5790_v61 = vld [vmem:[#allocation10 + $0x80] ss:$16 sps:$4 sm:$0xff]   ;;  %v5793_v62 = vld [vmem:[#allocation10 + $0x88] ss:$16 sps:$4 sm:$0xff]  }
  0xa6   :  { %v5798_v63 = vld [vmem:[#allocation10 + $0xa4] ss:$16 sps:$4 sm:$0xff]   ;;  %v5796_v1 = vld [vmem:[#allocation10 + $0xa0] ss:$16 sps:$4 sm:$0xff]   ;;  %v5799_v2 = vld [vmem:[#allocation10 + $0xa8] ss:$16 sps:$4 sm:$0xff]  }
  0xa7   :  { %v5804_v3 = vld [vmem:[#allocation10 + $0xc4] ss:$16 sps:$4 sm:$0xff]   ;;  %v5807_v4 = vld [vmem:[#allocation10 + $0xcc] ss:$16 sps:$4 sm:$0xff]   ;;  %v5802_v5 = vld [vmem:[#allocation10 + $0xc0] ss:$16 sps:$4 sm:$0xff]  }
  0xa8   :  { %v5805_v6 = vld [vmem:[#allocation10 + $0xc8] ss:$16 sps:$4 sm:$0xff]   ;;  %v5810_v7 = vld [vmem:[#allocation10 + $0xe4] ss:$16 sps:$4 sm:$0xff]   ;;  %v5813_v8 = vld [vmem:[#allocation10 + $0xec] ss:$16 sps:$4 sm:$0xff]  }
  0xa9   :  { %v5808_v9 = vld [vmem:[#allocation10 + $0xe0] ss:$16 sps:$4 sm:$0xff]   ;;  %v5811_v10 = vld [vmem:[#allocation10 + $0xe8] ss:$16 sps:$4 sm:$0xff]   ;;  %v5816_v11 = vld [vmem:[#allocation10 + $0x104] ss:$16 sps:$4 sm:$0xff]  }
  0xaa   :  { %v5819_v12 = vld [vmem:[#allocation10 + $0x10c] ss:$16 sps:$4 sm:$0xff]   ;;  %v5814_v13 = vld [vmem:[#allocation10 + $0x100] ss:$16 sps:$4 sm:$0xff]   ;;  %v5817_v14 = vld [vmem:[#allocation10 + $0x108] ss:$16 sps:$4 sm:$0xff]  }
  0xab   :  { %s4949_s22 = sshll.u32 %s6858_s1, 4  ;;  %s4950_s22 = int_to_ptr.vmem [resolvable:$true] %s4949_s22 }
  0xac   :  { %s6806_s23 = scalar_lea.vmem %s4950_s22, 768  ;;  %p6811_p9 = scmp.lt.s32.totalorder %s4950_s22, %s4950_s22 }
  0xad   :  { %p6807_p8 = scmp.ne.s32.totalorder %s4950_s22, %s6806_s23  ;;  %p6812_p10 = scmp.lt.s32.totalorder %s6806_s23, %s6806_s23 }
  0xaf   :  { %p6813_p11 = por %p6812_p10, %p6811_p9 }
  0xb1   :  { %p6814_p12 = pnand %p6813_p11, %p6807_p8 }
 0x117   :  { %v147_v15 = vpop.permute.xlu0 %146  ;;  %v161_v18 = vpop.permute.xlu1 %160 }
 0x118   :  { %v154_v21 = vmul.f32 %v147_v15, %v139_v16  ;;  %v174_v22 = vmul.f32 %v4965_v17, %v161_v18  ;;  %v5822_v15 = vld [vmem:[#allocation10 + $0x124] ss:$16 sps:$4 sm:$0xff]   ;;  %v5825_v16 = vld [vmem:[#allocation10 + $0x12c] ss:$16 sps:$4 sm:$0xff]   ;;  %v5823_v18 = vld [vmem:[#allocation10 + $0x128] ss:$16 sps:$4 sm:$0xff]  }
 0x11a   :  { %v176_v28 = vadd.f32 %v174_v22, %v154_v21  ;;  %v5826_v21 = vld [vmem:[#allocation10 + $0x140] ss:$16 sps:$4 sm:$0xff]   ;;  %v5829_v22 = vld [vmem:[#allocation10 + $0x148] ss:$16 sps:$4 sm:$0xff]  }
 0x11b   :  { %v152_v20 = vpop.permute.xlu0 %151  ;;  %v166_v23 = vpop.permute.xlu1 %165 }
 0x11c   :  { %v155_v24 = vmul.f32 %v152_v20, %v140_v19  ;;  %v175_v25 = vmul.f32 %v4965_v17, %v166_v23  ;;  %v5820_v17 = vld [vmem:[#allocation10 + $0x120] ss:$16 sps:$4 sm:$0xff]   ;;  %v5828_v19 = vld [vmem:[#allocation10 + $0x144] ss:$16 sps:$4 sm:$0xff]   ;;  %v5831_v20 = vld [vmem:[#allocation10 + $0x14c] ss:$16 sps:$4 sm:$0xff]  }
 0x11d   :  { %v5834_v23 = vld [vmem:[#allocation10 + $0x164] ss:$16 sps:$4 sm:$0xff]  }
 0x11e   :  { %v177_v29 = vadd.f32 %v175_v25, %v155_v24  ;;  %v5837_v24 = vld [vmem:[#allocation10 + $0x16c] ss:$16 sps:$4 sm:$0xff]   ;;  %v5832_v25 = vld [vmem:[#allocation10 + $0x160] ss:$16 sps:$4 sm:$0xff]  }
 0x120   :  { %v178_v32 = vpack.c.bf16 %v177_v29, %v176_v28  ;;  %v5843_v28 = vld [vmem:[#allocation10 + $0x18c] ss:$16 sps:$4 sm:$0xff]   ;;  %v5838_v29 = vld [vmem:[#allocation10 + $0x180] ss:$16 sps:$4 sm:$0xff]  }
 0x122   :  { %4990 = vmatmul.mubr.msk.bf16.vlgmr.msra.gmra.mrb[0].mxu0 %vm387_vm0, %v178_v32  ;;  %4991 = vmatmul.mubr.msk.bf16.vlgmr.msra.gmra.mrb[0].mxu1 %vm387_vm0, %v178_v32 }
 0x123   :  { %478 = vmatpush1.bf16.msra.mxu0 %v5742_v26  ;;  %521 = vmatpush1.bf16.msra.mxu1 %v5745_v27  ;;  %v5835_v26 = vld [vmem:[#allocation10 + $0x168] ss:$16 sps:$4 sm:$0xff]   ;;  %v5840_v27 = vld [vmem:[#allocation10 + $0x184] ss:$16 sps:$4 sm:$0xff]  }
 0x124   :  { %479 = vmatprep.subr.bf16.mxu0 %v5750_v30  ;;  %522 = vmatprep.subr.bf16.mxu1 %v5753_v31  ;;  %v5841_v30 = vld [vmem:[#allocation10 + $0x188] ss:$16 sps:$4 sm:$0xff]   ;;  %v5846_v31 = vld [vmem:[#allocation10 + $0x1a4] ss:$16 sps:$4 sm:$0xff]  }
 0x125   :  { %509 = vmatprep.mubr.bf16.mxu0 %v6857_v0  ;;  %552 = vmatprep.mubr.bf16.mxu1 %v6857_v0 }
 0x127   :  { %480 = vmatpush1.bf16.msra.mxu0 %v5748_v33  ;;  %523 = vmatpush1.bf16.msra.mxu1 %v5751_v34  ;;  %v5844_v33 = vld [vmem:[#allocation10 + $0x1a0] ss:$16 sps:$4 sm:$0xff]   ;;  %v5847_v34 = vld [vmem:[#allocation10 + $0x1a8] ss:$16 sps:$4 sm:$0xff]  }
 0x128   :  { %563 = vmatprep.subr.bf16.mxu0 %v5756_v35  ;;  %606 = vmatprep.subr.bf16.mxu1 %v5759_v36  ;;  %v5852_v35 = vld [vmem:[#allocation10 + $0x1c4] ss:$16 sps:$4 sm:$0xff]   ;;  %v5855_v36 = vld [vmem:[#allocation10 + $0x1cc] ss:$16 sps:$4 sm:$0xff]  }
 0x12a   :  { %4992 = vmatmul.mubr.msk.bf16.vlgmr.msra.gmra.mrb[4].mxu0 %vm387_vm0, %v178_v32  ;;  %4993 = vmatmul.mubr.msk.bf16.vlgmr.msra.gmra.mrb[4].mxu1 %vm387_vm0, %v178_v32 }
 0x12b   :  { %564 = vmatpush1.bf16.msra.mxu0 %v5754_v37  ;;  %607 = vmatpush1.bf16.msra.mxu1 %v5757_v38  ;;  %v5850_v37 = vld [vmem:[#allocation10 + $0x1c0] ss:$16 sps:$4 sm:$0xff]   ;;  %v5853_v38 = vld [vmem:[#allocation10 + $0x1c8] ss:$16 sps:$4 sm:$0xff]  }
 0x12c   :  { %565 = vmatprep.subr.bf16.mxu0 %v5762_v39  ;;  %608 = vmatprep.subr.bf16.mxu1 %v5765_v40  ;;  %v5858_v39 = vld [vmem:[#allocation10 + $0x1e4] ss:$16 sps:$4 sm:$0xff]   ;;  %v5861_v40 = vld [vmem:[#allocation10 + $0x1ec] ss:$16 sps:$4 sm:$0xff]  }
 0x12d   :  { %595 = vmatprep.mubr.bf16.mxu0 %v6857_v0  ;;  %638 = vmatprep.mubr.bf16.mxu1 %v6857_v0  ;;  %v5801_v0 = vld [vmem:[#allocation10 + $0xac] ss:$16 sps:$4 sm:$0xff]  }
 0x12f   :  { %566 = vmatpush1.bf16.msra.mxu0 %v5760_v41  ;;  %609 = vmatpush1.bf16.msra.mxu1 %v5763_v42  ;;  %v5856_v41 = vld [vmem:[#allocation10 + $0x1e0] ss:$16 sps:$4 sm:$0xff]   ;;  %v5859_v42 = vld [vmem:[#allocation10 + $0x1e8] ss:$16 sps:$4 sm:$0xff]  }
 0x130   :  { %1611 = vmatprep.subr.bf16.mxu0 %v5768_v43  ;;  %1697 = vmatprep.subr.bf16.mxu1 %v5771_v44  ;;  %v5864_v43 = vld [vmem:[#allocation10 + $0x204] ss:$16 sps:$4 sm:$0xff]   ;;  %v5867_v44 = vld [vmem:[#allocation10 + $0x20c] ss:$16 sps:$4 sm:$0xff]  }
 0x132   :  { %4994 = vmatmul.mubr.msk.bf16.vlgmr.msra.gmra.mrb[8].mxu0 %vm387_vm0, %v178_v32  ;;  %4995 = vmatmul.mubr.msk.bf16.vlgmr.msra.gmra.mrb[8].mxu1 %vm387_vm0, %v178_v32  ;;  %v5849_v32 = vld [vmem:[#allocation10 + $0x1ac] ss:$16 sps:$4 sm:$0xff]  }
 0x133   :  { %1612 = vmatpush1.bf16.msra.mxu0 %v5766_v45  ;;  %1698 = vmatpush1.bf16.msra.mxu1 %v5769_v46  ;;  %v207_v45 = vlaneseq }
 0x134   :  { %1613 = vmatprep.subr.bf16.mxu0 %v5774_v47  ;;  %1699 = vmatprep.subr.bf16.mxu1 %v5777_v48 }
 0x135   :  { %v7044_v46 = vshrl.u32 %v207_v45, 7 }
 0x137   :  { %1614 = vmatpush1.bf16.msra.mxu0 %v5772_v49  ;;  %1700 = vmatpush1.bf16.msra.mxu1 %v5775_v50  ;;  %v7047_v47 = vsub.s32 0, %v7044_v46  ;;  %v7050_v48 = vsub.s32 2, %v7044_v46  ;;  %v7052_v49 = vld [vmem:[#allocation8] sm:$0xff]  ;;  %v7055_v50 = vsub.s32 1, %v7044_v46 }
 0x138   :  { %1615 = vmatprep.subr.bf16.mxu0 %v5780_v51  ;;  %1701 = vmatprep.subr.bf16.mxu1 %v5783_v52  ;;  %v7058_v51 = vsub.s32 3, %v7044_v46 }
 0x139   :  { %v210_v52 = vrot.slane %v7052_v49, %v7047_v47 }
 0x13b   :  { %1616 = vmatpush1.bf16.msra.mxu0 %v5778_v53  ;;  %1702 = vmatpush1.bf16.msra.mxu1 %v5781_v54  ;;  %v218_v53 = vrot.slane %v7052_v49, %v7050_v48  ;;  %v214_v54 = vrot.slane %v7052_v49, %v7055_v50 }
 0x13c   :  { %1617 = vmatprep.subr.bf16.mxu0 %v5786_v55  ;;  %1703 = vmatprep.subr.bf16.mxu1 %v5789_v56  ;;  %v222_v55 = vrot.slane %v7052_v49, %v7058_v51 }
 0x13f   :  { %1618 = vmatpush1.bf16.msra.mxu0 %v5784_v57  ;;  %1704 = vmatpush1.bf16.msra.mxu1 %v5787_v58 }
 0x140   :  { %1619 = vmatprep.subr.bf16.mxu0 %v5792_v59  ;;  %1705 = vmatprep.subr.bf16.mxu1 %v5795_v60 }
 0x143   :  { %1620 = vmatpush1.bf16.msra.mxu0 %v5790_v61  ;;  %1706 = vmatpush1.bf16.msra.mxu1 %v5793_v62  ;;  %v225_v62 = vsub.s32 4, %v7044_v46 }
 0x144   :  { %1621 = vmatprep.subr.bf16.mxu0 %v5798_v63  ;;  %1707 = vmatprep.subr.bf16.mxu1 %v5801_v0  ;;  %v233_v63 = vsub.s32 6, %v7044_v46 }
 0x147   :  { %1622 = vmatpush1.bf16.msra.mxu0 %v5796_v1  ;;  %1708 = vmatpush1.bf16.msra.mxu1 %v5799_v2 }
 0x148   :  { %1623 = vmatprep.subr.bf16.mxu0 %v5804_v3  ;;  %1709 = vmatprep.subr.bf16.mxu1 %v5807_v4  ;;  %v229_v4 = vsub.s32 5, %v7044_v46 }
 0x14b   :  { %1624 = vmatpush1.bf16.msra.mxu0 %v5802_v5  ;;  %1710 = vmatpush1.bf16.msra.mxu1 %v5805_v6 }
 0x14c   :  { %1625 = vmatprep.subr.bf16.mxu0 %v5810_v7  ;;  %1711 = vmatprep.subr.bf16.mxu1 %v5813_v8 }
 0x14f   :  { %1626 = vmatpush1.bf16.msra.mxu0 %v5808_v9  ;;  %1712 = vmatpush1.bf16.msra.mxu1 %v5811_v10 }
 0x150   :  { %1627 = vmatprep.subr.bf16.mxu0 %v5816_v11  ;;  %1713 = vmatprep.subr.bf16.mxu1 %v5819_v12 }
 0x153   :  { %1628 = vmatpush1.bf16.msra.mxu0 %v5814_v13  ;;  %1714 = vmatpush1.bf16.msra.mxu1 %v5817_v14 }
 0x154   :  { %1629 = vmatprep.subr.bf16.mxu0 %v5822_v15  ;;  %1715 = vmatprep.subr.bf16.mxu1 %v5825_v16  ;;  %v226_v16 = vrot.slane %v7052_v49, %v225_v62 }
 0x157   :  { %1630 = vmatpush1.bf16.msra.mxu0 %v5820_v17  ;;  %1716 = vmatpush1.bf16.msra.mxu1 %v5823_v18  ;;  %v7094_v17 = vrot.slane %v7052_v49, %v233_v63 }
 0x158   :  { %1631 = vmatprep.subr.bf16.mxu0 %v5828_v19  ;;  %1717 = vmatprep.subr.bf16.mxu1 %v5831_v20  ;;  %v7098_v19 = vrot.slane %v7052_v49, %v229_v4 }
 0x15b   :  { %1632 = vmatpush1.bf16.msra.mxu0 %v5826_v21  ;;  %1718 = vmatpush1.bf16.msra.mxu1 %v5829_v22 }
 0x15c   :  { %1633 = vmatprep.subr.bf16.mxu0 %v5834_v23  ;;  %1719 = vmatprep.subr.bf16.mxu1 %v5837_v24 }
 0x15f   :  { %1634 = vmatpush1.bf16.msra.mxu0 %v5832_v25  ;;  %1720 = vmatpush1.bf16.msra.mxu1 %v5835_v26 }
 0x160   :  { %1635 = vmatprep.subr.bf16.mxu0 %v5840_v27  ;;  %1721 = vmatprep.subr.bf16.mxu1 %v5843_v28 }
 0x163   :  { %1636 = vmatpush1.bf16.msra.mxu0 %v5838_v29  ;;  %1722 = vmatpush1.bf16.msra.mxu1 %v5841_v30  ;;  %v237_v29 = vsub.s32 7, %v7044_v46 }
 0x164   :  { %1637 = vmatprep.subr.bf16.mxu0 %v5846_v31  ;;  %1723 = vmatprep.subr.bf16.mxu1 %v5849_v32  ;;  %v204_v32 = vld [vmem:[#allocation8 + $0x8] sm:$0xf] }
 0x167   :  { %1638 = vmatpush1.bf16.msra.mxu0 %v5844_v33  ;;  %1724 = vmatpush1.bf16.msra.mxu1 %v5847_v34 }
 0x168   :  { %1639 = vmatprep.subr.bf16.mxu0 %v5852_v35  ;;  %1725 = vmatprep.subr.bf16.mxu1 %v5855_v36 }
 0x16b   :  { %1640 = vmatpush1.bf16.msra.mxu0 %v5850_v37  ;;  %1726 = vmatpush1.bf16.msra.mxu1 %v5853_v38 }
 0x16c   :  { %1641 = vmatprep.subr.bf16.mxu0 %v5858_v39  ;;  %1727 = vmatprep.subr.bf16.mxu1 %v5861_v40  ;;  %v250_v40 = vrot.slane %v204_v32, %v7050_v48 }
 0x16f   :  { %1642 = vmatpush1.bf16.msra.mxu0 %v5856_v41  ;;  %1728 = vmatpush1.bf16.msra.mxu1 %v5859_v42  ;;  %v238_v41 = vrot.slane %v7052_v49, %v237_v29  ;;  %v254_v42 = vrot.slane %v204_v32, %v7058_v51 }
 0x170   :  { %1654 = vmatprep.subr.bf16.mxu0 %v5864_v43  ;;  %1740 = vmatprep.subr.bf16.mxu1 %v5867_v44 }
 0x1f5   :  { %v425_v56 = vpop.f32.mrb[0].mxu0  ;;  %v468_v57 = vpop.f32.mrb[0].mxu1 }
 0x1f6   :  { %v7068_v58 = vadd.f32 %v425_v56, %v210_v52  ;;  %v7070_v59 = vadd.f32 %v468_v57, %v218_v53  ;;  %v427_v60 = vpop.f32.mrb[1].mxu0  ;;  %v470_v61 = vpop.f32.mrb[1].mxu1 }
 0x1f7   :  { %v7074_v0 = vadd.f32 %v427_v60, %v214_v54  ;;  %v7076_v1 = vadd.f32 %v470_v61, %v222_v55  ;;  %v429_v2 = vpop.f32.mrb[2].mxu0  ;;  %v472_v3 = vpop.f32.mrb[2].mxu1 }
 0x1f8   :  { %v4996_v5 = vmul.f32 -1.442695, %v7068_v58  ;;  %v4998_v6 = vmul.f32 -1.442695, %v7070_v59  ;;  %v7081_v7 = vadd.f32 %v429_v2, %v210_v52  ;;  %v7083_v8 = vadd.f32 %v472_v3, %v218_v53  ;;  %v431_v9 = vpop.f32.mrb[3].mxu0  ;;  %v474_v10 = vpop.f32.mrb[3].mxu1 }
 0x1f9   :  { %v4997_v11 = vmul.f32 -1.442695, %v7074_v0  ;;  %v4999_v12 = vmul.f32 -1.442695, %v7076_v1  ;;  %v7087_v13 = vadd.f32 %v431_v9, %v214_v54  ;;  %v7089_v14 = vadd.f32 %v474_v10, %v222_v55 }
 0x1fa   :  { %6438 = vpow2.f32 %v4996_v5  ;;  %v5008_v15 = vmul.f32 -1.442695, %v7081_v7  ;;  %v5010_v18 = vmul.f32 -1.442695, %v7083_v8 }
 0x1fb   :  { %6440 = vpow2.f32 %v4998_v6  ;;  %v5009_v20 = vmul.f32 -1.442695, %v7087_v13  ;;  %v5011_v21 = vmul.f32 -1.442695, %v7089_v14 }
 0x1fc   :  { %6442 = vpow2.f32 %v4997_v11 }
 0x1fd   :  { %6444 = vpow2.f32 %v4999_v12  ;;  %v511_v22 = vpop.f32.mrb[4].mxu0  ;;  %v554_v23 = vpop.f32.mrb[4].mxu1 }
 0x1fe   :  { %6446 = vpow2.f32 %v5008_v15  ;;  %v7102_v24 = vadd.f32 %v511_v22, %v226_v16  ;;  %v7105_v25 = vadd.f32 %v554_v23, %v7094_v17  ;;  %v513_v26 = vpop.f32.mrb[5].mxu0  ;;  %v556_v27 = vpop.f32.mrb[5].mxu1  ;;  %v242_v15 = vrot.slane %v204_v32, %v7047_v47 }
 0x1ff   :  { %6448 = vpow2.f32 %v5010_v18  ;;  %v7108_v28 = vadd.f32 %v513_v26, %v7098_v19  ;;  %v515_v30 = vpop.f32.mrb[6].mxu0  ;;  %v558_v31 = vpop.f32.mrb[6].mxu1  ;;  %v7122_v62 = vadd.f32 %v556_v27, %v238_v41 }
 0x200   :  { %6450 = vpow2.f32 %v5009_v20  ;;  %v5000_v33 = vmul.f32 -1.442695, %v7102_v24  ;;  %v5002_v34 = vmul.f32 -1.442695, %v7105_v25  ;;  %v7113_v35 = vadd.f32 %v515_v30, %v226_v16  ;;  %v517_v36 = vpop.f32.mrb[7].mxu0  ;;  %v560_v37 = vpop.f32.mrb[7].mxu1 }
 0x201   :  { %6452 = vpow2.f32 %v5011_v21  ;;  %v5001_v38 = vmul.f32 -1.442695, %v7108_v28  ;;  %v5003_v21 = vmul.f32 -1.442695, %v7122_v62  ;;  %v7133_v27 = vadd.f32 %v558_v31, %v7094_v17 }
 0x202   :  { %6454 = vpow2.f32 %v5000_v33  ;;  %v5012_v39 = vmul.f32 -1.442695, %v7113_v35  ;;  %v7136_v29 = vadd.f32 %v517_v36, %v7098_v19 }
 0x203   :  { %6456 = vpow2.f32 %v5002_v34  ;;  %v246_v34 = vrot.slane %v204_v32, %v7055_v50  ;;  %v5014_v17 = vmul.f32 -1.442695, %v7133_v27 }
 0x204   :  { %v6439_v43 = vpop.eup %6438  ;;  %6458 = vpow2.f32 %v5001_v38  ;;  %v5013_v31 = vmul.f32 -1.442695, %v7136_v29 }
 0x205   :  { %v6441_v44 = vpop.eup %6440  ;;  %v721_v45 = vadd.f32 1.0, %v6439_v43  ;;  %v597_v46 = vpop.f32.mrb[8].mxu0  ;;  %6460 = vpow2.f32 %v5012_v39  ;;  %v7139_v39 = vadd.f32 %v560_v37, %v238_v41 }
 0x206   :  { %v640_v52 = vpop.f32.mrb[8].mxu1  ;;  %v6443_v53 = vpop.eup %6442  ;;  %v723_v54 = vadd.f32 1.0, %v6441_v44 }
 0x207   :  { %v7120_v55 = vadd.f32 %v640_v52, %v250_v40  ;;  %v599_v56 = vpop.f32.mrb[9].mxu0  ;;  %v642_v57 = vpop.f32.mrb[9].mxu1  ;;  %6462 = vrcp.f32 %v721_v45  ;;  %v722_v61 = vadd.f32 1.0, %v6443_v53  ;;  %v5015_v37 = vmul.f32 -1.442695, %v7139_v39 }
 0x208   :  { %v6445_v60 = vpop.eup %6444  ;;  %v7124_v49 = vadd.f32 %v642_v57, %v254_v42  ;;  %v601_v63 = vpop.f32.mrb[10].mxu0  ;;  %6464 = vrcp.f32 %v723_v54  ;;  %v7145_v44 = vadd.f32 %v599_v56, %v246_v34 }
 0x209   :  { %v644_v2 = vpop.f32.mrb[10].mxu1  ;;  %v6447_v3 = vpop.eup %6446  ;;  %v724_v4 = vadd.f32 1.0, %v6445_v60  ;;  %6466 = vrcp.f32 %v722_v61  ;;  %v7147_v45 = vadd.f32 %v601_v63, %v242_v15  ;;  %v5006_v54 = vmul.f32 -1.442695, %v7120_v55 }
 0x20a   :  { %v603_v5 = vpop.f32.mrb[11].mxu0  ;;  %v6449_v6 = vpop.eup %6448  ;;  %v733_v9 = vadd.f32 1.0, %v6447_v3  ;;  %v7127_v16 = vadd.f32 %v644_v2, %v250_v40  ;;  %v5005_v56 = vmul.f32 -1.442695, %v7145_v44  ;;  %v5007_v60 = vmul.f32 -1.442695, %v7124_v49 }
 0x20b   :  { %v646_v10 = vpop.f32.mrb[11].mxu1  ;;  %v6451_v11 = vpop.eup %6450  ;;  %6468 = vrcp.f32 %v724_v4  ;;  %v735_v12 = vadd.f32 1.0, %v6449_v6  ;;  %v7151_v52 = vadd.f32 %v603_v5, %v246_v34  ;;  %v5016_v61 = vmul.f32 -1.442695, %v7147_v45 }
 0x20c   :  { %v6453_v18 = vpop.eup %6452  ;;  %6470 = vrcp.f32 %v733_v9  ;;  %v734_v20 = vadd.f32 1.0, %v6451_v11  ;;  %v7130_v22 = vadd.f32 %v646_v10, %v254_v42  ;;  %v7141_v42 = vadd.f32 %v597_v46, %v242_v15 }
 0x20d   :  { %v6455_v23 = vpop.eup %6454  ;;  %6472 = vrcp.f32 %v735_v12  ;;  %v736_v26 = vadd.f32 1.0, %v6453_v18  ;;  %v5018_v4 = vmul.f32 -1.442695, %v7127_v16  ;;  %v5017_v10 = vmul.f32 -1.442695, %v7151_v52 }
 0x20e   :  { %v6457_v30 = vpop.eup %6456  ;;  %6474 = vrcp.f32 %v734_v20  ;;  %v725_v33 = vadd.f32 1.0, %v6455_v23  ;;  %v5004_v46 = vmul.f32 -1.442695, %v7141_v42  ;;  %v5862_v23 = vld [vmem:[#allocation10 + $0x200] ss:$16 sps:$4 sm:$0xff]  }
 0x20f   :  { %6476 = vrcp.f32 %v736_v26  ;;  %v727_v38 = vadd.f32 1.0, %v6457_v30  ;;  %v6459_v40 = vpop.eup %6458  ;;  %v5865_v26 = vld [vmem:[#allocation10 + $0x208] ss:$16 sps:$4 sm:$0xff]  }
 0x210   :  { %6478 = vpow2.f32 %v5003_v21  ;;  %v6461_v43 = vpop.eup %6460 }
 0x211   :  { %v6463_v19 = vpop.eup %6462  ;;  %6480 = vrcp.f32 %v725_v33  ;;  %v737_v36 = vadd.f32 1.0, %v6461_v43 }
 0x212   :  { %v6465_v32 = vpop.eup %6464  ;;  %6482 = vrcp.f32 %v727_v38  ;;  %v793_v2 = vmul.f32 %v6463_v19, %v7068_v58  ;;  %v5873_v38 = vld [vmem:[#allocation10 + $0x22c] ss:$16 sps:$4 sm:$0xff]   ;;  %v5871_v19 = vld [vmem:[#allocation10 + $0x228] ss:$16 sps:$4 sm:$0xff]  }
 0x213   :  { %v6467_v41 = vpop.eup %6466  ;;  %6484 = vrcp.f32 %v737_v36  ;;  %v795_v6 = vmul.f32 %v6465_v32, %v7070_v59  ;;  %v5019_v59 = vmul.f32 -1.442695, %v7130_v22 }
 0x214   :  { %6486 = vpow2.f32 %v5014_v17  ;;  %v794_v12 = vmul.f32 %v6467_v41, %v7074_v0  ;;  %v726_v0 = vadd.f32 1.0, %v6459_v40  ;;  %v5868_v40 = vld [vmem:[#allocation10 + $0x220] ss:$16 sps:$4 sm:$0xff]   ;;  %v5879_v41 = vld [vmem:[#allocation10 + $0x24c] ss:$16 sps:$4 sm:$0xff]  }
 0x215   :  { %v6469_v53 = vpop.eup %6468  ;;  %6488 = vpow2.f32 %v5013_v31 }
 0x216   :  { %v6471_v57 = vpop.eup %6470  ;;  %6490 = vpow2.f32 %v5015_v37  ;;  %v5876_v37 = vld [vmem:[#allocation10 + $0x244] ss:$16 sps:$4 sm:$0xff]  }
 0x217   :  { %v6473_v63 = vpop.eup %6472  ;;  %v805_v3 = vmul.f32 %v6471_v57, %v7081_v7  ;;  %6492 = vpow2.f32 %v5004_v46  ;;  %v796_v7 = vmul.f32 %v6469_v53, %v7076_v1  ;;  %v5870_v1 = vld [vmem:[#allocation10 + $0x224] ss:$16 sps:$4 sm:$0xff]  }
 0x218   :  { %v6475_v5 = vpop.eup %6474  ;;  %v807_v9 = vmul.f32 %v6473_v63, %v7083_v8  ;;  %6494 = vpow2.f32 %v5006_v54 }
 0x219   :  { %v6477_v11 = vpop.eup %6476  ;;  %v817_v15 = vpack.c.bf16 %v805_v3, %v793_v2  ;;  %v806_v18 = vmul.f32 %v6475_v5, %v7087_v13  ;;  %6496 = vpow2.f32 %v5005_v56  ;;  %v5882_v3 = vld [vmem:[#allocation10 + $0x264] ss:$16 sps:$4 sm:$0xff]  }
 0x21a   :  { %v6479_v58 = vpop.eup %6478  ;;  %v7166_v20 = vpack.c.bf16 %v807_v9, %v795_v6  ;;  %v808_v21 = vmul.f32 %v6477_v11, %v7089_v14  ;;  %6498 = vpow2.f32 %v5007_v60  ;;  %v5874_v60 = vld [vmem:[#allocation10 + $0x240] ss:$16 sps:$4 sm:$0xff]  }
 0x21b   :  { %v818_v8 = vpack.c.bf16 %v806_v18, %v794_v12  ;;  %v6481_v30 = vpop.eup %6480  ;;  %6500 = vpow2.f32 %v5016_v61  ;;  %v728_v34 = vadd.f32 1.0, %v6479_v58  ;;  %v5877_v61 = vld [vmem:[#allocation10 + $0x248] ss:$16 sps:$4 sm:$0xff]  }
 0x21c   :  { %v820_v33 = vpack.c.bf16 %v808_v21, %v796_v7  ;;  %v7170_v13 = vpop.eup %6482  ;;  %6502 = vpow2.f32 %v5018_v4  ;;  %v797_v17 = vmul.f32 %v6481_v30, %v7102_v24  ;;  %v5885_v4 = vld [vmem:[#allocation10 + $0x26c] ss:$16 sps:$4 sm:$0xff]   ;;  %v5883_v18 = vld [vmem:[#allocation10 + $0x268] ss:$16 sps:$4 sm:$0xff]   ;;  %v5888_v21 = vld [vmem:[#allocation10 + $0x284] ss:$16 sps:$4 sm:$0xff]  }
 0x21d   :  { %1643 = vmatprep.mubr.bf16.mxu0 %v818_v8  ;;  %1729 = vmatprep.mubr.bf16.mxu1 %v818_v8  ;;  %v6485_v14 = vpop.eup %6484  ;;  %6504 = vpow2.f32 %v5017_v10 }
 0x21e   :  { %1644 = vmatmul.mubr.bf16.vlgmr.msra.gmra.mrb[12].mxu0 %v817_v15  ;;  %1730 = vmatmul.mubr.bf16.vlgmr.msra.gmra.mrb[12].mxu1 %v817_v15  ;;  %v6487_v43 = vpop.eup %6486  ;;  %v809_v31 = vmul.f32 %v6485_v14, %v7113_v35  ;;  %6506 = vpow2.f32 %v5019_v59  ;;  %v5880_v15 = vld [vmem:[#allocation10 + $0x260] ss:$16 sps:$4 sm:$0xff]   ;;  %v5891_v59 = vld [vmem:[#allocation10 + $0x28c] ss:$16 sps:$4 sm:$0xff]  }
 0x21f   :  { %1655 = vmatpush1.bf16.msra.mxu0 %v5862_v23  ;;  %1741 = vmatpush1.bf16.msra.mxu1 %v5865_v26  ;;  %v6489_v36 = vpop.eup %6488  ;;  %6508 = vrcp.f32 %v726_v0  ;;  %v739_v32 = vadd.f32 1.0, %v6487_v43  ;;  %v5897_v14 = vld [vmem:[#allocation10 + $0x2ac] ss:$16 sps:$4 sm:$0xff]  }
 0x220   :  { %1686 = vmatprep.mubr.bf16.mxu0 %v820_v33  ;;  %1772 = vmatprep.mubr.bf16.mxu1 %v820_v33  ;;  %v6491_v46 = vpop.eup %6490  ;;  %6510 = vrcp.f32 %v728_v34  ;;  %v7174_v53 = vpack.c.bf16 %v809_v31, %v797_v17  ;;  %v738_v54 = vadd.f32 1.0, %v6489_v36  ;;  %v5886_v33 = vld [vmem:[#allocation10 + $0x280] ss:$16 sps:$4 sm:$0xff]   ;;  %v5889_v34 = vld [vmem:[#allocation10 + $0x288] ss:$16 sps:$4 sm:$0xff]   ;;  %v799_v17 = vmul.f32 %v7170_v13, %v7105_v25 }
 0x221   :  { %1656 = vmatprep.subr.bf16.mxu0 %v5870_v1  ;;  %1742 = vmatprep.subr.bf16.mxu1 %v5873_v38  ;;  %v6493_v24 = vpop.eup %6492  ;;  %6512 = vrcp.f32 %v739_v32  ;;  %v740_v35 = vadd.f32 1.0, %v6491_v46  ;;  %v5894_v38 = vld [vmem:[#allocation10 + $0x2a4] ss:$16 sps:$4 sm:$0xff]  }
 0x222   :  { %v6495_v57 = vpop.eup %6494  ;;  %6514 = vrcp.f32 %v738_v54  ;;  %v729_v56 = vadd.f32 1.0, %v6493_v24  ;;  %v5892_v54 = vld [vmem:[#allocation10 + $0x2a0] ss:$16 sps:$4 sm:$0xff]   ;;  %v5895_v24 = vld [vmem:[#allocation10 + $0x2a8] ss:$16 sps:$4 sm:$0xff]  }
 0x223   :  { %1657 = vmatpush1.bf16.msra.mxu0 %v5868_v40  ;;  %1743 = vmatpush1.bf16.msra.mxu1 %v5871_v19  ;;  %v6497_v63 = vpop.eup %6496  ;;  %6516 = vrcp.f32 %v740_v35  ;;  %v731_v2 = vadd.f32 1.0, %v6495_v57  ;;  %v5900_v25 = vld [vmem:[#allocation10 + $0x2c4] ss:$16 sps:$4 sm:$0xff]  }
 0x224   :  { %1658 = vmatprep.subr.bf16.mxu0 %v5876_v37  ;;  %1744 = vmatprep.subr.bf16.mxu1 %v5879_v41  ;;  %v6499_v5 = vpop.eup %6498  ;;  %6518 = vrcp.f32 %v729_v56  ;;  %v730_v6 = vadd.f32 1.0, %v6497_v63  ;;  %v5898_v56 = vld [vmem:[#allocation10 + $0x2c0] ss:$16 sps:$4 sm:$0xff]  }
 0x225   :  { %v6501_v9 = vpop.eup %6500  ;;  %6520 = vrcp.f32 %v731_v2  ;;  %v732_v10 = vadd.f32 1.0, %v6499_v5  ;;  %v5906_v2 = vld [vmem:[#allocation10 + $0x2e4] ss:$16 sps:$4 sm:$0xff]  }
 0x226   :  { %v6503_v11 = vpop.eup %6502  ;;  %6522 = vrcp.f32 %v730_v6  ;;  %v741_v12 = vadd.f32 1.0, %v6501_v9 }
 0x227   :  { %1659 = vmatpush1.bf16.msra.mxu0 %v5874_v60  ;;  %1745 = vmatpush1.bf16.msra.mxu1 %v5877_v61  ;;  %v6505_v58 = vpop.eup %6504  ;;  %6524 = vrcp.f32 %v732_v10  ;;  %v743_v7 = vadd.f32 1.0, %v6503_v11 }
 0x228   :  { %1660 = vmatprep.subr.bf16.mxu0 %v5882_v3  ;;  %1746 = vmatprep.subr.bf16.mxu1 %v5885_v4  ;;  %v6507_v8 = vpop.eup %6506  ;;  %6526 = vrcp.f32 %v741_v12  ;;  %v742_v23 = vadd.f32 1.0, %v6505_v58  ;;  %v5909_v3 = vld [vmem:[#allocation10 + $0x2ec] ss:$16 sps:$4 sm:$0xff]   ;;  %v5907_v58 = vld [vmem:[#allocation10 + $0x2e8] ss:$16 sps:$4 sm:$0xff]  }
 0x229   :  { %v6509_v26 = vpop.eup %6508  ;;  %6528 = vrcp.f32 %v743_v7  ;;  %v744_v30 = vadd.f32 1.0, %v6507_v8  ;;  %v5919_v8 = vld [vmem:[#allocation10 + $0x328] ss:$16 sps:$4 sm:$0xff]  }
 0x22a   :  { %v6511_v0 = vpop.eup %6510  ;;  %6530 = vrcp.f32 %v742_v23  ;;  %v798_v19 = vmul.f32 %v6509_v26, %v7108_v28  ;;  %v5924_v23 = vld [vmem:[#allocation10 + $0x344] ss:$16 sps:$4 sm:$0xff]   ;;  %v5927_v26 = vld [vmem:[#allocation10 + $0x34c] ss:$16 sps:$4 sm:$0xff]  }
 0x22b   :  { %1661 = vmatpush1.bf16.msra.mxu0 %v5880_v15  ;;  %1747 = vmatpush1.bf16.msra.mxu1 %v5883_v18  ;;  %v6513_v1 = vpop.eup %6512  ;;  %6532 = vrcp.f32 %v744_v30  ;;  %v800_v37 = vmul.f32 %v6511_v0, %v7122_v62  ;;  %v5904_v18 = vld [vmem:[#allocation10 + $0x2e0] ss:$16 sps:$4 sm:$0xff]   ;;  %v5925_v0 = vld [vmem:[#allocation10 + $0x348] ss:$16 sps:$4 sm:$0xff]  }
 0x22c   :  { %1662 = vmatprep.subr.bf16.mxu0 %v5888_v21  ;;  %1748 = vmatprep.subr.bf16.mxu1 %v5891_v59  ;;  %v6515_v43 = vpop.eup %6514  ;;  %v811_v31 = vmul.f32 %v6513_v1, %v7133_v27  ;;  %v5903_v27 = vld [vmem:[#allocation10 + $0x2cc] ss:$16 sps:$4 sm:$0xff]   ;;  %v5918_v21 = vld [vmem:[#allocation10 + $0x324] ss:$16 sps:$4 sm:$0xff]   ;;  %v5916_v59 = vld [vmem:[#allocation10 + $0x320] ss:$16 sps:$4 sm:$0xff]  }
 0x22d   :  { %v6517_v40 = vpop.eup %6516  ;;  %v810_v36 = vmul.f32 %v6515_v43, %v7136_v29  ;;  %v5922_v30 = vld [vmem:[#allocation10 + $0x340] ss:$16 sps:$4 sm:$0xff]   ;;  %v5939_v43 = vld [vmem:[#allocation10 + $0x38c] ss:$16 sps:$4 sm:$0xff]  }
 0x22e   :  { %v6519_v32 = vpop.eup %6518  ;;  %v7182_v41 = vpack.c.bf16 %v811_v31, %v799_v17  ;;  %v812_v46 = vmul.f32 %v6517_v40, %v7139_v39  ;;  %v5901_v39 = vld [vmem:[#allocation10 + $0x2c8] ss:$16 sps:$4 sm:$0xff]   ;;  %v5928_v1 = vld [vmem:[#allocation10 + $0x360] ss:$16 sps:$4 sm:$0xff]   ;;  %v5942_v40 = vld [vmem:[#allocation10 + $0x3a4] ss:$16 sps:$4 sm:$0xff]  }
 0x22f   :  { %1663 = vmatpush1.bf16.msra.mxu0 %v5886_v33  ;;  %1749 = vmatpush1.bf16.msra.mxu1 %v5889_v34  ;;  %v6521_v35 = vpop.eup %6520  ;;  %v7185_v13 = vpack.c.bf16 %v810_v36, %v798_v19  ;;  %v801_v61 = vmul.f32 %v6519_v32, %v7141_v42  ;;  %v5930_v33 = vld [vmem:[#allocation10 + $0x364] ss:$16 sps:$4 sm:$0xff]   ;;  %v5933_v34 = vld [vmem:[#allocation10 + $0x36c] ss:$16 sps:$4 sm:$0xff]   ;;  %v5934_v17 = vld [vmem:[#allocation10 + $0x380] ss:$16 sps:$4 sm:$0xff]  }
 0x230   :  { %1664 = vmatprep.subr.bf16.mxu0 %v5894_v38  ;;  %1750 = vmatprep.subr.bf16.mxu1 %v5897_v14  ;;  %v6523_v28 = vpop.eup %6522  ;;  %v7187_v29 = vpack.c.bf16 %v812_v46, %v800_v37  ;;  %v803_v5 = vmul.f32 %v6521_v35, %v7120_v55  ;;  %v5912_v55 = vld [vmem:[#allocation10 + $0x304] ss:$16 sps:$4 sm:$0xff]   ;;  %v5931_v38 = vld [vmem:[#allocation10 + $0x368] ss:$16 sps:$4 sm:$0xff]   ;;  %v5945_v19 = vld [vmem:[#allocation10 + $0x3ac] ss:$16 sps:$4 sm:$0xff]  }
 0x231   :  { %v6525_v57 = vpop.eup %6524  ;;  %v802_v10 = vmul.f32 %v6523_v28, %v7145_v44  ;;  %v5936_v14 = vld [vmem:[#allocation10 + $0x384] ss:$16 sps:$4 sm:$0xff]   ;;  %v5937_v31 = vld [vmem:[#allocation10 + $0x388] ss:$16 sps:$4 sm:$0xff]   ;;  %v5940_v36 = vld [vmem:[#allocation10 + $0x3a0] ss:$16 sps:$4 sm:$0xff]  }
 0x232   :  { %v6527_v62 = vpop.eup %6526  ;;  %v804_v42 = vmul.f32 %v6525_v57, %v7124_v49  ;;  %v5913_v49 = vld [vmem:[#allocation10 + $0x308] ss:$16 sps:$4 sm:$0xff]   ;;  %v5948_v37 = vld [vmem:[#allocation10 + $0x3c4] ss:$16 sps:$4 sm:$0xff]   ;;  %v5951_v46 = vld [vmem:[#allocation10 + $0x3cc] ss:$16 sps:$4 sm:$0xff]  }
 0x233   :  { %1665 = vmatpush1.bf16.msra.mxu0 %v5892_v54  ;;  %1751 = vmatpush1.bf16.msra.mxu1 %v5895_v24  ;;  %v6529_v60 = vpop.eup %6528  ;;  %v813_v63 = vmul.f32 %v6527_v62, %v7147_v45  ;;  %v5943_v32 = vld [vmem:[#allocation10 + $0x3a8] ss:$16 sps:$4 sm:$0xff]   ;;  %v5946_v54 = vld [vmem:[#allocation10 + $0x3c0] ss:$16 sps:$4 sm:$0xff]   ;;  %v5954_v35 = vld [vmem:[#allocation10 + $0x3e4] ss:$16 sps:$4 sm:$0xff]  }
 0x234   :  { %1666 = vmatprep.subr.bf16.mxu0 %v5900_v25  ;;  %1752 = vmatprep.subr.bf16.mxu1 %v5903_v27  ;;  %v6531_v4 = vpop.eup %6530  ;;  %v815_v6 = vmul.f32 %v6529_v60, %v7127_v16  ;;  %v5915_v16 = vld [vmem:[#allocation10 + $0x30c] ss:$16 sps:$4 sm:$0xff]   ;;  %v5949_v24 = vld [vmem:[#allocation10 + $0x3c8] ss:$16 sps:$4 sm:$0xff]   ;;  %v5952_v27 = vld [vmem:[#allocation10 + $0x3e0] ss:$16 sps:$4 sm:$0xff]  }
 0x235   :  { %v6533_v9 = vpop.eup %6532  ;;  %v7194_v11 = vpack.c.bf16 %v813_v63, %v801_v61  ;;  %v814_v12 = vmul.f32 %v6531_v4, %v7151_v52  ;;  %v5910_v52 = vld [vmem:[#allocation10 + $0x300] ss:$16 sps:$4 sm:$0xff]   ;;  %v5957_v25 = vld [vmem:[#allocation10 + $0x3ec] ss:$16 sps:$4 sm:$0xff]   ;;  %v5955_v28 = vld [vmem:[#allocation10 + $0x3e8] ss:$16 sps:$4 sm:$0xff]  }
 0x236   :  { %v7198_v15 = vpack.c.bf16 %v815_v6, %v803_v5  ;;  %v816_v45 = vmul.f32 %v6533_v9, %v7130_v22  ;;  %v5921_v22 = vld [vmem:[#allocation10 + $0x32c] ss:$16 sps:$4 sm:$0xff]   ;;  %v5962_v60 = vld [vmem:[#allocation13 + $0x48] sm:$0xff]   ;;  %v5970_v6 = vld [vmem:[#allocation13 + $0x58] sm:$0xff]  }
 0x237   :  { %1667 = vmatpush1.bf16.msra.mxu0 %v5898_v56  ;;  %1753 = vmatpush1.bf16.msra.mxu1 %v5901_v39  ;;  %v7201_v7 = vpack.c.bf16 %v814_v12, %v802_v10  ;;  %v5958_v57 = vld [vmem:[#allocation13 + $0x40] sm:$0xff]   ;;  %v5963_v61 = vld [vmem:[#allocation13 + $0xc8] sm:$0xff]   ;;  %v5967_v4 = vld [vmem:[#allocation13 + $0xd0] sm:$0xff]  }
 0x238   :  { %1668 = vmatprep.subr.bf16.mxu0 %v5906_v2  ;;  %1754 = vmatprep.subr.bf16.mxu1 %v5909_v3  ;;  %v7203_v44 = vpack.c.bf16 %v816_v45, %v804_v42  ;;  %v5959_v62 = vld [vmem:[#allocation13 + $0xc0] sm:$0xff]   ;;  %v5964_v63 = vld [vmem:[#allocation13 + $0x8] sm:$0xff]   ;;  %v5966_v3 = vld [vmem:[#allocation13 + $0x50] sm:$0xff]  }
 0x239   :  { %v5960_v56 = vld [vmem:[#allocation13] sm:$0xff]   ;;  %v5965_v2 = vld [vmem:[#allocation13 + $0x88] sm:$0xff]   ;;  %v5968_v5 = vld [vmem:[#allocation13 + $0x10] sm:$0xff]  }
 0x23a   :  { %v5961_v39 = vld [vmem:[#allocation13 + $0x80] sm:$0xff]   ;;  %v5971_v9 = vld [vmem:[#allocation13 + $0xd8] sm:$0xff]  }
 0x23b   :  { %1669 = vmatpush1.bf16.msra.mxu0 %v5904_v18  ;;  %1755 = vmatpush1.bf16.msra.mxu1 %v5907_v58  ;;  %v5972_v10 = vld [vmem:[#allocation13 + $0x18] sm:$0xff]   ;;  %v5974_v42 = vld [vmem:[#allocation13 + $0x60] sm:$0xff]  }
 0x23c   :  { %1670 = vmatprep.subr.bf16.mxu0 %v5912_v55  ;;  %1756 = vmatprep.subr.bf16.mxu1 %v5915_v16  ;;  %v5973_v12 = vld [vmem:[#allocation13 + $0x98] sm:$0xff]   ;;  %v5975_v45 = vld [vmem:[#allocation13 + $0xe0] sm:$0xff]   ;;  %v5978_v55 = vld [vmem:[#allocation13 + $0x68] sm:$0xff]  }
 0x23d   :  { %v5976_v18 = vld [vmem:[#allocation13 + $0x20] sm:$0xff]   ;;  %v5979_v16 = vld [vmem:[#allocation13 + $0xe8] sm:$0xff]  }
 0x23e   :  { %v5977_v58 = vld [vmem:[#allocation13 + $0xa0] sm:$0xff]  }
 0x23f   :  { %1671 = vmatpush1.bf16.msra.mxu0 %v5910_v52  ;;  %1757 = vmatpush1.bf16.msra.mxu1 %v5913_v49  ;;  %v5980_v52 = vld [vmem:[#allocation13 + $0x28] sm:$0xff]  }
 0x240   :  { %1672 = vmatprep.subr.bf16.mxu0 %v5918_v21  ;;  %1758 = vmatprep.subr.bf16.mxu1 %v5921_v22  ;;  %v5981_v49 = vld [vmem:[#allocation13 + $0xa8] sm:$0xff]   ;;  %v5982_v21 = vld [vmem:[#allocation13 + $0x70] sm:$0xff]  }
 0x241   :  { %v5983_v22 = vld [vmem:[#allocation13 + $0xf0] sm:$0xff]  }
 0x243   :  { %1673 = vmatpush1.bf16.msra.mxu0 %v5916_v59  ;;  %1759 = vmatpush1.bf16.msra.mxu1 %v5919_v8  ;;  %v5984_v59 = vld [vmem:[#allocation13 + $0x30] sm:$0xff]  }
 0x244   :  { %1674 = vmatprep.subr.bf16.mxu0 %v5924_v23  ;;  %1760 = vmatprep.subr.bf16.mxu1 %v5927_v26  ;;  %v5985_v8 = vld [vmem:[#allocation13 + $0xb0] sm:$0xff]   ;;  %v5986_v23 = vld [vmem:[#allocation13 + $0x78] sm:$0xff]  }
 0x245   :  { %v5987_v26 = vld [vmem:[#allocation13 + $0xf8] sm:$0xff]  }
 0x247   :  { %1675 = vmatpush1.bf16.msra.mxu0 %v5922_v30  ;;  %1761 = vmatpush1.bf16.msra.mxu1 %v5925_v0  ;;  %v5988_v30 = vld [vmem:[#allocation13 + $0x38] sm:$0xff]  }
 0x248   :  { %1676 = vmatprep.subr.bf16.mxu0 %v5930_v33  ;;  %1762 = vmatprep.subr.bf16.mxu1 %v5933_v34  ;;  %v5989_v0 = vld [vmem:[#allocation13 + $0xb8] sm:$0xff]   ;;  %v5995_v34 = vld [vmem:[#allocation10 + $0x40c] ss:$16 sps:$4 sm:$0xff]  }
 0x249   :  { %v5992_v33 = vld [vmem:[#allocation10 + $0x404] ss:$16 sps:$4 sm:$0xff]  }
 0x24b   :  { %1677 = vmatpush1.bf16.msra.mxu0 %v5928_v1  ;;  %1763 = vmatpush1.bf16.msra.mxu1 %v5931_v38  ;;  %v949_v1 = vld [vmem:[#allocation11] sm:$0xf] }
 0x24c   :  { %1678 = vmatprep.subr.bf16.mxu0 %v5936_v14  ;;  %1764 = vmatprep.subr.bf16.mxu1 %v5939_v43  ;;  %v954_v38 = vrot.slane %v949_v1, %v7047_v47  ;;  %v962_v14 = vrot.slane %v949_v1, %v7050_v48  ;;  %v958_v43 = vrot.slane %v949_v1, %v7055_v50 }
 0x24f   :  { %1679 = vmatpush1.bf16.msra.mxu0 %v5934_v17  ;;  %1765 = vmatpush1.bf16.msra.mxu1 %v5937_v31  ;;  %v966_v17 = vrot.slane %v949_v1, %v7058_v51 }
 0x250   :  { %1680 = vmatprep.subr.bf16.mxu0 %v5942_v40  ;;  %1766 = vmatprep.subr.bf16.mxu1 %v5945_v19 }
 0x253   :  { %1681 = vmatpush1.bf16.msra.mxu0 %v5940_v36  ;;  %1767 = vmatpush1.bf16.msra.mxu1 %v5943_v32 }
 0x254   :  { %1682 = vmatprep.subr.bf16.mxu0 %v5948_v37  ;;  %1768 = vmatprep.subr.bf16.mxu1 %v5951_v46 }
 0x257   :  { %1683 = vmatpush1.bf16.msra.mxu0 %v5946_v54  ;;  %1769 = vmatpush1.bf16.msra.mxu1 %v5949_v24 }
 0x258   :  { %1684 = vmatprep.subr.bf16.mxu0 %v5954_v35  ;;  %1770 = vmatprep.subr.bf16.mxu1 %v5957_v25 }
 0x25b   :  { %1685 = vmatpush1.bf16.msra.mxu0 %v5952_v27  ;;  %1771 = vmatpush1.bf16.msra.mxu1 %v5955_v28 }
 0x25c   :  { %5527 = vmatprep.subr.bf16.mxu0 %v5958_v57  ;;  %5549 = vmatprep.subr.bf16.mxu1 %v5959_v62 }
 0x25e   :  { %1687 = vmatmul.mubr.bf16.vlgmr.msra.gmra.mrb[12].mxu0 %v7166_v20  ;;  %1773 = vmatmul.mubr.bf16.vlgmr.msra.gmra.mrb[12].mxu1 %v7166_v20  ;;  %v5969_v20 = vld [vmem:[#allocation13 + $0x90] sm:$0xff]  }
 0x25f   :  { %5528 = vmatpush3.bf16.msra.mxu0 %v5960_v56  ;;  %5550 = vmatpush3.bf16.msra.mxu1 %v5961_v39 }
 0x260   :  { %5529 = vmatprep.subr.bf16.mxu0 %v5962_v60  ;;  %5551 = vmatprep.subr.bf16.mxu1 %v5963_v61 }
 0x263   :  { %5530 = vmatpush3.bf16.msra.mxu0 %v5964_v63  ;;  %5552 = vmatpush3.bf16.msra.mxu1 %v5965_v2 }
 0x264   :  { %5531 = vmatprep.subr.bf16.mxu0 %v5966_v3  ;;  %5553 = vmatprep.subr.bf16.mxu1 %v5967_v4 }
 0x267   :  { %5532 = vmatpush3.bf16.msra.mxu0 %v5968_v5  ;;  %5554 = vmatpush3.bf16.msra.mxu1 %v5969_v20 }
 0x268   :  { %5533 = vmatprep.subr.bf16.mxu0 %v5970_v6  ;;  %5555 = vmatprep.subr.bf16.mxu1 %v5971_v9 }
 0x26b   :  { %5534 = vmatpush3.bf16.msra.mxu0 %v5972_v10  ;;  %5556 = vmatpush3.bf16.msra.mxu1 %v5973_v12 }
 0x26c   :  { %5535 = vmatprep.subr.bf16.mxu0 %v5974_v42  ;;  %5557 = vmatprep.subr.bf16.mxu1 %v5975_v45 }
 0x26f   :  { %5536 = vmatpush3.bf16.msra.mxu0 %v5976_v18  ;;  %5558 = vmatpush3.bf16.msra.mxu1 %v5977_v58 }
 0x270   :  { %5537 = vmatprep.subr.bf16.mxu0 %v5978_v55  ;;  %5559 = vmatprep.subr.bf16.mxu1 %v5979_v16 }
 0x273   :  { %5538 = vmatpush3.bf16.msra.mxu0 %v5980_v52  ;;  %5560 = vmatpush3.bf16.msra.mxu1 %v5981_v49 }
 0x274   :  { %5539 = vmatprep.subr.bf16.mxu0 %v5982_v21  ;;  %5561 = vmatprep.subr.bf16.mxu1 %v5983_v22 }
 0x277   :  { %5540 = vmatpush3.bf16.msra.mxu0 %v5984_v59  ;;  %5562 = vmatpush3.bf16.msra.mxu1 %v5985_v8 }
 0x278   :  { %5541 = vmatprep.subr.bf16.mxu0 %v5986_v23  ;;  %5563 = vmatprep.subr.bf16.mxu1 %v5987_v26 }
 0x27b   :  { %5542 = vmatpush3.bf16.msra.mxu0 %v5988_v30  ;;  %5564 = vmatpush3.bf16.msra.mxu1 %v5989_v0 }
 0x27c   :  { %2986 = vmatprep.subr.bf16.mxu0 %v5992_v33  ;;  %3072 = vmatprep.subr.bf16.mxu1 %v5995_v34 }
 0x331   :  { %v1688_v31 = vpop.f32.mrb[12].mxu0  ;;  %v1774_v40 = vpop.f32.mrb[12].mxu1 }
 0x332   :  { %v5659_v19 = vadd.f32 %v1688_v31, %v954_v38  ;;  %v5663_v36 = vadd.f32 %v1774_v40, %v962_v14  ;;  %v1690_v32 = vpop.f32.mrb[13].mxu0  ;;  %v1776_v37 = vpop.f32.mrb[13].mxu1 }
 0x333   :  { %v5660_v46 = vadd.f32 %v1690_v32, %v958_v43  ;;  %v7211_v54 = vadd.f32 %v1776_v37, %v966_v17  ;;  %v1692_v24 = vpop.f32.mrb[14].mxu0  ;;  %v1778_v35 = vpop.f32.mrb[14].mxu1 }
 0x334   :  { %v5148_v25 = vmul.f32 -1.442695, %v5659_v19  ;;  %v5150_v27 = vmul.f32 -1.442695, %v5663_v36  ;;  %v5661_v28 = vadd.f32 %v1692_v24, %v954_v38  ;;  %v5665_v57 = vadd.f32 %v1778_v35, %v962_v14  ;;  %v1694_v62 = vpop.f32.mrb[15].mxu0  ;;  %v1780_v56 = vpop.f32.mrb[15].mxu1 }
 0x335   :  { %v5149_v39 = vmul.f32 -1.442695, %v5660_v46  ;;  %v5151_v60 = vmul.f32 -1.442695, %v7211_v54  ;;  %v5662_v61 = vadd.f32 %v1694_v62, %v958_v43  ;;  %v5666_v63 = vadd.f32 %v1780_v56, %v966_v17  ;;  %v5993_v56 = vld [vmem:[#allocation10 + $0x408] ss:$16 sps:$4 sm:$0xff]  }
 0x336   :  { %6534 = vpow2.f32 %v5148_v25  ;;  %v5152_v2 = vmul.f32 -1.442695, %v5661_v28  ;;  %v5154_v3 = vmul.f32 -1.442695, %v5665_v57 }
 0x337   :  { %6536 = vpow2.f32 %v5150_v27  ;;  %v5153_v4 = vmul.f32 -1.442695, %v5662_v61  ;;  %v5155_v5 = vmul.f32 -1.442695, %v5666_v63  ;;  %v5990_v27 = vld [vmem:[#allocation10 + $0x400] ss:$16 sps:$4 sm:$0xff]  }
 0x338   :  { %6538 = vpow2.f32 %v5149_v39  ;;  %v5998_v39 = vld [vmem:[#allocation10 + $0x424] ss:$16 sps:$4 sm:$0xff]  }
 0x339   :  { %6540 = vpow2.f32 %v5151_v60  ;;  %v6005_v60 = vld [vmem:[#allocation10 + $0x448] ss:$16 sps:$4 sm:$0xff]  }
 0x33a   :  { %6542 = vpow2.f32 %v5152_v2  ;;  %v6008_v2 = vld [vmem:[#allocation10 + $0x460] ss:$16 sps:$4 sm:$0xff]  }
 0x33b   :  { %6544 = vpow2.f32 %v5154_v3  ;;  %v6011_v3 = vld [vmem:[#allocation10 + $0x468] ss:$16 sps:$4 sm:$0xff]  }
 0x33c   :  { %6546 = vpow2.f32 %v5153_v4  ;;  %v6016_v4 = vld [vmem:[#allocation10 + $0x484] ss:$16 sps:$4 sm:$0xff]  }
 0x33d   :  { %6548 = vpow2.f32 %v5155_v5  ;;  %v6019_v5 = vld [vmem:[#allocation10 + $0x48c] ss:$16 sps:$4 sm:$0xff]  }
 0x340   :  { %v6535_v20 = vpop.eup %6534 }
 0x341   :  { %v6537_v6 = vpop.eup %6536  ;;  %v1807_v9 = vadd.f32 1.0, %v6535_v20  ;;  %v6017_v20 = vld [vmem:[#allocation10 + $0x488] ss:$16 sps:$4 sm:$0xff]  }
 0x342   :  { %v6539_v10 = vpop.eup %6538  ;;  %v1809_v12 = vadd.f32 1.0, %v6537_v6  ;;  %v6022_v6 = vld [vmem:[#allocation10 + $0x4a4] ss:$16 sps:$4 sm:$0xff]  }
 0x343   :  { %v6541_v42 = vpop.eup %6540  ;;  %6550 = vrcp.f32 %v1807_v9  ;;  %v1808_v45 = vadd.f32 1.0, %v6539_v10  ;;  %v6025_v9 = vld [vmem:[#allocation10 + $0x4ac] ss:$16 sps:$4 sm:$0xff]   ;;  %v6020_v10 = vld [vmem:[#allocation10 + $0x4a0] ss:$16 sps:$4 sm:$0xff]  }
 0x344   :  { %v6543_v18 = vpop.eup %6542  ;;  %6552 = vrcp.f32 %v1809_v12  ;;  %v1810_v58 = vadd.f32 1.0, %v6541_v42  ;;  %v6023_v12 = vld [vmem:[#allocation10 + $0x4a8] ss:$16 sps:$4 sm:$0xff]   ;;  %v6028_v42 = vld [vmem:[#allocation10 + $0x4c4] ss:$16 sps:$4 sm:$0xff]  }
 0x345   :  { %v6545_v55 = vpop.eup %6544  ;;  %6554 = vrcp.f32 %v1808_v45  ;;  %v1811_v16 = vadd.f32 1.0, %v6543_v18  ;;  %v6031_v45 = vld [vmem:[#allocation10 + $0x4cc] ss:$16 sps:$4 sm:$0xff]   ;;  %v6026_v18 = vld [vmem:[#allocation10 + $0x4c0] ss:$16 sps:$4 sm:$0xff]  }
 0x346   :  { %v6547_v52 = vpop.eup %6546  ;;  %6556 = vrcp.f32 %v1810_v58  ;;  %v1813_v49 = vadd.f32 1.0, %v6545_v55  ;;  %v6029_v58 = vld [vmem:[#allocation10 + $0x4c8] ss:$16 sps:$4 sm:$0xff]   ;;  %v6034_v55 = vld [vmem:[#allocation10 + $0x4e4] ss:$16 sps:$4 sm:$0xff]  }
 0x347   :  { %v6549_v21 = vpop.eup %6548  ;;  %6558 = vrcp.f32 %v1811_v16  ;;  %v1812_v22 = vadd.f32 1.0, %v6547_v52  ;;  %v6037_v16 = vld [vmem:[#allocation10 + $0x4ec] ss:$16 sps:$4 sm:$0xff]   ;;  %v6032_v52 = vld [vmem:[#allocation10 + $0x4e0] ss:$16 sps:$4 sm:$0xff]  }
 0x348   :  { %6560 = vrcp.f32 %v1813_v49  ;;  %v1814_v59 = vadd.f32 1.0, %v6549_v21  ;;  %v6035_v49 = vld [vmem:[#allocation10 + $0x4e8] ss:$16 sps:$4 sm:$0xff]   ;;  %v6040_v21 = vld [vmem:[#allocation10 + $0x504] ss:$16 sps:$4 sm:$0xff]  }
 0x349   :  { %6562 = vrcp.f32 %v1812_v22  ;;  %v6043_v22 = vld [vmem:[#allocation10 + $0x50c] ss:$16 sps:$4 sm:$0xff]  }
 0x34a   :  { %6564 = vrcp.f32 %v1814_v59  ;;  %v6038_v59 = vld [vmem:[#allocation10 + $0x500] ss:$16 sps:$4 sm:$0xff]  }
 0x34d   :  { %v6551_v8 = vpop.eup %6550 }
 0x34e   :  { %v6553_v23 = vpop.eup %6552  ;;  %v1831_v34 = vmul.f32 %v6551_v8, %v5659_v19  ;;  %v6001_v19 = vld [vmem:[#allocation10 + $0x42c] ss:$16 sps:$4 sm:$0xff]   ;;  %v6041_v8 = vld [vmem:[#allocation10 + $0x508] ss:$16 sps:$4 sm:$0xff]  }
 0x34f   :  { %v6555_v26 = vpop.eup %6554  ;;  %v1833_v14 = vmul.f32 %v6553_v23, %v5663_v36  ;;  %v5996_v36 = vld [vmem:[#allocation10 + $0x420] ss:$16 sps:$4 sm:$0xff]   ;;  %v6046_v23 = vld [vmem:[#allocation10 + $0x524] ss:$16 sps:$4 sm:$0xff]  }
 0x350   :  { %v6557_v30 = vpop.eup %6556  ;;  %v1832_v31 = vmul.f32 %v6555_v26, %v5660_v46  ;;  %v5999_v46 = vld [vmem:[#allocation10 + $0x428] ss:$16 sps:$4 sm:$0xff]   ;;  %v6049_v26 = vld [vmem:[#allocation10 + $0x52c] ss:$16 sps:$4 sm:$0xff]  }
 0x351   :  { %v6559_v0 = vpop.eup %6558  ;;  %v1834_v37 = vmul.f32 %v6557_v30, %v7211_v54  ;;  %v6007_v54 = vld [vmem:[#allocation10 + $0x44c] ss:$16 sps:$4 sm:$0xff]   ;;  %v6044_v30 = vld [vmem:[#allocation10 + $0x520] ss:$16 sps:$4 sm:$0xff]  }
 0x352   :  { %v6561_v33 = vpop.eup %6560  ;;  %v1835_v1 = vmul.f32 %v6559_v0, %v5661_v28  ;;  %v6004_v28 = vld [vmem:[#allocation10 + $0x444] ss:$16 sps:$4 sm:$0xff]   ;;  %v6047_v0 = vld [vmem:[#allocation10 + $0x528] ss:$16 sps:$4 sm:$0xff]  }
 0x353   :  { %v6563_v38 = vpop.eup %6562  ;;  %v1837_v43 = vmul.f32 %v6561_v33, %v5665_v57  ;;  %v6002_v57 = vld [vmem:[#allocation10 + $0x440] ss:$16 sps:$4 sm:$0xff]   ;;  %v6052_v33 = vld [vmem:[#allocation10 + $0x544] ss:$16 sps:$4 sm:$0xff]  }
 0x354   :  { %v6565_v17 = vpop.eup %6564  ;;  %v1839_v40 = vpack.c.bf16 %v1835_v1, %v1831_v34  ;;  %v1836_v32 = vmul.f32 %v6563_v38, %v5662_v61  ;;  %v6010_v61 = vld [vmem:[#allocation10 + $0x464] ss:$16 sps:$4 sm:$0xff]   ;;  %v6055_v34 = vld [vmem:[#allocation10 + $0x54c] ss:$16 sps:$4 sm:$0xff]   ;;  %v6050_v1 = vld [vmem:[#allocation10 + $0x540] ss:$16 sps:$4 sm:$0xff]  }
 0x355   :  { %v1841_v24 = vpack.c.bf16 %v1837_v43, %v1833_v14  ;;  %v1838_v35 = vmul.f32 %v6565_v17, %v5666_v63  ;;  %v6013_v63 = vld [vmem:[#allocation10 + $0x46c] ss:$16 sps:$4 sm:$0xff]   ;;  %v6053_v38 = vld [vmem:[#allocation10 + $0x548] ss:$16 sps:$4 sm:$0xff]   ;;  %v6058_v14 = vld [vmem:[#allocation10 + $0x564] ss:$16 sps:$4 sm:$0xff]  }
 0x356   :  { %v1840_v25 = vpack.c.bf16 %v1836_v32, %v1832_v31  ;;  %v6061_v43 = vld [vmem:[#allocation10 + $0x56c] ss:$16 sps:$4 sm:$0xff]   ;;  %v6056_v17 = vld [vmem:[#allocation10 + $0x560] ss:$16 sps:$4 sm:$0xff]   ;;  %v6059_v31 = vld [vmem:[#allocation10 + $0x568] ss:$16 sps:$4 sm:$0xff]  }
 0x357   :  { %v1842_v62 = vpack.c.bf16 %v1838_v35, %v1834_v37  ;;  %v6067_v32 = vld [vmem:[#allocation10 + $0x58c] ss:$16 sps:$4 sm:$0xff]   ;;  %v6062_v37 = vld [vmem:[#allocation10 + $0x580] ss:$16 sps:$4 sm:$0xff]   ;;  %v6070_v35 = vld [vmem:[#allocation10 + $0x5a4] ss:$16 sps:$4 sm:$0xff]  }
 0x358   :  { %2138 = vmatprep.mubr.bf16.mxu0 %v1840_v25  ;;  %v6073_v25 = vld [vmem:[#allocation10 + $0x5ac] ss:$16 sps:$4 sm:$0xff]  }
 0x359   :  { %2179 = vmatprep.mubr.bf16.mxu1 %v1842_v62  ;;  %2139 = vmatmul.mubr.bf16.vlgmr.msra.gmra.mrb[16].mxu0 %v1839_v40  ;;  %v6064_v40 = vld [vmem:[#allocation10 + $0x584] ss:$16 sps:$4 sm:$0xff]   ;;  %v6071_v62 = vld [vmem:[#allocation10 + $0x5a8] ss:$16 sps:$4 sm:$0xff]  }
 0x35a   :  { %2180 = vmatmul.mubr.bf16.vlgmr.msra.gmra.mrb[16].mxu1 %v1841_v24  ;;  %2987 = vmatpush1.bf16.msra.mxu0 %v5990_v27  ;;  %v6065_v24 = vld [vmem:[#allocation10 + $0x588] ss:$16 sps:$4 sm:$0xff]   ;;  %v6068_v27 = vld [vmem:[#allocation10 + $0x5a0] ss:$16 sps:$4 sm:$0xff]  }
 0x35b   :  { %3073 = vmatpush1.bf16.msra.mxu1 %v5993_v56  ;;  %3018 = vmatprep.mubr.bf16.mxu0 %v7185_v13  ;;  %v6076_v56 = vld [vmem:[#allocation10 + $0x5c4] ss:$16 sps:$4 sm:$0xff]  }
 0x35c   :  { %3104 = vmatprep.mubr.bf16.mxu1 %v7185_v13  ;;  %2988 = vmatprep.subr.bf16.mxu0 %v5998_v39  ;;  %v6014_v13 = vld [vmem:[#allocation10 + $0x480] ss:$16 sps:$4 sm:$0xff]   ;;  %v6079_v39 = vld [vmem:[#allocation10 + $0x5cc] ss:$16 sps:$4 sm:$0xff]  }
 0x35d   :  { %3074 = vmatprep.subr.bf16.mxu1 %v6001_v19  ;;  %v6074_v19 = vld [vmem:[#allocation10 + $0x5c0] ss:$16 sps:$4 sm:$0xff]  }
 0x35e   :  { %2989 = vmatpush1.bf16.msra.mxu0 %v5996_v36  ;;  %v6077_v36 = vld [vmem:[#allocation10 + $0x5c8] ss:$16 sps:$4 sm:$0xff]  }
 0x35f   :  { %3075 = vmatpush1.bf16.msra.mxu1 %v5999_v46  ;;  %2990 = vmatprep.subr.bf16.mxu0 %v6004_v28  ;;  %v6082_v46 = vld [vmem:[#allocation10 + $0x5e4] ss:$16 sps:$4 sm:$0xff]   ;;  %v6085_v28 = vld [vmem:[#allocation10 + $0x5ec] ss:$16 sps:$4 sm:$0xff]  }
 0x360   :  { %3076 = vmatprep.subr.bf16.mxu1 %v6007_v54  ;;  %v6080_v54 = vld [vmem:[#allocation10 + $0x5e0] ss:$16 sps:$4 sm:$0xff]  }
 0x362   :  { %2991 = vmatpush1.bf16.msra.mxu0 %v6002_v57  ;;  %v6083_v57 = vld [vmem:[#allocation10 + $0x5e8] ss:$16 sps:$4 sm:$0xff]  }
 0x363   :  { %3077 = vmatpush1.bf16.msra.mxu1 %v6005_v60  ;;  %2992 = vmatprep.subr.bf16.mxu0 %v6010_v61  ;;  %v6088_v60 = vld [vmem:[#allocation10 + $0x604] ss:$16 sps:$4 sm:$0xff]   ;;  %v6091_v61 = vld [vmem:[#allocation10 + $0x60c] ss:$16 sps:$4 sm:$0xff]  }
 0x364   :  { %3078 = vmatprep.subr.bf16.mxu1 %v6013_v63  ;;  %v6086_v63 = vld [vmem:[#allocation10 + $0x600] ss:$16 sps:$4 sm:$0xff]  }
 0x366   :  { %2993 = vmatpush1.bf16.msra.mxu0 %v6008_v2  ;;  %v6089_v2 = vld [vmem:[#allocation10 + $0x608] ss:$16 sps:$4 sm:$0xff]  }
 0x367   :  { %3079 = vmatpush1.bf16.msra.mxu1 %v6011_v3  ;;  %2994 = vmatprep.subr.bf16.mxu0 %v6016_v4  ;;  %v6094_v3 = vld [vmem:[#allocation10 + $0x624] ss:$16 sps:$4 sm:$0xff]   ;;  %v6097_v4 = vld [vmem:[#allocation10 + $0x62c] ss:$16 sps:$4 sm:$0xff]  }
 0x368   :  { %3080 = vmatprep.subr.bf16.mxu1 %v6019_v5  ;;  %v6092_v5 = vld [vmem:[#allocation10 + $0x620] ss:$16 sps:$4 sm:$0xff]  }
 0x36a   :  { %2995 = vmatpush1.bf16.msra.mxu0 %v6014_v13  ;;  %v6095_v13 = vld [vmem:[#allocation10 + $0x628] ss:$16 sps:$4 sm:$0xff]  }
 0x36b   :  { %3081 = vmatpush1.bf16.msra.mxu1 %v6017_v20  ;;  %2996 = vmatprep.subr.bf16.mxu0 %v6022_v6  ;;  %v6100_v20 = vld [vmem:[#allocation10 + $0x644] ss:$16 sps:$4 sm:$0xff]   ;;  %v6103_v6 = vld [vmem:[#allocation10 + $0x64c] ss:$16 sps:$4 sm:$0xff]  }
 0x36c   :  { %3082 = vmatprep.subr.bf16.mxu1 %v6025_v9  ;;  %v6098_v9 = vld [vmem:[#allocation10 + $0x640] ss:$16 sps:$4 sm:$0xff]  }
 0x36e   :  { %2997 = vmatpush1.bf16.msra.mxu0 %v6020_v10  ;;  %v6101_v10 = vld [vmem:[#allocation10 + $0x648] ss:$16 sps:$4 sm:$0xff]  }
 0x36f   :  { %3083 = vmatpush1.bf16.msra.mxu1 %v6023_v12  ;;  %2998 = vmatprep.subr.bf16.mxu0 %v6028_v42  ;;  %v6106_v12 = vld [vmem:[#allocation10 + $0x664] ss:$16 sps:$4 sm:$0xff]   ;;  %v6104_v42 = vld [vmem:[#allocation10 + $0x660] ss:$16 sps:$4 sm:$0xff]  }
 0x370   :  { %3084 = vmatprep.subr.bf16.mxu1 %v6031_v45  ;;  %v6107_v45 = vld [vmem:[#allocation10 + $0x668] ss:$16 sps:$4 sm:$0xff]  }
 0x372   :  { %2999 = vmatpush1.bf16.msra.mxu0 %v6026_v18  ;;  %v6112_v18 = vld [vmem:[#allocation10 + $0x684] ss:$16 sps:$4 sm:$0xff]  }
 0x373   :  { %3085 = vmatpush1.bf16.msra.mxu1 %v6029_v58  ;;  %3000 = vmatprep.subr.bf16.mxu0 %v6034_v55  ;;  %v6115_v58 = vld [vmem:[#allocation10 + $0x68c] ss:$16 sps:$4 sm:$0xff]   ;;  %v6113_v55 = vld [vmem:[#allocation10 + $0x688] ss:$16 sps:$4 sm:$0xff]  }
 0x374   :  { %3086 = vmatprep.subr.bf16.mxu1 %v6037_v16  ;;  %v6118_v16 = vld [vmem:[#allocation10 + $0x6a4] ss:$16 sps:$4 sm:$0xff]  }
 0x376   :  { %3001 = vmatpush1.bf16.msra.mxu0 %v6032_v52  ;;  %v6121_v52 = vld [vmem:[#allocation10 + $0x6ac] ss:$16 sps:$4 sm:$0xff]  }
 0x377   :  { %3087 = vmatpush1.bf16.msra.mxu1 %v6035_v49  ;;  %3002 = vmatprep.subr.bf16.mxu0 %v6040_v21  ;;  %v6116_v49 = vld [vmem:[#allocation10 + $0x6a0] ss:$16 sps:$4 sm:$0xff]   ;;  %v6119_v21 = vld [vmem:[#allocation10 + $0x6a8] ss:$16 sps:$4 sm:$0xff]  }
 0x378   :  { %3088 = vmatprep.subr.bf16.mxu1 %v6043_v22  ;;  %v6124_v22 = vld [vmem:[#allocation10 + $0x6c4] ss:$16 sps:$4 sm:$0xff]  }
 0x37a   :  { %3003 = vmatpush1.bf16.msra.mxu0 %v6038_v59  ;;  %v6127_v59 = vld [vmem:[#allocation10 + $0x6cc] ss:$16 sps:$4 sm:$0xff]  }
 0x37b   :  { %3089 = vmatpush1.bf16.msra.mxu1 %v6041_v8  ;;  %3004 = vmatprep.subr.bf16.mxu0 %v6046_v23  ;;  %v6122_v8 = vld [vmem:[#allocation10 + $0x6c0] ss:$16 sps:$4 sm:$0xff]   ;;  %v6125_v23 = vld [vmem:[#allocation10 + $0x6c8] ss:$16 sps:$4 sm:$0xff]  }
 0x37c   :  { %3090 = vmatprep.subr.bf16.mxu1 %v6049_v26  ;;  %v6130_v26 = vld [vmem:[#allocation10 + $0x6e4] ss:$16 sps:$4 sm:$0xff]  }
 0x37e   :  { %3005 = vmatpush1.bf16.msra.mxu0 %v6044_v30  ;;  %v6133_v30 = vld [vmem:[#allocation10 + $0x6ec] ss:$16 sps:$4 sm:$0xff]  }
 0x37f   :  { %3091 = vmatpush1.bf16.msra.mxu1 %v6047_v0  ;;  %3006 = vmatprep.subr.bf16.mxu0 %v6052_v33  ;;  %v6128_v0 = vld [vmem:[#allocation10 + $0x6e0] ss:$16 sps:$4 sm:$0xff]   ;;  %v6131_v33 = vld [vmem:[#allocation10 + $0x6e8] ss:$16 sps:$4 sm:$0xff]  }
 0x380   :  { %3092 = vmatprep.subr.bf16.mxu1 %v6055_v34  ;;  %v6136_v34 = vld [vmem:[#allocation10 + $0x704] ss:$16 sps:$4 sm:$0xff]  }
 0x382   :  { %3007 = vmatpush1.bf16.msra.mxu0 %v6050_v1  ;;  %v6139_v1 = vld [vmem:[#allocation10 + $0x70c] ss:$16 sps:$4 sm:$0xff]  }
 0x383   :  { %3093 = vmatpush1.bf16.msra.mxu1 %v6053_v38  ;;  %3008 = vmatprep.subr.bf16.mxu0 %v6058_v14  ;;  %v6134_v38 = vld [vmem:[#allocation10 + $0x700] ss:$16 sps:$4 sm:$0xff]   ;;  %v6137_v14 = vld [vmem:[#allocation10 + $0x708] ss:$16 sps:$4 sm:$0xff]  }
 0x384   :  { %3094 = vmatprep.subr.bf16.mxu1 %v6061_v43  ;;  %v6142_v43 = vld [vmem:[#allocation10 + $0x724] ss:$16 sps:$4 sm:$0xff]  }
 0x386   :  { %3009 = vmatpush1.bf16.msra.mxu0 %v6056_v17  ;;  %v6145_v17 = vld [vmem:[#allocation10 + $0x72c] ss:$16 sps:$4 sm:$0xff]  }
 0x387   :  { %3095 = vmatpush1.bf16.msra.mxu1 %v6059_v31  ;;  %3010 = vmatprep.subr.bf16.mxu0 %v6064_v40  ;;  %v6140_v31 = vld [vmem:[#allocation10 + $0x720] ss:$16 sps:$4 sm:$0xff]   ;;  %v6143_v40 = vld [vmem:[#allocation10 + $0x728] ss:$16 sps:$4 sm:$0xff]  }
 0x388   :  { %3096 = vmatprep.subr.bf16.mxu1 %v6067_v32  ;;  %v6148_v32 = vld [vmem:[#allocation10 + $0x744] ss:$16 sps:$4 sm:$0xff]  }
 0x38a   :  { %3011 = vmatpush1.bf16.msra.mxu0 %v6062_v37  ;;  %v6151_v37 = vld [vmem:[#allocation10 + $0x74c] ss:$16 sps:$4 sm:$0xff]  }
 0x38b   :  { %3097 = vmatpush1.bf16.msra.mxu1 %v6065_v24  ;;  %3012 = vmatprep.subr.bf16.mxu0 %v6070_v35  ;;  %v6146_v24 = vld [vmem:[#allocation10 + $0x740] ss:$16 sps:$4 sm:$0xff]   ;;  %v6149_v35 = vld [vmem:[#allocation10 + $0x748] ss:$16 sps:$4 sm:$0xff]  }
 0x38c   :  { %3098 = vmatprep.subr.bf16.mxu1 %v6073_v25  ;;  %v6154_v25 = vld [vmem:[#allocation10 + $0x764] ss:$16 sps:$4 sm:$0xff]  }
 0x38e   :  { %3013 = vmatpush1.bf16.msra.mxu0 %v6068_v27  ;;  %v6157_v27 = vld [vmem:[#allocation10 + $0x76c] ss:$16 sps:$4 sm:$0xff]  }
 0x38f   :  { %3099 = vmatpush1.bf16.msra.mxu1 %v6071_v62  ;;  %3014 = vmatprep.subr.bf16.mxu0 %v6076_v56  ;;  %v6152_v62 = vld [vmem:[#allocation10 + $0x760] ss:$16 sps:$4 sm:$0xff]   ;;  %v6155_v56 = vld [vmem:[#allocation10 + $0x768] ss:$16 sps:$4 sm:$0xff]  }
 0x390   :  { %3100 = vmatprep.subr.bf16.mxu1 %v6079_v39  ;;  %v6160_v39 = vld [vmem:[#allocation10 + $0x784] ss:$16 sps:$4 sm:$0xff]  }
 0x392   :  { %3015 = vmatpush1.bf16.msra.mxu0 %v6074_v19  ;;  %v6163_v19 = vld [vmem:[#allocation10 + $0x78c] ss:$16 sps:$4 sm:$0xff]  }
 0x393   :  { %3101 = vmatpush1.bf16.msra.mxu1 %v6077_v36  ;;  %3016 = vmatprep.subr.bf16.mxu0 %v6082_v46  ;;  %v6158_v36 = vld [vmem:[#allocation10 + $0x780] ss:$16 sps:$4 sm:$0xff]   ;;  %v6161_v46 = vld [vmem:[#allocation10 + $0x788] ss:$16 sps:$4 sm:$0xff]  }
 0x394   :  { %3102 = vmatprep.subr.bf16.mxu1 %v6085_v28  ;;  %v6166_v28 = vld [vmem:[#allocation10 + $0x7a4] ss:$16 sps:$4 sm:$0xff]  }
 0x396   :  { %3017 = vmatpush1.bf16.msra.mxu0 %v6080_v54  ;;  %v6169_v54 = vld [vmem:[#allocation10 + $0x7ac] ss:$16 sps:$4 sm:$0xff]  }
 0x397   :  { %3103 = vmatpush1.bf16.msra.mxu1 %v6083_v57  ;;  %3029 = vmatprep.subr.bf16.mxu0 %v6088_v60  ;;  %v6164_v57 = vld [vmem:[#allocation10 + $0x7a0] ss:$16 sps:$4 sm:$0xff]   ;;  %v6167_v60 = vld [vmem:[#allocation10 + $0x7a8] ss:$16 sps:$4 sm:$0xff]  }
 0x398   :  { %3115 = vmatprep.subr.bf16.mxu1 %v6091_v61  ;;  %v6172_v61 = vld [vmem:[#allocation10 + $0x7c4] ss:$16 sps:$4 sm:$0xff]  }
 0x399   :  { %3019 = vmatmul.mubr.bf16.vlgmr.msra.gmra.mrb[20].mxu0 %v7174_v53 }
 0x39a   :  { %3105 = vmatmul.mubr.bf16.vlgmr.msra.gmra.mrb[20].mxu1 %v7174_v53  ;;  %3030 = vmatpush1.bf16.msra.mxu0 %v6086_v63  ;;  %v6109_v53 = vld [vmem:[#allocation10 + $0x66c] ss:$16 sps:$4 sm:$0xff]  }
 0x39b   :  { %3061 = vmatprep.mubr.bf16.mxu0 %v7187_v29  ;;  %3116 = vmatpush1.bf16.msra.mxu1 %v6089_v2  ;;  %v6175_v63 = vld [vmem:[#allocation10 + $0x7cc] ss:$16 sps:$4 sm:$0xff]   ;;  %v6170_v2 = vld [vmem:[#allocation10 + $0x7c0] ss:$16 sps:$4 sm:$0xff]  }
 0x39c   :  { %3147 = vmatprep.mubr.bf16.mxu1 %v7187_v29  ;;  %3031 = vmatprep.subr.bf16.mxu0 %v6094_v3  ;;  %v6110_v29 = vld [vmem:[#allocation10 + $0x680] ss:$16 sps:$4 sm:$0xff]   ;;  %v6173_v3 = vld [vmem:[#allocation10 + $0x7c8] ss:$16 sps:$4 sm:$0xff]  }
 0x39d   :  { %3117 = vmatprep.subr.bf16.mxu1 %v6097_v4  ;;  %v6178_v4 = vld [vmem:[#allocation10 + $0x7e4] ss:$16 sps:$4 sm:$0xff]  }
 0x39e   :  { %3032 = vmatpush1.bf16.msra.mxu0 %v6092_v5  ;;  %v6181_v5 = vld [vmem:[#allocation10 + $0x7ec] ss:$16 sps:$4 sm:$0xff]  }
 0x39f   :  { %3118 = vmatpush1.bf16.msra.mxu1 %v6095_v13  ;;  %3033 = vmatprep.subr.bf16.mxu0 %v6100_v20  ;;  %v6176_v13 = vld [vmem:[#allocation10 + $0x7e0] ss:$16 sps:$4 sm:$0xff]   ;;  %v6179_v20 = vld [vmem:[#allocation10 + $0x7e8] ss:$16 sps:$4 sm:$0xff]  }
 0x3a0   :  { %3119 = vmatprep.subr.bf16.mxu1 %v6103_v6 }
 0x3a2   :  { %3034 = vmatpush1.bf16.msra.mxu0 %v6098_v9 }
 0x3a3   :  { %3120 = vmatpush1.bf16.msra.mxu1 %v6101_v10  ;;  %3035 = vmatprep.subr.bf16.mxu0 %v6106_v12  ;;  %v5156_v10 = vld [vmem:[#allocation14] ss:$0 sm:$0xff] }
 0x3a4   :  { %3121 = vmatprep.subr.bf16.mxu1 %v6109_v53 }
 0x3a6   :  { %3036 = vmatpush1.bf16.msra.mxu0 %v6104_v42 }
 0x3a7   :  { %3122 = vmatpush1.bf16.msra.mxu1 %v6107_v45  ;;  %3037 = vmatprep.subr.bf16.mxu0 %v6112_v18 }
 0x3a8   :  { %3123 = vmatprep.subr.bf16.mxu1 %v6115_v58 }
 0x3aa   :  { %3038 = vmatpush1.bf16.msra.mxu0 %v6110_v29 }
 0x3ab   :  { %3124 = vmatpush1.bf16.msra.mxu1 %v6113_v55  ;;  %3039 = vmatprep.subr.bf16.mxu0 %v6118_v16 }
 0x3ac   :  { %3125 = vmatprep.subr.bf16.mxu1 %v6121_v52 }
 0x3ae   :  { %3040 = vmatpush1.bf16.msra.mxu0 %v6116_v49 }
 0x3af   :  { %3126 = vmatpush1.bf16.msra.mxu1 %v6119_v21  ;;  %3041 = vmatprep.subr.bf16.mxu0 %v6124_v22 }
 0x3b0   :  { %3127 = vmatprep.subr.bf16.mxu1 %v6127_v59 }
 0x3b2   :  { %3042 = vmatpush1.bf16.msra.mxu0 %v6122_v8  ;;  %v6183_v8 = vld [vmem:[#allocation13 + $0x1c0] sm:$0xff]  }
 0x3b3   :  { %3128 = vmatpush1.bf16.msra.mxu1 %v6125_v23  ;;  %3043 = vmatprep.subr.bf16.mxu0 %v6130_v26  ;;  %v6184_v23 = vld [vmem:[#allocation13 + $0x100] sm:$0xff]  }
 0x3b4   :  { %3129 = vmatprep.subr.bf16.mxu1 %v6133_v30  ;;  %v6185_v26 = vld [vmem:[#allocation13 + $0x180] sm:$0xff]   ;;  %v6186_v30 = vld [vmem:[#allocation13 + $0x148] sm:$0xff]  }
 0x3b6   :  { %3044 = vmatpush1.bf16.msra.mxu0 %v6128_v0  ;;  %v6187_v0 = vld [vmem:[#allocation13 + $0x1c8] sm:$0xff]  }
 0x3b7   :  { %3130 = vmatpush1.bf16.msra.mxu1 %v6131_v33  ;;  %3045 = vmatprep.subr.bf16.mxu0 %v6136_v34  ;;  %v6188_v33 = vld [vmem:[#allocation13 + $0x108] sm:$0xff]  }
 0x3b8   :  { %3131 = vmatprep.subr.bf16.mxu1 %v6139_v1  ;;  %v6189_v34 = vld [vmem:[#allocation13 + $0x188] sm:$0xff]   ;;  %v6190_v1 = vld [vmem:[#allocation13 + $0x150] sm:$0xff]  }
 0x3ba   :  { %3046 = vmatpush1.bf16.msra.mxu0 %v6134_v38  ;;  %v6191_v38 = vld [vmem:[#allocation13 + $0x1d0] sm:$0xff]  }
 0x3bb   :  { %3132 = vmatpush1.bf16.msra.mxu1 %v6137_v14  ;;  %3047 = vmatprep.subr.bf16.mxu0 %v6142_v43  ;;  %v6192_v14 = vld [vmem:[#allocation13 + $0x110] sm:$0xff]  }
 0x3bc   :  { %3133 = vmatprep.subr.bf16.mxu1 %v6145_v17  ;;  %v6193_v43 = vld [vmem:[#allocation13 + $0x190] sm:$0xff]   ;;  %v6194_v17 = vld [vmem:[#allocation13 + $0x158] sm:$0xff]  }
 0x3be   :  { %3048 = vmatpush1.bf16.msra.mxu0 %v6140_v31  ;;  %v6195_v31 = vld [vmem:[#allocation13 + $0x1d8] sm:$0xff]  }
 0x3bf   :  { %3134 = vmatpush1.bf16.msra.mxu1 %v6143_v40  ;;  %3049 = vmatprep.subr.bf16.mxu0 %v6148_v32  ;;  %v6196_v40 = vld [vmem:[#allocation13 + $0x118] sm:$0xff]  }
 0x3c0   :  { %3135 = vmatprep.subr.bf16.mxu1 %v6151_v37  ;;  %v6197_v32 = vld [vmem:[#allocation13 + $0x198] sm:$0xff]   ;;  %v6198_v37 = vld [vmem:[#allocation13 + $0x160] sm:$0xff]  }
 0x3c2   :  { %3050 = vmatpush1.bf16.msra.mxu0 %v6146_v24  ;;  %v6199_v24 = vld [vmem:[#allocation13 + $0x1e0] sm:$0xff]  }
 0x3c3   :  { %3136 = vmatpush1.bf16.msra.mxu1 %v6149_v35  ;;  %3051 = vmatprep.subr.bf16.mxu0 %v6154_v25  ;;  %v6200_v35 = vld [vmem:[#allocation13 + $0x120] sm:$0xff]  }
 0x3c4   :  { %3137 = vmatprep.subr.bf16.mxu1 %v6157_v27  ;;  %v6201_v25 = vld [vmem:[#allocation13 + $0x1a0] sm:$0xff]   ;;  %v6202_v27 = vld [vmem:[#allocation13 + $0x168] sm:$0xff]  }
 0x3c6   :  { %3052 = vmatpush1.bf16.msra.mxu0 %v6152_v62  ;;  %v6203_v62 = vld [vmem:[#allocation13 + $0x1e8] sm:$0xff]  }
 0x3c7   :  { %3138 = vmatpush1.bf16.msra.mxu1 %v6155_v56  ;;  %3053 = vmatprep.subr.bf16.mxu0 %v6160_v39  ;;  %v6204_v56 = vld [vmem:[#allocation13 + $0x128] sm:$0xff]  }
 0x3c8   :  { %3139 = vmatprep.subr.bf16.mxu1 %v6163_v19  ;;  %v6205_v39 = vld [vmem:[#allocation13 + $0x1a8] sm:$0xff]   ;;  %v6206_v19 = vld [vmem:[#allocation13 + $0x170] sm:$0xff]  }
 0x3ca   :  { %3054 = vmatpush1.bf16.msra.mxu0 %v6158_v36  ;;  %v6207_v36 = vld [vmem:[#allocation13 + $0x1f0] sm:$0xff]  }
 0x3cb   :  { %3140 = vmatpush1.bf16.msra.mxu1 %v6161_v46  ;;  %3055 = vmatprep.subr.bf16.mxu0 %v6166_v28  ;;  %v6208_v46 = vld [vmem:[#allocation13 + $0x130] sm:$0xff]  }
 0x3cc   :  { %3141 = vmatprep.subr.bf16.mxu1 %v6169_v54  ;;  %v6209_v28 = vld [vmem:[#allocation13 + $0x1b0] sm:$0xff]   ;;  %v6210_v54 = vld [vmem:[#allocation13 + $0x178] sm:$0xff]  }
 0x3ce   :  { %3056 = vmatpush1.bf16.msra.mxu0 %v6164_v57  ;;  %v6211_v57 = vld [vmem:[#allocation13 + $0x1f8] sm:$0xff]  }
 0x3cf   :  { %3142 = vmatpush1.bf16.msra.mxu1 %v6167_v60  ;;  %3057 = vmatprep.subr.bf16.mxu0 %v6172_v61  ;;  %v6212_v60 = vld [vmem:[#allocation13 + $0x138] sm:$0xff]  }
 0x3d0   :  { %3143 = vmatprep.subr.bf16.mxu1 %v6175_v63  ;;  %v6213_v61 = vld [vmem:[#allocation13 + $0x1b8] sm:$0xff]  }
 0x3d1   :  { %v6216_v63 = vld [vmem:[#allocation10 + $0x804] ss:$16 sps:$4 sm:$0xff]  }
 0x3d2   :  { %3058 = vmatpush1.bf16.msra.mxu0 %v6170_v2  ;;  %v6219_v2 = vld [vmem:[#allocation10 + $0x80c] ss:$16 sps:$4 sm:$0xff]  }
 0x3d3   :  { %3144 = vmatpush1.bf16.msra.mxu1 %v6173_v3  ;;  %3059 = vmatprep.subr.bf16.mxu0 %v6178_v4  ;;  %v2324_v3 = vld [vmem:[#allocation11 + $0x4] sm:$0xf] }
 0x3d4   :  { %3145 = vmatprep.subr.bf16.mxu1 %v6181_v5  ;;  %v2329_v4 = vrot.slane %v2324_v3, %v7047_v47  ;;  %v2337_v5 = vrot.slane %v2324_v3, %v7050_v48 }
 0x3d6   :  { %3060 = vmatpush1.bf16.msra.mxu0 %v6176_v13  ;;  %v2333_v13 = vrot.slane %v2324_v3, %v7055_v50 }
 0x3d7   :  { %3146 = vmatpush1.bf16.msra.mxu1 %v6179_v20  ;;  %v2341_v20 = vrot.slane %v2324_v3, %v7058_v51 }
 0x3d8   :  { %5593 = vmatprep.subr.bf16.mxu1 %v6183_v8 }
 0x3d9   :  { %3062 = vmatmul.mubr.bf16.vlgmr.msra.gmra.mrb[20].mxu0 %v7182_v41 }
 0x3da   :  { %3148 = vmatmul.mubr.bf16.vlgmr.msra.gmra.mrb[20].mxu1 %v7182_v41  ;;  %v6182_v41 = vld [vmem:[#allocation13 + $0x140] sm:$0xff]  }
 0x3db   :  { %5571 = vmatprep.subr.bf16.mxu0 %v6182_v41  ;;  %5594 = vmatpush3.bf16.msra.mxu1 %v6185_v26 }
 0x3dc   :  { %5572 = vmatpush3.bf16.msra.mxu0 %v6184_v23  ;;  %5595 = vmatprep.subr.bf16.mxu1 %v6187_v0 }
 0x3dd   :  { %5573 = vmatprep.subr.bf16.mxu0 %v6186_v30 }
 0x3df   :  { %5596 = vmatpush3.bf16.msra.mxu1 %v6189_v34 }
 0x3e0   :  { %5574 = vmatpush3.bf16.msra.mxu0 %v6188_v33  ;;  %5597 = vmatprep.subr.bf16.mxu1 %v6191_v38 }
 0x3e1   :  { %5575 = vmatprep.subr.bf16.mxu0 %v6190_v1 }
 0x3e3   :  { %5598 = vmatpush3.bf16.msra.mxu1 %v6193_v43 }
 0x3e4   :  { %5576 = vmatpush3.bf16.msra.mxu0 %v6192_v14  ;;  %5599 = vmatprep.subr.bf16.mxu1 %v6195_v31 }
 0x3e5   :  { %5577 = vmatprep.subr.bf16.mxu0 %v6194_v17 }
 0x3e7   :  { %5600 = vmatpush3.bf16.msra.mxu1 %v6197_v32 }
 0x3e8   :  { %5578 = vmatpush3.bf16.msra.mxu0 %v6196_v40  ;;  %5601 = vmatprep.subr.bf16.mxu1 %v6199_v24 }
 0x3e9   :  { %5579 = vmatprep.subr.bf16.mxu0 %v6198_v37 }
 0x3eb   :  { %5602 = vmatpush3.bf16.msra.mxu1 %v6201_v25 }
 0x3ec   :  { %5580 = vmatpush3.bf16.msra.mxu0 %v6200_v35  ;;  %5603 = vmatprep.subr.bf16.mxu1 %v6203_v62 }
 0x3ed   :  { %5581 = vmatprep.subr.bf16.mxu0 %v6202_v27 }
 0x3ef   :  { %5604 = vmatpush3.bf16.msra.mxu1 %v6205_v39 }
 0x3f0   :  { %5582 = vmatpush3.bf16.msra.mxu0 %v6204_v56  ;;  %5605 = vmatprep.subr.bf16.mxu1 %v6207_v36 }
 0x3f1   :  { %5583 = vmatprep.subr.bf16.mxu0 %v6206_v19 }
 0x3f3   :  { %5606 = vmatpush3.bf16.msra.mxu1 %v6209_v28 }
 0x3f4   :  { %5584 = vmatpush3.bf16.msra.mxu0 %v6208_v46  ;;  %5607 = vmatprep.subr.bf16.mxu1 %v6211_v57 }
 0x3f5   :  { %5585 = vmatprep.subr.bf16.mxu0 %v6210_v54 }
 0x3f7   :  { %5608 = vmatpush3.bf16.msra.mxu1 %v6213_v61 }
 0x3f8   :  { %5586 = vmatpush3.bf16.msra.mxu0 %v6212_v60  ;;  %4449 = vmatprep.subr.bf16.mxu1 %v6219_v2 }
 0x3f9   :  { %4363 = vmatprep.subr.bf16.mxu0 %v6216_v63 }
 0x42c   :  { %v5543_v6 = vpop.f32.mrb[16].mxu0 }
 0x42d   :  { %v5565_v9 = vpop.f32.mrb[16].mxu1  ;;  %v5544_v12 = vpop.f32.mrb[17].mxu0 }
 0x42e   :  { %v5545_v53 = vadd.f32 %v5544_v12, %v5543_v6  ;;  %v5566_v42 = vpop.f32.mrb[17].mxu1  ;;  %v5546_v45 = vpop.f32.mrb[18].mxu0 }
 0x42f   :  { %v5567_v18 = vadd.f32 %v5566_v42, %v5565_v9  ;;  %v5568_v58 = vpop.f32.mrb[18].mxu1  ;;  %v5547_v29 = vpop.f32.mrb[19].mxu0 }
 0x430   :  { %v2141_v55 = vadd.f32 %v5545_v53, %v5156_v10  ;;  %v5548_v16 = vadd.f32 %v5547_v29, %v5546_v45  ;;  %v5569_v52 = vpop.f32.mrb[19].mxu1 }
 0x431   :  { %v5570_v49 = vadd.f32 %v5569_v52, %v5568_v58 }
 0x432   :  { %v2182_v21 = vadd.f32 %v5567_v18, %v2141_v55  ;;  %v2144_v22 = vadd.f32 %v5548_v16, %v5156_v10 }
 0x434   :  { %2188 = vst [vmem:[#allocation16] sm:$0xff] %v2182_v21  ;;  %v2185_v59 = vadd.f32 %v5570_v49, %v2144_v22 }
 0x436   :  { %2189 = vst [vmem:[#allocation16 + $0x18] sm:$0xff] %v2185_v59 }
 0x4ac   :  { %v3063_v6 = vpop.f32.mrb[20].mxu0 }
 0x4ad   :  { %v5667_v9 = vadd.f32 %v3063_v6, %v2329_v4  ;;  %v3149_v10 = vpop.f32.mrb[20].mxu1  ;;  %v3065_v12 = vpop.f32.mrb[21].mxu0 }
 0x4ae   :  { %v5671_v53 = vadd.f32 %v3149_v10, %v2337_v5  ;;  %v7227_v42 = vadd.f32 %v3065_v12, %v2333_v13  ;;  %v3151_v45 = vpop.f32.mrb[21].mxu1  ;;  %v3067_v18 = vpop.f32.mrb[22].mxu0 }
 0x4af   :  { %v5317_v58 = vmul.f32 -1.442695, %v5667_v9  ;;  %v5672_v29 = vadd.f32 %v3151_v45, %v2341_v20  ;;  %v5669_v55 = vadd.f32 %v3067_v18, %v2329_v4  ;;  %v3153_v16 = vpop.f32.mrb[22].mxu1  ;;  %v3069_v52 = vpop.f32.mrb[23].mxu0  ;;  %v6214_v45 = vld [vmem:[#allocation10 + $0x800] ss:$16 sps:$4 sm:$0xff]  }
 0x4b0   :  { %v5319_v49 = vmul.f32 -1.442695, %v5671_v53  ;;  %v5318_v21 = vmul.f32 -1.442695, %v7227_v42  ;;  %v5673_v22 = vadd.f32 %v3153_v16, %v2337_v5  ;;  %v5670_v59 = vadd.f32 %v3069_v52, %v2333_v13  ;;  %v3155_v41 = vpop.f32.mrb[23].mxu1 }
 0x4b1   :  { %6566 = vpow2.f32 %v5317_v58  ;;  %v5320_v8 = vmul.f32 -1.442695, %v5672_v29  ;;  %v5321_v23 = vmul.f32 -1.442695, %v5669_v55  ;;  %v5674_v26 = vadd.f32 %v3155_v41, %v2341_v20  ;;  %v6217_v58 = vld [vmem:[#allocation10 + $0x808] ss:$16 sps:$4 sm:$0xff]  }
 0x4b2   :  { %6568 = vpow2.f32 %v5319_v49  ;;  %v5323_v30 = vmul.f32 -1.442695, %v5673_v22  ;;  %v5322_v0 = vmul.f32 -1.442695, %v5670_v59  ;;  %v6222_v16 = vld [vmem:[#allocation10 + $0x824] ss:$16 sps:$4 sm:$0xff]  }
 0x4b3   :  { %6570 = vpow2.f32 %v5318_v21  ;;  %v5324_v33 = vmul.f32 -1.442695, %v5674_v26  ;;  %v6226_v52 = vld [vmem:[#allocation10 + $0x840] ss:$16 sps:$4 sm:$0xff]   ;;  %v6229_v49 = vld [vmem:[#allocation10 + $0x848] ss:$16 sps:$4 sm:$0xff]  }
 0x4b4   :  { %6572 = vpow2.f32 %v5320_v8  ;;  %v6234_v21 = vld [vmem:[#allocation10 + $0x864] ss:$16 sps:$4 sm:$0xff]   ;;  %v6235_v41 = vld [vmem:[#allocation10 + $0x868] ss:$16 sps:$4 sm:$0xff]  }
 0x4b5   :  { %6574 = vpow2.f32 %v5321_v23  ;;  %v6240_v8 = vld [vmem:[#allocation10 + $0x884] ss:$16 sps:$4 sm:$0xff]   ;;  %v6243_v23 = vld [vmem:[#allocation10 + $0x88c] ss:$16 sps:$4 sm:$0xff]  }
 0x4b6   :  { %6576 = vpow2.f32 %v5323_v30  ;;  %v6246_v30 = vld [vmem:[#allocation10 + $0x8a4] ss:$16 sps:$4 sm:$0xff]  }
 0x4b7   :  { %6578 = vpow2.f32 %v5322_v0  ;;  %v6249_v0 = vld [vmem:[#allocation10 + $0x8ac] ss:$16 sps:$4 sm:$0xff]  }
 0x4b8   :  { %6580 = vpow2.f32 %v5324_v33  ;;  %v6244_v33 = vld [vmem:[#allocation10 + $0x8a0] ss:$16 sps:$4 sm:$0xff]  }
 0x4bb   :  { %v6567_v34 = vpop.eup %6566 }
 0x4bc   :  { %v6569_v1 = vpop.eup %6568  ;;  %v3182_v38 = vadd.f32 1.0, %v6567_v34  ;;  %v6247_v34 = vld [vmem:[#allocation10 + $0x8a8] ss:$16 sps:$4 sm:$0xff]  }
 0x4bd   :  { %v6571_v14 = vpop.eup %6570  ;;  %v3184_v43 = vadd.f32 1.0, %v6569_v1  ;;  %v6252_v1 = vld [vmem:[#allocation10 + $0x8c4] ss:$16 sps:$4 sm:$0xff]  }
 0x4be   :  { %v6573_v17 = vpop.eup %6572  ;;  %6582 = vrcp.f32 %v3182_v38  ;;  %v3183_v31 = vadd.f32 1.0, %v6571_v14  ;;  %v6255_v38 = vld [vmem:[#allocation10 + $0x8cc] ss:$16 sps:$4 sm:$0xff]   ;;  %v6250_v14 = vld [vmem:[#allocation10 + $0x8c0] ss:$16 sps:$4 sm:$0xff]  }
 0x4bf   :  { %v6575_v40 = vpop.eup %6574  ;;  %6584 = vrcp.f32 %v3184_v43  ;;  %v3185_v32 = vadd.f32 1.0, %v6573_v17  ;;  %v6253_v43 = vld [vmem:[#allocation10 + $0x8c8] ss:$16 sps:$4 sm:$0xff]   ;;  %v6258_v17 = vld [vmem:[#allocation10 + $0x8e4] ss:$16 sps:$4 sm:$0xff]  }
 0x4c0   :  { %v6577_v37 = vpop.eup %6576  ;;  %6586 = vrcp.f32 %v3183_v31  ;;  %v3186_v24 = vadd.f32 1.0, %v6575_v40  ;;  %v6261_v31 = vld [vmem:[#allocation10 + $0x8ec] ss:$16 sps:$4 sm:$0xff]   ;;  %v6256_v40 = vld [vmem:[#allocation10 + $0x8e0] ss:$16 sps:$4 sm:$0xff]  }
 0x4c1   :  { %v6579_v35 = vpop.eup %6578  ;;  %6588 = vrcp.f32 %v3185_v32  ;;  %v3188_v25 = vadd.f32 1.0, %v6577_v37  ;;  %v6259_v32 = vld [vmem:[#allocation10 + $0x8e8] ss:$16 sps:$4 sm:$0xff]   ;;  %v6264_v37 = vld [vmem:[#allocation10 + $0x904] ss:$16 sps:$4 sm:$0xff]  }
 0x4c2   :  { %v6581_v27 = vpop.eup %6580  ;;  %6590 = vrcp.f32 %v3186_v24  ;;  %v3187_v62 = vadd.f32 1.0, %v6579_v35  ;;  %v6267_v24 = vld [vmem:[#allocation10 + $0x90c] ss:$16 sps:$4 sm:$0xff]   ;;  %v6262_v35 = vld [vmem:[#allocation10 + $0x900] ss:$16 sps:$4 sm:$0xff]  }
 0x4c3   :  { %6592 = vrcp.f32 %v3188_v25  ;;  %v3189_v56 = vadd.f32 1.0, %v6581_v27  ;;  %v6265_v25 = vld [vmem:[#allocation10 + $0x908] ss:$16 sps:$4 sm:$0xff]   ;;  %v6270_v27 = vld [vmem:[#allocation10 + $0x924] ss:$16 sps:$4 sm:$0xff]  }
 0x4c4   :  { %6594 = vrcp.f32 %v3187_v62  ;;  %v6273_v62 = vld [vmem:[#allocation10 + $0x92c] ss:$16 sps:$4 sm:$0xff]  }
 0x4c5   :  { %6596 = vrcp.f32 %v3189_v56  ;;  %v6268_v56 = vld [vmem:[#allocation10 + $0x920] ss:$16 sps:$4 sm:$0xff]  }
 0x4c8   :  { %v6583_v39 = vpop.eup %6582 }
 0x4c9   :  { %v6585_v19 = vpop.eup %6584  ;;  %v3206_v57 = vmul.f32 %v6583_v39, %v5667_v9  ;;  %v6225_v9 = vld [vmem:[#allocation10 + $0x82c] ss:$16 sps:$4 sm:$0xff]   ;;  %v6271_v39 = vld [vmem:[#allocation10 + $0x928] ss:$16 sps:$4 sm:$0xff]  }
 0x4ca   :  { %v6587_v36 = vpop.eup %6586  ;;  %v3208_v63 = vmul.f32 %v6585_v19, %v5671_v53  ;;  %v6220_v53 = vld [vmem:[#allocation10 + $0x820] ss:$16 sps:$4 sm:$0xff]   ;;  %v6276_v19 = vld [vmem:[#allocation10 + $0x944] ss:$16 sps:$4 sm:$0xff]  }
 0x4cb   :  { %v6589_v46 = vpop.eup %6588  ;;  %v3207_v4 = vmul.f32 %v6587_v36, %v7227_v42  ;;  %v6223_v42 = vld [vmem:[#allocation10 + $0x828] ss:$16 sps:$4 sm:$0xff]   ;;  %v6279_v36 = vld [vmem:[#allocation10 + $0x94c] ss:$16 sps:$4 sm:$0xff]  }
 0x4cc   :  { %v6591_v28 = vpop.eup %6590  ;;  %v3209_v20 = vmul.f32 %v6589_v46, %v5672_v29  ;;  %v6231_v29 = vld [vmem:[#allocation10 + $0x84c] ss:$16 sps:$4 sm:$0xff]   ;;  %v6274_v46 = vld [vmem:[#allocation10 + $0x940] ss:$16 sps:$4 sm:$0xff]  }
 0x4cd   :  { %v6593_v54 = vpop.eup %6592  ;;  %v3210_v60 = vmul.f32 %v6591_v28, %v5669_v55  ;;  %v6228_v55 = vld [vmem:[#allocation10 + $0x844] ss:$16 sps:$4 sm:$0xff]   ;;  %v6277_v28 = vld [vmem:[#allocation10 + $0x948] ss:$16 sps:$4 sm:$0xff]  }
 0x4ce   :  { %v6595_v61 = vpop.eup %6594  ;;  %v3212_v2 = vmul.f32 %v6593_v54, %v5673_v22  ;;  %v6237_v22 = vld [vmem:[#allocation10 + $0x86c] ss:$16 sps:$4 sm:$0xff]   ;;  %v6282_v54 = vld [vmem:[#allocation10 + $0x964] ss:$16 sps:$4 sm:$0xff]  }
 0x4cf   :  { %v6597_v3 = vpop.eup %6596  ;;  %v3214_v5 = vpack.c.bf16 %v3210_v60, %v3206_v57  ;;  %v3211_v13 = vmul.f32 %v6595_v61, %v5670_v59  ;;  %v6232_v59 = vld [vmem:[#allocation10 + $0x860] ss:$16 sps:$4 sm:$0xff]   ;;  %v6285_v57 = vld [vmem:[#allocation10 + $0x96c] ss:$16 sps:$4 sm:$0xff]   ;;  %v6283_v61 = vld [vmem:[#allocation10 + $0x968] ss:$16 sps:$4 sm:$0xff]  }
 0x4d0   :  { %v3216_v6 = vpack.c.bf16 %v3212_v2, %v3208_v63  ;;  %v3213_v10 = vmul.f32 %v6597_v3, %v5674_v26  ;;  %v6241_v26 = vld [vmem:[#allocation10 + $0x888] ss:$16 sps:$4 sm:$0xff]   ;;  %v6280_v60 = vld [vmem:[#allocation10 + $0x960] ss:$16 sps:$4 sm:$0xff]   ;;  %v6288_v63 = vld [vmem:[#allocation10 + $0x984] ss:$16 sps:$4 sm:$0xff]  }
 0x4d1   :  { %v3215_v12 = vpack.c.bf16 %v3211_v13, %v3207_v4  ;;  %v6291_v2 = vld [vmem:[#allocation10 + $0x98c] ss:$16 sps:$4 sm:$0xff]   ;;  %v6286_v3 = vld [vmem:[#allocation10 + $0x980] ss:$16 sps:$4 sm:$0xff]   ;;  %v6289_v4 = vld [vmem:[#allocation10 + $0x988] ss:$16 sps:$4 sm:$0xff]  }
 0x4d2   :  { %v3217_v18 = vpack.c.bf16 %v3213_v10, %v3209_v20  ;;  %v6297_v13 = vld [vmem:[#allocation10 + $0x9ac] ss:$16 sps:$4 sm:$0xff]   ;;  %v6292_v20 = vld [vmem:[#allocation10 + $0x9a0] ss:$16 sps:$4 sm:$0xff]   ;;  %v6300_v10 = vld [vmem:[#allocation10 + $0x9c4] ss:$16 sps:$4 sm:$0xff]  }
 0x4d3   :  { %3515 = vmatprep.mubr.bf16.mxu0 %v3215_v12  ;;  %v6303_v12 = vld [vmem:[#allocation10 + $0x9cc] ss:$16 sps:$4 sm:$0xff]  }
 0x4d4   :  { %3556 = vmatprep.mubr.bf16.mxu1 %v3217_v18  ;;  %3516 = vmatmul.mubr.bf16.vlgmr.msra.gmra.mrb[24].mxu0 %v3214_v5  ;;  %v6294_v5 = vld [vmem:[#allocation10 + $0x9a4] ss:$16 sps:$4 sm:$0xff]   ;;  %v6301_v18 = vld [vmem:[#allocation10 + $0x9c8] ss:$16 sps:$4 sm:$0xff]  }
 0x4d5   :  { %3557 = vmatmul.mubr.bf16.vlgmr.msra.gmra.mrb[24].mxu1 %v3216_v6  ;;  %4364 = vmatpush1.bf16.msra.mxu0 %v6214_v45  ;;  %v6295_v6 = vld [vmem:[#allocation10 + $0x9a8] ss:$16 sps:$4 sm:$0xff]   ;;  %v6298_v45 = vld [vmem:[#allocation10 + $0x9c0] ss:$16 sps:$4 sm:$0xff]  }
 0x4d6   :  { %4450 = vmatpush1.bf16.msra.mxu1 %v6217_v58  ;;  %4395 = vmatprep.mubr.bf16.mxu0 %v7201_v7  ;;  %v6306_v58 = vld [vmem:[#allocation10 + $0x9e4] ss:$16 sps:$4 sm:$0xff]  }
 0x4d7   :  { %4481 = vmatprep.mubr.bf16.mxu1 %v7201_v7  ;;  %4365 = vmatprep.subr.bf16.mxu0 %v6222_v16  ;;  %v6238_v7 = vld [vmem:[#allocation10 + $0x880] ss:$16 sps:$4 sm:$0xff]   ;;  %v6309_v16 = vld [vmem:[#allocation10 + $0x9ec] ss:$16 sps:$4 sm:$0xff]  }
 0x4d8   :  { %4451 = vmatprep.subr.bf16.mxu1 %v6225_v9  ;;  %v6304_v9 = vld [vmem:[#allocation10 + $0x9e0] ss:$16 sps:$4 sm:$0xff]  }
 0x4d9   :  { %4366 = vmatpush1.bf16.msra.mxu0 %v6220_v53  ;;  %v6307_v53 = vld [vmem:[#allocation10 + $0x9e8] ss:$16 sps:$4 sm:$0xff]  }
 0x4da   :  { %4452 = vmatpush1.bf16.msra.mxu1 %v6223_v42  ;;  %4367 = vmatprep.subr.bf16.mxu0 %v6228_v55  ;;  %v6312_v42 = vld [vmem:[#allocation10 + $0xa04] ss:$16 sps:$4 sm:$0xff]   ;;  %v6315_v55 = vld [vmem:[#allocation10 + $0xa0c] ss:$16 sps:$4 sm:$0xff]  }
 0x4db   :  { %4453 = vmatprep.subr.bf16.mxu1 %v6231_v29  ;;  %v6310_v29 = vld [vmem:[#allocation10 + $0xa00] ss:$16 sps:$4 sm:$0xff]  }
 0x4dd   :  { %4368 = vmatpush1.bf16.msra.mxu0 %v6226_v52  ;;  %v6313_v52 = vld [vmem:[#allocation10 + $0xa08] ss:$16 sps:$4 sm:$0xff]  }
 0x4de   :  { %4454 = vmatpush1.bf16.msra.mxu1 %v6229_v49  ;;  %4369 = vmatprep.subr.bf16.mxu0 %v6234_v21  ;;  %v6318_v49 = vld [vmem:[#allocation10 + $0xa24] ss:$16 sps:$4 sm:$0xff]   ;;  %v6321_v21 = vld [vmem:[#allocation10 + $0xa2c] ss:$16 sps:$4 sm:$0xff]  }
 0x4df   :  { %4455 = vmatprep.subr.bf16.mxu1 %v6237_v22  ;;  %v6316_v22 = vld [vmem:[#allocation10 + $0xa20] ss:$16 sps:$4 sm:$0xff]  }
 0x4e1   :  { %4370 = vmatpush1.bf16.msra.mxu0 %v6232_v59  ;;  %v6319_v59 = vld [vmem:[#allocation10 + $0xa28] ss:$16 sps:$4 sm:$0xff]  }
 0x4e2   :  { %4456 = vmatpush1.bf16.msra.mxu1 %v6235_v41  ;;  %4371 = vmatprep.subr.bf16.mxu0 %v6240_v8  ;;  %v6324_v41 = vld [vmem:[#allocation10 + $0xa44] ss:$16 sps:$4 sm:$0xff]   ;;  %v6327_v8 = vld [vmem:[#allocation10 + $0xa4c] ss:$16 sps:$4 sm:$0xff]  }
 0x4e3   :  { %4457 = vmatprep.subr.bf16.mxu1 %v6243_v23  ;;  %v6322_v23 = vld [vmem:[#allocation10 + $0xa40] ss:$16 sps:$4 sm:$0xff]  }
 0x4e5   :  { %4372 = vmatpush1.bf16.msra.mxu0 %v6238_v7  ;;  %v6325_v7 = vld [vmem:[#allocation10 + $0xa48] ss:$16 sps:$4 sm:$0xff]  }
 0x4e6   :  { %4458 = vmatpush1.bf16.msra.mxu1 %v6241_v26  ;;  %4373 = vmatprep.subr.bf16.mxu0 %v6246_v30  ;;  %v6330_v26 = vld [vmem:[#allocation10 + $0xa64] ss:$16 sps:$4 sm:$0xff]   ;;  %v6328_v30 = vld [vmem:[#allocation10 + $0xa60] ss:$16 sps:$4 sm:$0xff]  }
 0x4e7   :  { %4459 = vmatprep.subr.bf16.mxu1 %v6249_v0  ;;  %v6331_v0 = vld [vmem:[#allocation10 + $0xa68] ss:$16 sps:$4 sm:$0xff]  }
 0x4e9   :  { %4374 = vmatpush1.bf16.msra.mxu0 %v6244_v33  ;;  %v6336_v33 = vld [vmem:[#allocation10 + $0xa84] ss:$16 sps:$4 sm:$0xff]  }
 0x4ea   :  { %4460 = vmatpush1.bf16.msra.mxu1 %v6247_v34  ;;  %4375 = vmatprep.subr.bf16.mxu0 %v6252_v1  ;;  %v6339_v34 = vld [vmem:[#allocation10 + $0xa8c] ss:$16 sps:$4 sm:$0xff]   ;;  %v6337_v1 = vld [vmem:[#allocation10 + $0xa88] ss:$16 sps:$4 sm:$0xff]  }
 0x4eb   :  { %4461 = vmatprep.subr.bf16.mxu1 %v6255_v38  ;;  %v6342_v38 = vld [vmem:[#allocation10 + $0xaa4] ss:$16 sps:$4 sm:$0xff]  }
 0x4ed   :  { %4376 = vmatpush1.bf16.msra.mxu0 %v6250_v14  ;;  %v6345_v14 = vld [vmem:[#allocation10 + $0xaac] ss:$16 sps:$4 sm:$0xff]  }
 0x4ee   :  { %4462 = vmatpush1.bf16.msra.mxu1 %v6253_v43  ;;  %4377 = vmatprep.subr.bf16.mxu0 %v6258_v17  ;;  %v6340_v43 = vld [vmem:[#allocation10 + $0xaa0] ss:$16 sps:$4 sm:$0xff]   ;;  %v6343_v17 = vld [vmem:[#allocation10 + $0xaa8] ss:$16 sps:$4 sm:$0xff]  }
 0x4ef   :  { %4463 = vmatprep.subr.bf16.mxu1 %v6261_v31  ;;  %v6348_v31 = vld [vmem:[#allocation10 + $0xac4] ss:$16 sps:$4 sm:$0xff]  }
 0x4f1   :  { %4378 = vmatpush1.bf16.msra.mxu0 %v6256_v40  ;;  %v6351_v40 = vld [vmem:[#allocation10 + $0xacc] ss:$16 sps:$4 sm:$0xff]  }
 0x4f2   :  { %4464 = vmatpush1.bf16.msra.mxu1 %v6259_v32  ;;  %4379 = vmatprep.subr.bf16.mxu0 %v6264_v37  ;;  %v6346_v32 = vld [vmem:[#allocation10 + $0xac0] ss:$16 sps:$4 sm:$0xff]   ;;  %v6349_v37 = vld [vmem:[#allocation10 + $0xac8] ss:$16 sps:$4 sm:$0xff]  }
 0x4f3   :  { %4465 = vmatprep.subr.bf16.mxu1 %v6267_v24  ;;  %v6354_v24 = vld [vmem:[#allocation10 + $0xae4] ss:$16 sps:$4 sm:$0xff]  }
 0x4f5   :  { %4380 = vmatpush1.bf16.msra.mxu0 %v6262_v35  ;;  %v6357_v35 = vld [vmem:[#allocation10 + $0xaec] ss:$16 sps:$4 sm:$0xff]  }
 0x4f6   :  { %4466 = vmatpush1.bf16.msra.mxu1 %v6265_v25  ;;  %4381 = vmatprep.subr.bf16.mxu0 %v6270_v27  ;;  %v6352_v25 = vld [vmem:[#allocation10 + $0xae0] ss:$16 sps:$4 sm:$0xff]   ;;  %v6355_v27 = vld [vmem:[#allocation10 + $0xae8] ss:$16 sps:$4 sm:$0xff]  }
 0x4f7   :  { %4467 = vmatprep.subr.bf16.mxu1 %v6273_v62  ;;  %v6360_v62 = vld [vmem:[#allocation10 + $0xb04] ss:$16 sps:$4 sm:$0xff]  }
 0x4f9   :  { %4382 = vmatpush1.bf16.msra.mxu0 %v6268_v56  ;;  %v6363_v56 = vld [vmem:[#allocation10 + $0xb0c] ss:$16 sps:$4 sm:$0xff]  }
 0x4fa   :  { %4468 = vmatpush1.bf16.msra.mxu1 %v6271_v39  ;;  %4383 = vmatprep.subr.bf16.mxu0 %v6276_v19  ;;  %v6358_v39 = vld [vmem:[#allocation10 + $0xb00] ss:$16 sps:$4 sm:$0xff]   ;;  %v6361_v19 = vld [vmem:[#allocation10 + $0xb08] ss:$16 sps:$4 sm:$0xff]  }
 0x4fb   :  { %4469 = vmatprep.subr.bf16.mxu1 %v6279_v36  ;;  %v6366_v36 = vld [vmem:[#allocation10 + $0xb24] ss:$16 sps:$4 sm:$0xff]  }
 0x4fd   :  { %4384 = vmatpush1.bf16.msra.mxu0 %v6274_v46  ;;  %v6369_v46 = vld [vmem:[#allocation10 + $0xb2c] ss:$16 sps:$4 sm:$0xff]  }
 0x4fe   :  { %4470 = vmatpush1.bf16.msra.mxu1 %v6277_v28  ;;  %4385 = vmatprep.subr.bf16.mxu0 %v6282_v54  ;;  %v6364_v28 = vld [vmem:[#allocation10 + $0xb20] ss:$16 sps:$4 sm:$0xff]   ;;  %v6367_v54 = vld [vmem:[#allocation10 + $0xb28] ss:$16 sps:$4 sm:$0xff]  }
 0x4ff   :  { %4471 = vmatprep.subr.bf16.mxu1 %v6285_v57  ;;  %v6372_v57 = vld [vmem:[#allocation10 + $0xb44] ss:$16 sps:$4 sm:$0xff]  }
 0x501   :  { %4386 = vmatpush1.bf16.msra.mxu0 %v6280_v60  ;;  %v6375_v60 = vld [vmem:[#allocation10 + $0xb4c] ss:$16 sps:$4 sm:$0xff]  }
 0x502   :  { %4472 = vmatpush1.bf16.msra.mxu1 %v6283_v61  ;;  %4387 = vmatprep.subr.bf16.mxu0 %v6288_v63  ;;  %v6370_v61 = vld [vmem:[#allocation10 + $0xb40] ss:$16 sps:$4 sm:$0xff]   ;;  %v6373_v63 = vld [vmem:[#allocation10 + $0xb48] ss:$16 sps:$4 sm:$0xff]  }
 0x503   :  { %4473 = vmatprep.subr.bf16.mxu1 %v6291_v2  ;;  %v6378_v2 = vld [vmem:[#allocation10 + $0xb64] ss:$16 sps:$4 sm:$0xff]  }
 0x505   :  { %4388 = vmatpush1.bf16.msra.mxu0 %v6286_v3  ;;  %v6381_v3 = vld [vmem:[#allocation10 + $0xb6c] ss:$16 sps:$4 sm:$0xff]  }
 0x506   :  { %4474 = vmatpush1.bf16.msra.mxu1 %v6289_v4  ;;  %4389 = vmatprep.subr.bf16.mxu0 %v6294_v5  ;;  %v6376_v4 = vld [vmem:[#allocation10 + $0xb60] ss:$16 sps:$4 sm:$0xff]   ;;  %v6379_v5 = vld [vmem:[#allocation10 + $0xb68] ss:$16 sps:$4 sm:$0xff]  }
 0x507   :  { %4475 = vmatprep.subr.bf16.mxu1 %v6297_v13  ;;  %v6384_v13 = vld [vmem:[#allocation10 + $0xb84] ss:$16 sps:$4 sm:$0xff]  }
 0x509   :  { %4390 = vmatpush1.bf16.msra.mxu0 %v6292_v20  ;;  %v6387_v20 = vld [vmem:[#allocation10 + $0xb8c] ss:$16 sps:$4 sm:$0xff]  }
 0x50a   :  { %4476 = vmatpush1.bf16.msra.mxu1 %v6295_v6  ;;  %4391 = vmatprep.subr.bf16.mxu0 %v6300_v10  ;;  %v6382_v6 = vld [vmem:[#allocation10 + $0xb80] ss:$16 sps:$4 sm:$0xff]   ;;  %v6385_v10 = vld [vmem:[#allocation10 + $0xb88] ss:$16 sps:$4 sm:$0xff]  }
 0x50b   :  { %4477 = vmatprep.subr.bf16.mxu1 %v6303_v12  ;;  %v6390_v12 = vld [vmem:[#allocation10 + $0xba4] ss:$16 sps:$4 sm:$0xff]  }
 0x50d   :  { %4392 = vmatpush1.bf16.msra.mxu0 %v6298_v45  ;;  %v6393_v45 = vld [vmem:[#allocation10 + $0xbac] ss:$16 sps:$4 sm:$0xff]  }
 0x50e   :  { %4478 = vmatpush1.bf16.msra.mxu1 %v6301_v18  ;;  %4393 = vmatprep.subr.bf16.mxu0 %v6306_v58  ;;  %v6388_v18 = vld [vmem:[#allocation10 + $0xba0] ss:$16 sps:$4 sm:$0xff]   ;;  %v6391_v58 = vld [vmem:[#allocation10 + $0xba8] ss:$16 sps:$4 sm:$0xff]  }
 0x50f   :  { %4479 = vmatprep.subr.bf16.mxu1 %v6309_v16  ;;  %v6396_v16 = vld [vmem:[#allocation10 + $0xbc4] ss:$16 sps:$4 sm:$0xff]  }
 0x511   :  { %4394 = vmatpush1.bf16.msra.mxu0 %v6304_v9  ;;  %v6399_v9 = vld [vmem:[#allocation10 + $0xbcc] ss:$16 sps:$4 sm:$0xff]  }
 0x512   :  { %4480 = vmatpush1.bf16.msra.mxu1 %v6307_v53  ;;  %4406 = vmatprep.subr.bf16.mxu0 %v6312_v42  ;;  %v6394_v53 = vld [vmem:[#allocation10 + $0xbc0] ss:$16 sps:$4 sm:$0xff]   ;;  %v6397_v42 = vld [vmem:[#allocation10 + $0xbc8] ss:$16 sps:$4 sm:$0xff]  }
 0x513   :  { %4492 = vmatprep.subr.bf16.mxu1 %v6315_v55  ;;  %v6402_v55 = vld [vmem:[#allocation10 + $0xbe4] ss:$16 sps:$4 sm:$0xff]  }
 0x514   :  { %4396 = vmatmul.mubr.bf16.vlgmr.msra.gmra.mrb[28].mxu0 %v7194_v11 }
 0x515   :  { %4482 = vmatmul.mubr.bf16.vlgmr.msra.gmra.mrb[28].mxu1 %v7194_v11  ;;  %4407 = vmatpush1.bf16.msra.mxu0 %v6310_v29  ;;  %v6333_v11 = vld [vmem:[#allocation10 + $0xa6c] ss:$16 sps:$4 sm:$0xff]  }
 0x516   :  { %4438 = vmatprep.mubr.bf16.mxu0 %v7203_v44  ;;  %4493 = vmatpush1.bf16.msra.mxu1 %v6313_v52  ;;  %v6405_v29 = vld [vmem:[#allocation10 + $0xbec] ss:$16 sps:$4 sm:$0xff]   ;;  %v6400_v52 = vld [vmem:[#allocation10 + $0xbe0] ss:$16 sps:$4 sm:$0xff]  }
 0x517   :  { %4524 = vmatprep.mubr.bf16.mxu1 %v7203_v44  ;;  %4408 = vmatprep.subr.bf16.mxu0 %v6318_v49  ;;  %v6334_v44 = vld [vmem:[#allocation10 + $0xa80] ss:$16 sps:$4 sm:$0xff]   ;;  %v6403_v49 = vld [vmem:[#allocation10 + $0xbe8] ss:$16 sps:$4 sm:$0xff]  }
 0x518   :  { %4494 = vmatprep.subr.bf16.mxu1 %v6321_v21 }
 0x519   :  { %4409 = vmatpush1.bf16.msra.mxu0 %v6316_v22 }
 0x51a   :  { %4495 = vmatpush1.bf16.msra.mxu1 %v6319_v59  ;;  %4410 = vmatprep.subr.bf16.mxu0 %v6324_v41  ;;  %v5325_v59 = vld [vmem:[#allocation14 + $0x1] ss:$0 sm:$0xff] }
 0x51b   :  { %4496 = vmatprep.subr.bf16.mxu1 %v6327_v8 }
 0x51d   :  { %4411 = vmatpush1.bf16.msra.mxu0 %v6322_v23 }
 0x51e   :  { %4497 = vmatpush1.bf16.msra.mxu1 %v6325_v7  ;;  %4412 = vmatprep.subr.bf16.mxu0 %v6330_v26 }
 0x51f   :  { %4498 = vmatprep.subr.bf16.mxu1 %v6333_v11 }
 0x521   :  { %4413 = vmatpush1.bf16.msra.mxu0 %v6328_v30 }
 0x522   :  { %4499 = vmatpush1.bf16.msra.mxu1 %v6331_v0  ;;  %4414 = vmatprep.subr.bf16.mxu0 %v6336_v33 }
 0x523   :  { %4500 = vmatprep.subr.bf16.mxu1 %v6339_v34 }
 0x525   :  { %4415 = vmatpush1.bf16.msra.mxu0 %v6334_v44 }
 0x526   :  { %4501 = vmatpush1.bf16.msra.mxu1 %v6337_v1  ;;  %4416 = vmatprep.subr.bf16.mxu0 %v6342_v38 }
 0x527   :  { %4502 = vmatprep.subr.bf16.mxu1 %v6345_v14 }
 0x529   :  { %4417 = vmatpush1.bf16.msra.mxu0 %v6340_v43  ;;  %v6406_v43 = vld [vmem:[#allocation13 + $0x240] sm:$0xff]  }
 0x52a   :  { %4503 = vmatpush1.bf16.msra.mxu1 %v6343_v17  ;;  %4418 = vmatprep.subr.bf16.mxu0 %v6348_v31  ;;  %v6408_v17 = vld [vmem:[#allocation13 + $0x200] sm:$0xff]  }
 0x52b   :  { %4504 = vmatprep.subr.bf16.mxu1 %v6351_v40  ;;  %v6409_v31 = vld [vmem:[#allocation13 + $0x280] sm:$0xff]   ;;  %v6410_v40 = vld [vmem:[#allocation13 + $0x248] sm:$0xff]  }
 0x52d   :  { %4419 = vmatpush1.bf16.msra.mxu0 %v6346_v32  ;;  %v6411_v32 = vld [vmem:[#allocation13 + $0x2c8] sm:$0xff]  }
 0x52e   :  { %4505 = vmatpush1.bf16.msra.mxu1 %v6349_v37  ;;  %4420 = vmatprep.subr.bf16.mxu0 %v6354_v24  ;;  %v6412_v37 = vld [vmem:[#allocation13 + $0x208] sm:$0xff]  }
 0x52f   :  { %4506 = vmatprep.subr.bf16.mxu1 %v6357_v35  ;;  %v6413_v24 = vld [vmem:[#allocation13 + $0x288] sm:$0xff]   ;;  %v6414_v35 = vld [vmem:[#allocation13 + $0x250] sm:$0xff]  }
 0x531   :  { %4421 = vmatpush1.bf16.msra.mxu0 %v6352_v25  ;;  %v6415_v25 = vld [vmem:[#allocation13 + $0x2d0] sm:$0xff]  }
 0x532   :  { %4507 = vmatpush1.bf16.msra.mxu1 %v6355_v27  ;;  %4422 = vmatprep.subr.bf16.mxu0 %v6360_v62  ;;  %v6416_v27 = vld [vmem:[#allocation13 + $0x210] sm:$0xff]  }
 0x533   :  { %4508 = vmatprep.subr.bf16.mxu1 %v6363_v56  ;;  %v6417_v62 = vld [vmem:[#allocation13 + $0x290] sm:$0xff]   ;;  %v6418_v56 = vld [vmem:[#allocation13 + $0x258] sm:$0xff]  }
 0x535   :  { %4423 = vmatpush1.bf16.msra.mxu0 %v6358_v39  ;;  %v6419_v39 = vld [vmem:[#allocation13 + $0x2d8] sm:$0xff]  }
 0x536   :  { %4509 = vmatpush1.bf16.msra.mxu1 %v6361_v19  ;;  %4424 = vmatprep.subr.bf16.mxu0 %v6366_v36  ;;  %v6420_v19 = vld [vmem:[#allocation13 + $0x218] sm:$0xff]  }
 0x537   :  { %4510 = vmatprep.subr.bf16.mxu1 %v6369_v46  ;;  %v6421_v36 = vld [vmem:[#allocation13 + $0x298] sm:$0xff]   ;;  %v6422_v46 = vld [vmem:[#allocation13 + $0x260] sm:$0xff]  }
 0x539   :  { %4425 = vmatpush1.bf16.msra.mxu0 %v6364_v28  ;;  %v6423_v28 = vld [vmem:[#allocation13 + $0x2e0] sm:$0xff]  }
 0x53a   :  { %4511 = vmatpush1.bf16.msra.mxu1 %v6367_v54  ;;  %4426 = vmatprep.subr.bf16.mxu0 %v6372_v57  ;;  %v6424_v54 = vld [vmem:[#allocation13 + $0x220] sm:$0xff]  }
 0x53b   :  { %4512 = vmatprep.subr.bf16.mxu1 %v6375_v60  ;;  %v6425_v57 = vld [vmem:[#allocation13 + $0x2a0] sm:$0xff]   ;;  %v6426_v60 = vld [vmem:[#allocation13 + $0x268] sm:$0xff]  }
 0x53d   :  { %4427 = vmatpush1.bf16.msra.mxu0 %v6370_v61  ;;  %v6427_v61 = vld [vmem:[#allocation13 + $0x2e8] sm:$0xff]  }
 0x53e   :  { %4513 = vmatpush1.bf16.msra.mxu1 %v6373_v63  ;;  %4428 = vmatprep.subr.bf16.mxu0 %v6378_v2  ;;  %v6428_v63 = vld [vmem:[#allocation13 + $0x228] sm:$0xff]  }
 0x53f   :  { %4514 = vmatprep.subr.bf16.mxu1 %v6381_v3  ;;  %v6429_v2 = vld [vmem:[#allocation13 + $0x2a8] sm:$0xff]   ;;  %v6430_v3 = vld [vmem:[#allocation13 + $0x270] sm:$0xff]  }
 0x541   :  { %4429 = vmatpush1.bf16.msra.mxu0 %v6376_v4  ;;  %v6431_v4 = vld [vmem:[#allocation13 + $0x2f0] sm:$0xff]  }
 0x542   :  { %4515 = vmatpush1.bf16.msra.mxu1 %v6379_v5  ;;  %4430 = vmatprep.subr.bf16.mxu0 %v6384_v13  ;;  %v6432_v5 = vld [vmem:[#allocation13 + $0x230] sm:$0xff]  }
 0x543   :  { %4516 = vmatprep.subr.bf16.mxu1 %v6387_v20  ;;  %v6433_v13 = vld [vmem:[#allocation13 + $0x2b0] sm:$0xff]   ;;  %v6434_v20 = vld [vmem:[#allocation13 + $0x278] sm:$0xff]  }
 0x545   :  { %4431 = vmatpush1.bf16.msra.mxu0 %v6382_v6  ;;  %v6435_v6 = vld [vmem:[#allocation13 + $0x2f8] sm:$0xff]  }
 0x546   :  { %4517 = vmatpush1.bf16.msra.mxu1 %v6385_v10  ;;  %4432 = vmatprep.subr.bf16.mxu0 %v6390_v12  ;;  %v6436_v10 = vld [vmem:[#allocation13 + $0x238] sm:$0xff]  }
 0x547   :  { %4518 = vmatprep.subr.bf16.mxu1 %v6393_v45  ;;  %v6437_v12 = vld [vmem:[#allocation13 + $0x2b8] sm:$0xff]  }
 0x548   :  { %v3701_v45 = vld [vmem:[#allocation11 + $0x8] sm:$0xf] }
 0x549   :  { %4433 = vmatpush1.bf16.msra.mxu0 %v6388_v18  ;;  %v3706_v18 = vrot.slane %v3701_v45, %v7047_v47 }
 0x54a   :  { %4519 = vmatpush1.bf16.msra.mxu1 %v6391_v58  ;;  %4434 = vmatprep.subr.bf16.mxu0 %v6396_v16  ;;  %v3714_v58 = vrot.slane %v3701_v45, %v7050_v48  ;;  %v3710_v16 = vrot.slane %v3701_v45, %v7055_v50 }
 0x54b   :  { %4520 = vmatprep.subr.bf16.mxu1 %v6399_v9  ;;  %v3718_v9 = vrot.slane %v3701_v45, %v7058_v51 }
 0x54d   :  { %4435 = vmatpush1.bf16.msra.mxu0 %v6394_v53 }
 0x54e   :  { %4521 = vmatpush1.bf16.msra.mxu1 %v6397_v42  ;;  %4436 = vmatprep.subr.bf16.mxu0 %v6402_v55 }
 0x54f   :  { %4522 = vmatprep.subr.bf16.mxu1 %v6405_v29 }
 0x551   :  { %4437 = vmatpush1.bf16.msra.mxu0 %v6400_v52 }
 0x552   :  { %4523 = vmatpush1.bf16.msra.mxu1 %v6403_v49  ;;  %5615 = vmatprep.subr.bf16.mxu0 %v6406_v43 }
 0x554   :  { %4439 = vmatmul.mubr.bf16.vlgmr.msra.gmra.mrb[28].mxu0 %v7198_v15 }
 0x555   :  { %4525 = vmatmul.mubr.bf16.vlgmr.msra.gmra.mrb[28].mxu1 %v7198_v15  ;;  %v6407_v15 = vld [vmem:[#allocation13 + $0x2c0] sm:$0xff]   ;;  %5616 = vmatpush3.bf16.msra.mxu0 %v6408_v17 }
 0x556   :  { %5637 = vmatprep.subr.bf16.mxu1 %v6407_v15  ;;  %5617 = vmatprep.subr.bf16.mxu0 %v6410_v40 }
 0x557   :  { %5638 = vmatpush3.bf16.msra.mxu1 %v6409_v31 }
 0x558   :  { %5639 = vmatprep.subr.bf16.mxu1 %v6411_v32 }
 0x559   :  { %5618 = vmatpush3.bf16.msra.mxu0 %v6412_v37 }
 0x55a   :  { %5619 = vmatprep.subr.bf16.mxu0 %v6414_v35 }
 0x55b   :  { %5640 = vmatpush3.bf16.msra.mxu1 %v6413_v24 }
 0x55c   :  { %5641 = vmatprep.subr.bf16.mxu1 %v6415_v25 }
 0x55d   :  { %5620 = vmatpush3.bf16.msra.mxu0 %v6416_v27 }
 0x55e   :  { %5621 = vmatprep.subr.bf16.mxu0 %v6418_v56 }
 0x55f   :  { %5642 = vmatpush3.bf16.msra.mxu1 %v6417_v62 }
 0x560   :  { %5643 = vmatprep.subr.bf16.mxu1 %v6419_v39 }
 0x561   :  { %5622 = vmatpush3.bf16.msra.mxu0 %v6420_v19 }
 0x562   :  { %5623 = vmatprep.subr.bf16.mxu0 %v6422_v46 }
 0x563   :  { %5644 = vmatpush3.bf16.msra.mxu1 %v6421_v36 }
 0x564   :  { %5645 = vmatprep.subr.bf16.mxu1 %v6423_v28 }
 0x565   :  { %5624 = vmatpush3.bf16.msra.mxu0 %v6424_v54 }
 0x566   :  { %5625 = vmatprep.subr.bf16.mxu0 %v6426_v60 }
 0x567   :  { %5646 = vmatpush3.bf16.msra.mxu1 %v6425_v57 }
 0x568   :  { %5647 = vmatprep.subr.bf16.mxu1 %v6427_v61 }
 0x569   :  { %5626 = vmatpush3.bf16.msra.mxu0 %v6428_v63 }
 0x56a   :  { %5627 = vmatprep.subr.bf16.mxu0 %v6430_v3 }
 0x56b   :  { %5648 = vmatpush3.bf16.msra.mxu1 %v6429_v2 }
 0x56c   :  { %5649 = vmatprep.subr.bf16.mxu1 %v6431_v4 }
 0x56d   :  { %5628 = vmatpush3.bf16.msra.mxu0 %v6432_v5 }
 0x56e   :  { %5629 = vmatprep.subr.bf16.mxu0 %v6434_v20 }
 0x56f   :  { %5650 = vmatpush3.bf16.msra.mxu1 %v6433_v13 }
 0x570   :  { %5651 = vmatprep.subr.bf16.mxu1 %v6435_v6 }
 0x571   :  { %5630 = vmatpush3.bf16.msra.mxu0 %v6436_v10 }
 0x573   :  { %5652 = vmatpush3.bf16.msra.mxu1 %v6437_v12 }
 0x5a7   :  { %v5587_v21 = vpop.f32.mrb[24].mxu0 }
 0x5a8   :  { %v5609_v22 = vpop.f32.mrb[24].mxu1  ;;  %v5588_v41 = vpop.f32.mrb[25].mxu0 }
 0x5a9   :  { %v5589_v8 = vadd.f32 %v5588_v41, %v5587_v21  ;;  %v5610_v23 = vpop.f32.mrb[25].mxu1  ;;  %v5590_v7 = vpop.f32.mrb[26].mxu0 }
 0x5aa   :  { %v5611_v26 = vadd.f32 %v5610_v23, %v5609_v22  ;;  %v5612_v11 = vpop.f32.mrb[26].mxu1  ;;  %v5591_v30 = vpop.f32.mrb[27].mxu0 }
 0x5ab   :  { %v3518_v0 = vadd.f32 %v5589_v8, %v5325_v59  ;;  %v5592_v33 = vadd.f32 %v5591_v30, %v5590_v7  ;;  %v5613_v34 = vpop.f32.mrb[27].mxu1 }
 0x5ac   :  { %v5614_v44 = vadd.f32 %v5613_v34, %v5612_v11 }
 0x5ad   :  { %v3559_v1 = vadd.f32 %v5611_v26, %v3518_v0  ;;  %v3521_v38 = vadd.f32 %v5592_v33, %v5325_v59 }
 0x5af   :  { %3565 = vst [vmem:[#allocation16 + $0x8] sm:$0xff] %v3559_v1  ;;  %v3562_v14 = vadd.f32 %v5614_v44, %v3521_v38 }
 0x5b1   :  { %3566 = vst [vmem:[#allocation16 + $0x20] sm:$0xff] %v3562_v14 }
 0x627   :  { %v4440_v53 = vpop.f32.mrb[28].mxu0 }
 0x628   :  { %v5675_v42 = vadd.f32 %v4440_v53, %v3706_v18  ;;  %v4526_v55 = vpop.f32.mrb[28].mxu1  ;;  %v4442_v29 = vpop.f32.mrb[29].mxu0 }
 0x629   :  { %v5679_v52 = vadd.f32 %v4526_v55, %v3714_v58  ;;  %v7243_v49 = vadd.f32 %v4442_v29, %v3710_v16  ;;  %v4528_v21 = vpop.f32.mrb[29].mxu1  ;;  %v4444_v22 = vpop.f32.mrb[30].mxu0 }
 0x62a   :  { %v5486_v59 = vmul.f32 -1.442695, %v5675_v42  ;;  %v5680_v41 = vadd.f32 %v4528_v21, %v3718_v9  ;;  %v5677_v8 = vadd.f32 %v4444_v22, %v3706_v18  ;;  %v4530_v23 = vpop.f32.mrb[30].mxu1  ;;  %v4446_v47 = vpop.f32.mrb[31].mxu0 }
 0x62b   :  { %v5488_v7 = vmul.f32 -1.442695, %v5679_v52  ;;  %v5487_v48 = vmul.f32 -1.442695, %v7243_v49  ;;  %v5681_v50 = vadd.f32 %v4530_v23, %v3714_v58  ;;  %v5678_v26 = vadd.f32 %v4446_v47, %v3710_v16  ;;  %v4532_v51 = vpop.f32.mrb[31].mxu1 }
 0x62c   :  { %6598 = vpow2.f32 %v5486_v59  ;;  %v5489_v11 = vmul.f32 -1.442695, %v5680_v41  ;;  %v5490_v30 = vmul.f32 -1.442695, %v5677_v8  ;;  %v5682_v0 = vadd.f32 %v4532_v51, %v3718_v9  ;;  %v5494_v16 = vld [vmem:[#allocation14 + $0x2] ss:$0 sm:$0xff] }
 0x62d   :  { %6600 = vpow2.f32 %v5488_v7  ;;  %v5492_v33 = vmul.f32 -1.442695, %v5681_v50  ;;  %v5491_v34 = vmul.f32 -1.442695, %v5678_v26 }
 0x62e   :  { %6602 = vpow2.f32 %v5487_v48  ;;  %v5493_v44 = vmul.f32 -1.442695, %v5682_v0 }
 0x62f   :  { %6604 = vpow2.f32 %v5489_v11 }
 0x630   :  { %6606 = vpow2.f32 %v5490_v30 }
 0x631   :  { %6608 = vpow2.f32 %v5492_v33 }
 0x632   :  { %6610 = vpow2.f32 %v5491_v34 }
 0x633   :  { %6612 = vpow2.f32 %v5493_v44 }
 0x636   :  { %v6599_v1 = vpop.eup %6598 }
 0x637   :  { %v6601_v38 = vpop.eup %6600  ;;  %v4559_v14 = vadd.f32 1.0, %v6599_v1 }
 0x638   :  { %v6603_v43 = vpop.eup %6602  ;;  %v4561_v15 = vadd.f32 1.0, %v6601_v38 }
 0x639   :  { %v6605_v17 = vpop.eup %6604  ;;  %6614 = vrcp.f32 %v4559_v14  ;;  %v4560_v31 = vadd.f32 1.0, %v6603_v43 }
 0x63a   :  { %v6607_v40 = vpop.eup %6606  ;;  %6616 = vrcp.f32 %v4561_v15  ;;  %v4562_v32 = vadd.f32 1.0, %v6605_v17 }
 0x63b   :  { %v6609_v37 = vpop.eup %6608  ;;  %6618 = vrcp.f32 %v4560_v31  ;;  %v4563_v24 = vadd.f32 1.0, %v6607_v40 }
 0x63c   :  { %v6611_v35 = vpop.eup %6610  ;;  %6620 = vrcp.f32 %v4562_v32  ;;  %v4565_v25 = vadd.f32 1.0, %v6609_v37 }
 0x63d   :  { %v6613_v27 = vpop.eup %6612  ;;  %6622 = vrcp.f32 %v4563_v24  ;;  %v4564_v62 = vadd.f32 1.0, %v6611_v35 }
 0x63e   :  { %6624 = vrcp.f32 %v4565_v25  ;;  %v4566_v56 = vadd.f32 1.0, %v6613_v27 }
 0x63f   :  { %6626 = vrcp.f32 %v4564_v62 }
 0x640   :  { %6628 = vrcp.f32 %v4566_v56 }
 0x643   :  { %v6615_v39 = vpop.eup %6614 }
 0x644   :  { %v6617_v19 = vpop.eup %6616  ;;  %v4583_v57 = vmul.f32 %v6615_v39, %v5675_v42 }
 0x645   :  { %v6619_v36 = vpop.eup %6618  ;;  %v4585_v63 = vmul.f32 %v6617_v19, %v5679_v52 }
 0x646   :  { %v6621_v46 = vpop.eup %6620  ;;  %v4584_v4 = vmul.f32 %v6619_v36, %v7243_v49 }
 0x647   :  { %v6623_v28 = vpop.eup %6622  ;;  %v4586_v20 = vmul.f32 %v6621_v46, %v5680_v41 }
 0x648   :  { %v6625_v54 = vpop.eup %6624  ;;  %v4587_v60 = vmul.f32 %v6623_v28, %v5677_v8 }
 0x649   :  { %v6627_v61 = vpop.eup %6626  ;;  %v4589_v2 = vmul.f32 %v6625_v54, %v5681_v50 }
 0x64a   :  { %v6629_v3 = vpop.eup %6628  ;;  %v4591_v5 = vpack.c.bf16 %v4587_v60, %v4583_v57  ;;  %v4588_v13 = vmul.f32 %v6627_v61, %v5678_v26 }
 0x64b   :  { %v4593_v6 = vpack.c.bf16 %v4589_v2, %v4585_v63  ;;  %v4590_v10 = vmul.f32 %v6629_v3, %v5682_v0 }
 0x64c   :  { %v4592_v12 = vpack.c.bf16 %v4588_v13, %v4584_v4 }
 0x64d   :  { %v4594_v45 = vpack.c.bf16 %v4590_v10, %v4586_v20 }
 0x64e   :  { %4892 = vmatprep.mubr.bf16.mxu0 %v4592_v12 }
 0x64f   :  { %4933 = vmatprep.mubr.bf16.mxu1 %v4594_v45  ;;  %4893 = vmatmul.mubr.bf16.vlgmr.msra.gmra.mrb[32].mxu0 %v4591_v5 }
 0x650   :  { %4934 = vmatmul.mubr.bf16.vlgmr.msra.gmra.mrb[32].mxu1 %v4593_v6 }
 0x722   :  { %v5631_v18 = vpop.f32.mrb[32].mxu0 }
 0x723   :  { %v5653_v58 = vpop.f32.mrb[32].mxu1  ;;  %v5632_v9 = vpop.f32.mrb[33].mxu0 }
 0x724   :  { %v5633_v53 = vadd.f32 %v5632_v9, %v5631_v18  ;;  %v5654_v42 = vpop.f32.mrb[33].mxu1  ;;  %v5634_v55 = vpop.f32.mrb[34].mxu0 }
 0x725   :  { %v5655_v29 = vadd.f32 %v5654_v42, %v5653_v58  ;;  %v5656_v52 = vpop.f32.mrb[34].mxu1  ;;  %v5635_v49 = vpop.f32.mrb[35].mxu0 }
 0x726   :  { %v4895_v21 = vadd.f32 %v5633_v53, %v5494_v16  ;;  %v5636_v22 = vadd.f32 %v5635_v49, %v5634_v55  ;;  %v5657_v59 = vpop.f32.mrb[35].mxu1 }
 0x727   :  { %v5658_v41 = vadd.f32 %v5657_v59, %v5656_v52 }
 0x728   :  { %v4936_v8 = vadd.f32 %v5655_v29, %v4895_v21  ;;  %v4898_v23 = vadd.f32 %v5636_v22, %v5494_v16 }
 0x72a   :  { %4942 = vst [vmem:[#allocation16 + $0x10] sm:$0xff] %v4936_v8  ;;  %v4939_v47 = vadd.f32 %v5658_v41, %v4898_v23 }
 0x72c   :  { %4943 = vst [vmem:[#allocation16 + $0x28] sm:$0xff] %v4939_v47 }
 0x72d   :  { %6817 = shalt.err (!%p6814_p12)
}
 0x72e   :  { %s6818_s27 = scalar_lea.hbm %s7268_s9, 768 }
 0x72f   :  { %p6819_p13 = scmp.ne.s32.totalorder %s7268_s9, %s6818_s27  ;;  %p6822_p0 = scmp.lt.u32.totalorder %s6818_s27, %s7268_s9 }
 0x731   :  { %p6824_p1 = pnand %p6822_p0, %p6819_p13 }
 0x733   :  { %6827 = shalt.err (!%p6824_p1)
}
 0x734   :  { %s6859_s30 = smov 384   ;;  %s6860_s5 = smov 24  }
 0x735   :  { %4955 = dma.vmem_to_hbm [thread:$0]  %s4950_s22, 768, %s7268_s9, [#allocation4], %s6859_s30, %s6859_s30, %s6860_s5  }
 0x736   :  { %6838 = dma.done.wait [#allocation4], 768  }
 0x737   :  { %6839 = vsyncadd [#allocation4], 4294966528 }
 0x738   :  { %4959 = vsyncpa [#allocation3], 1 }
 0x739   :  { %4960 = vsyncpa [#allocation6], 1 }
 0x73a   :  { %4961 = vsyncpa [#allocation9], 1 }
 0x73b   :  { %4962 = vsyncpa [#allocation12], 1 }
 0x73c   :  { %4963 = vsyncpa [#allocation15], 1 }
 0x73d   :  { %4964 = vsyncpa [#allocation4], 1 }

</bundles_post_ra>
